<compile_context>
chip_gen: v7x
topology: tpu7x:2x2x1
jax: 0.10.0
libtpu: 0.0.40
codegen_flags: <defaults>
</compile_context>

<pallas_src>
import functools

import jax
import jax.numpy as jnp
from jax.experimental import pallas as pl
from jax.experimental.pallas import tpu as pltpu

_EPS = 1e-5                      # PyTorch GroupNorm default eps
_INV_SQRT2 = 0.7071067811865476


def _gelu_exact(x):
    # PyTorch nn.GELU() default: exact erf formulation.
    return 0.5 * x * (1.0 + jax.lax.erf(x * _INV_SQRT2))


# ----------------------------------------------------------------------------
# Fully fused kernel: conv1 -> GN(1) -> GELU -> conv2 -> GN(1) [-> +x -> GELU]
# One batch sample per grid step. Output is lane-dense (Cout, H*W).
# ----------------------------------------------------------------------------
def _double_conv_kernel(*refs, H, W, Cin, Cmid, Cout, residual):
    if residual:
        (x_ref, w1_ref, g1_ref, b1_ref, w2_ref, g2_ref, b2_ref,
         r_ref, o_ref, hpad_ref) = refs
    else:
        (x_ref, w1_ref, g1_ref, b1_ref, w2_ref, g2_ref, b2_ref,
         o_ref, hpad_ref) = refs
        r_ref = None

    HW = H * W

    # ---- Conv1: implicit GEMM, 9 shifted windows of the padded sample ----
    acc1 = jnp.zeros((HW, Cmid), jnp.float32)
    for kh in range(3):
        for kw in range(3):
            win = x_ref[0, kh:kh + H, kw:kw + W, :].reshape(HW, Cin)      # bf16 (HW,Cin)
            acc1 = acc1 + jnp.dot(win, w1_ref[kh * 3 + kw],
                                  preferred_element_type=jnp.float32)

    # ---- GroupNorm(num_groups=1) over the whole sample (two-pass, f32) + GELU ----
    inv_n1 = 1.0 / (HW * Cmid)
    mean1 = jnp.sum(acc1) * inv_n1
    cen1 = acc1 - mean1
    var1 = jnp.sum(cen1 * cen1) * inv_n1
    h = cen1 * jax.lax.rsqrt(var1 + _EPS)
    h = h * g1_ref[...] + b1_ref[...]                                     # (1,Cmid) bcast
    h = _gelu_exact(h)

    # ---- Stage intermediate in VMEM with a 1-pixel zero halo (== padding=1) ----
    hpad_ref[...] = jnp.zeros_like(hpad_ref)
    hpad_ref[1:H + 1, 1:W + 1, :] = h.reshape(H, W, Cmid)

    # ---- Conv2: implicit GEMM on the staged (never-leaves-VMEM) intermediate ----
    acc2 = jnp.zeros((HW, Cout), jnp.float32)
    for kh in range(3):
        for kw in range(3):
            win = hpad_ref[kh:kh + H, kw:kw + W, :].reshape(HW, Cmid)
            win = win.astype(jnp.bfloat16)       # same quantization point as reference
            acc2 = acc2 + jnp.dot(win, w2_ref[kh * 3 + kw],
                                  preferred_element_type=jnp.float32)

    # ---- GroupNorm(num_groups=1); epilogue on the lane-dense (Cout, HW) tile ----
    inv_n2 = 1.0 / (HW * Cout)
    mean2 = jnp.sum(acc2) * inv_n2
    cen2 = acc2 - mean2
    var2 = jnp.sum(cen2 * cen2) * inv_n2
    y = (cen2 * jax.lax.rsqrt(var2 + _EPS)).T                             # (Cout, HW)
    y = y * g2_ref[...] + b2_ref[...]                                     # (Cout,1) bcast

    if residual:
        y = _gelu_exact(y + r_ref[0])                                     # f32 residual

    o_ref[0] = y.astype(o_ref.dtype)


# ----------------------------------------------------------------------------
# Parameter construction & weight reshaping.
# ----------------------------------------------------------------------------
def _weight_to_taps(w_oihw):
    # (Cout, Cin, 3, 3) -> (9, Cin, Cout) bf16; tap index t = kh*3 + kw.
    cout, cin, kh, kw = w_oihw.shape
    return jnp.transpose(w_oihw, (2, 3, 1, 0)).reshape(kh * kw, cin, cout).astype(jnp.bfloat16)


def init_double_conv_params(key, in_channels, out_channels, mid_channels=None):
    if not mid_channels:
        mid_channels = out_channels
    k1, k2 = jax.random.split(key)
    w1 = jax.random.normal(k1, (mid_channels, in_channels, 3, 3), jnp.float32) * 0.1
    w2 = jax.random.normal(k2, (out_channels, mid_channels, 3, 3), jnp.float32) * 0.1
    return dict(
        w1=w1, g1=jnp.ones((mid_channels,), jnp.float32), b1=jnp.zeros((mid_channels,), jnp.float32),
        w2=w2, g2=jnp.ones((out_channels,), jnp.float32), b2=jnp.zeros((out_channels,), jnp.float32),
    )


def double_conv(x_nchw, params, *, residual=False):
    """Forward pass of DoubleConv. x_nchw: (N, Cin, H, W) f32 -> (N, Cout, H, W) f32."""
    N, Cin, H, W = x_nchw.shape
    Cmid = params["w1"].shape[0]
    Cout = params["w2"].shape[0]
    HW = H * W
    if residual:
        assert Cin == Cout, "residual DoubleConv requires in_channels == out_channels"

    # bf16 NHWC activations with a 1-pixel halo (zero padding == Conv2d padding=1).
    x_nhwc = jnp.transpose(x_nchw, (0, 2, 3, 1))
    xp = jnp.pad(x_nhwc.astype(jnp.bfloat16), ((0, 0), (1, 1), (1, 1), (0, 0)))

    w1 = _weight_to_taps(params["w1"])                      # (9, Cin,  Cmid) bf16
    w2 = _weight_to_taps(params["w2"])                      # (9, Cmid, Cout) bf16
    g1 = params["g1"].reshape(1, Cmid).astype(jnp.float32)
    b1 = params["b1"].reshape(1, Cmid).astype(jnp.float32)
    g2 = params["g2"].reshape(Cout, 1).astype(jnp.float32)
    b2 = params["b2"].reshape(Cout, 1).astype(jnp.float32)

    in_specs = [
        pl.BlockSpec((1, H + 2, W + 2, Cin), lambda n: (n, 0, 0, 0)),
        pl.BlockSpec((9, Cin, Cmid), lambda n: (0, 0, 0)),
        pl.BlockSpec((1, Cmid), lambda n: (0, 0)),
        pl.BlockSpec((1, Cmid), lambda n: (0, 0)),
        pl.BlockSpec((9, Cmid, Cout), lambda n: (0, 0, 0)),
        pl.BlockSpec((Cout, 1), lambda n: (0, 0)),
        pl.BlockSpec((Cout, 1), lambda n: (0, 0)),
    ]
    inputs = [xp, w1, g1, b1, w2, g2, b2]
    if residual:
        # Full-precision residual already in NCHW-flat (lane-dense) layout; reshape is free.
        in_specs.append(pl.BlockSpec((1, Cout, HW), lambda n: (n, 0, 0)))
        inputs.append(x_nchw.reshape(N, Cout, HW))

    kernel = functools.partial(_double_conv_kernel, H=H, W=W, Cin=Cin,
                               Cmid=Cmid, Cout=Cout, residual=residual)

    # VMEM budget: double-buffered blocks + resident weights + scratch + temporaries.
    blk_x = (H + 2) * (W + 2) * Cin * 2                     # bf16 padded input block
    blk_out = Cout * HW * 4                                 # f32 output block
    blk_res = Cout * HW * 4 if residual else 0
    blk_w = 9 * (Cin * Cmid + Cmid * Cout) * 2              # bf16 weights
    scratch_b = (H + 2) * (W + 2) * Cmid * 4                # f32 halo scratch
    temps = HW * (2 * Cmid + 3 * Cout) * 4                  # f32 in-register temporaries
    vmem = 2 * (blk_x + blk_out + blk_res + blk_w) + scratch_b + temps + (8 << 20)
    vmem = int(min(max(vmem, 16 << 20), 48 << 20))

    y = pl.pallas_call(
        kernel,
        out_shape=jax.ShapeDtypeStruct((N, Cout, HW), jnp.float32),
        grid_spec=pltpu.PrefetchScalarGridSpec(
            num_scalar_prefetch=0,
            grid=(N,),
            in_specs=in_specs,
            out_specs=pl.BlockSpec((1, Cout, HW), lambda n: (n, 0, 0)),
            scratch_shapes=[pltpu.VMEM((H + 2, W + 2, Cmid), jnp.float32)],
        ),
        compiler_params=pltpu.CompilerParams(
            dimension_semantics=("parallel",),
            vmem_limit_bytes=vmem,
        ),
    )(*inputs)

    # (N, Cout, H*W) is already NCHW-flat -> no final transpose.
    return y.reshape(N, Cout, H, W)


# ----------------------------------------------------------------------------
# Pure-JAX reference (same bf16-input / f32-accumulate conv quantization).
# ----------------------------------------------------------------------------
def _ref_double_conv(x, params, *, residual=False):
    def conv(a, w):
        return jax.lax.conv_general_dilated(
            a.astype(jnp.bfloat16), w.astype(jnp.bfloat16), (1, 1), ((1, 1), (1, 1)),
            dimension_numbers=("NCHW", "OIHW", "NCHW"),
            preferred_element_type=jnp.float32)

    def gn(a, g, b):
        mean = a.mean(axis=(1, 2, 3), keepdims=True)
        var = ((a - mean) ** 2).mean(axis=(1, 2, 3), keepdims=True)
        ah = (a - mean) * jax.lax.rsqrt(var + _EPS)
        return ah * g.reshape(1, -1, 1, 1) + b.reshape(1, -1, 1, 1)

    h = _gelu_exact(gn(conv(x, params["w1"]), params["g1"], params["b1"]))
    h = gn(conv(h, params["w2"]), params["g2"], params["b2"])
    return _gelu_exact(x + h) if residual else h


if __name__ == "__main__":
    key = jax.random.PRNGKey(0)
    kx, kp, kxr, kpr = jax.random.split(key, 4)

    fwd = jax.jit(functools.partial(double_conv, residual=False))
    fwd_res = jax.jit(functools.partial(double_conv, residual=True))

    # Non-residual DoubleConv(in=4, out=8), x: (2, 4, 16, 16)
    x = jax.random.normal(kx, (2, 4, 16, 16), jnp.float32)
    params = init_double_conv_params(kp, in_channels=4, out_channels=8)
    out = jax.block_until_ready(fwd(x, params))
    ref = _ref_double_conv(x, params, residual=False)
    assert out.shape == (2, 8, 16, 16)
    assert jnp.allclose(out, ref, rtol=2e-3, atol=2e-3), "non-residual mismatch"

    # Residual DoubleConv(in=8, out=8, residual=True), x: (2, 8, 16, 16)
    xr = jax.random.normal(kxr, (2, 8, 16, 16), jnp.float32)
    params_r = init_double_conv_params(kpr, in_channels=8, out_channels=8)
    out_r = jax.block_until_ready(fwd_res(xr, params_r))
    ref_r = _ref_double_conv(xr, params_r, residual=True)
    assert out_r.shape == (2, 8, 16, 16)
    assert jnp.allclose(out_r, ref_r, rtol=2e-3, atol=2e-3), "residual mismatch"

    print("KERNEL_OK")
</pallas_src>

<mosaic_0001>
module attributes {stable_mosaic.version = 11 : i64} {
  func.func @_double_conv_kernel(%arg0: i32, %arg1: memref<1x18x18x4xbf16, #tpu.memory_space<vmem>>, %arg2: memref<9x4x8xbf16, #tpu.memory_space<vmem>>, %arg3: memref<1x8xf32, #tpu.memory_space<vmem>>, %arg4: memref<1x8xf32, #tpu.memory_space<vmem>>, %arg5: memref<9x8x8xbf16, #tpu.memory_space<vmem>>, %arg6: memref<8x1xf32, #tpu.memory_space<vmem>>, %arg7: memref<8x1xf32, #tpu.memory_space<vmem>>, %arg8: memref<1x8x256xf32, #tpu.memory_space<vmem>>, %arg9: memref<18x18x8xf32, #tpu.memory_space<vmem>>) attributes {dimension_semantics = [#tpu.dimension_semantics<parallel>], iteration_bounds = array<i64: 2>, scalar_prefetch = 0 : i64, scratch_operands = 1 : i64, tpu.core_type = #tpu.core_type<tc>, window_params = [{transform_indices = @transform_0, window_bounds = array<i64: 1, 18, 18, 4>}, {pipeline_mode = #tpu.pipeline_mode<synchronous>, transform_indices = @transform_1, window_bounds = array<i64: 9, 4, 8>}, {pipeline_mode = #tpu.pipeline_mode<synchronous>, transform_indices = @transform_2, window_bounds = array<i64: 1, 8>}, {pipeline_mode = #tpu.pipeline_mode<synchronous>, transform_indices = @transform_3, window_bounds = array<i64: 1, 8>}, {pipeline_mode = #tpu.pipeline_mode<synchronous>, transform_indices = @transform_4, window_bounds = array<i64: 9, 8, 8>}, {pipeline_mode = #tpu.pipeline_mode<synchronous>, transform_indices = @transform_5, window_bounds = array<i64: 8, 1>}, {pipeline_mode = #tpu.pipeline_mode<synchronous>, transform_indices = @transform_6, window_bounds = array<i64: 8, 1>}, {transform_indices = @transform_7, window_bounds = array<i64: 1, 8, 256>}]} {
    %cst = arith.constant 0.000000e+00 : f32
    %0 = vector.broadcast %cst : f32 to vector<256x8xf32>
    %c0 = arith.constant 0 : index
    %c0_0 = arith.constant 0 : index
    %c0_1 = arith.constant 0 : index
    %c0_2 = arith.constant 0 : index
    %1 = vector.load %arg1[%c0, %c0_0, %c0_1, %c0_2] : memref<1x18x18x4xbf16, #tpu.memory_space<vmem>>, vector<1x16x16x4xbf16>
    %2 = vector.shape_cast %1 : vector<1x16x16x4xbf16> to vector<16x16x4xbf16>
    %3 = vector.shape_cast %2 : vector<16x16x4xbf16> to vector<256x4xbf16>
    %c0_3 = arith.constant 0 : index
    %c0_4 = arith.constant 0 : index
    %c0_5 = arith.constant 0 : index
    %4 = vector.load %arg2[%c0_3, %c0_4, %c0_5] : memref<9x4x8xbf16, #tpu.memory_space<vmem>>, vector<1x4x8xbf16>
    %5 = vector.shape_cast %4 : vector<1x4x8xbf16> to vector<4x8xbf16>
    %cst_6 = arith.constant dense<0.000000e+00> : vector<256x8xf32>
    %6 = tpu.matmul %3, %5, %cst_6 {dimension_numbers = #tpu.dot_dimension_numbers<[1], [0], [0], [1], [0, 0, 1, 1], [], []>} : vector<256x4xbf16>, vector<4x8xbf16>, vector<256x8xf32> -> vector<256x8xf32>
    %7 = arith.addf %0, %6 : vector<256x8xf32>
    %c0_7 = arith.constant 0 : index
    %c0_8 = arith.constant 0 : index
    %c1 = arith.constant 1 : index
    %c0_9 = arith.constant 0 : index
    %8 = vector.load %arg1[%c0_7, %c0_8, %c1, %c0_9] : memref<1x18x18x4xbf16, #tpu.memory_space<vmem>>, vector<1x16x16x4xbf16>
    %9 = vector.shape_cast %8 : vector<1x16x16x4xbf16> to vector<16x16x4xbf16>
    %10 = vector.shape_cast %9 : vector<16x16x4xbf16> to vector<256x4xbf16>
    %c1_10 = arith.constant 1 : index
    %c0_11 = arith.constant 0 : index
    %c0_12 = arith.constant 0 : index
    %11 = vector.load %arg2[%c1_10, %c0_11, %c0_12] : memref<9x4x8xbf16, #tpu.memory_space<vmem>>, vector<1x4x8xbf16>
    %12 = vector.shape_cast %11 : vector<1x4x8xbf16> to vector<4x8xbf16>
    %cst_13 = arith.constant dense<0.000000e+00> : vector<256x8xf32>
    %13 = tpu.matmul %10, %12, %cst_13 {dimension_numbers = #tpu.dot_dimension_numbers<[1], [0], [0], [1], [0, 0, 1, 1], [], []>} : vector<256x4xbf16>, vector<4x8xbf16>, vector<256x8xf32> -> vector<256x8xf32>
    %14 = arith.addf %7, %13 : vector<256x8xf32>
    %c0_14 = arith.constant 0 : index
    %c0_15 = arith.constant 0 : index
    %c2 = arith.constant 2 : index
    %c0_16 = arith.constant 0 : index
    %15 = vector.load %arg1[%c0_14, %c0_15, %c2, %c0_16] : memref<1x18x18x4xbf16, #tpu.memory_space<vmem>>, vector<1x16x16x4xbf16>
    %16 = vector.shape_cast %15 : vector<1x16x16x4xbf16> to vector<16x16x4xbf16>
    %17 = vector.shape_cast %16 : vector<16x16x4xbf16> to vector<256x4xbf16>
    %c2_17 = arith.constant 2 : index
    %c0_18 = arith.constant 0 : index
    %c0_19 = arith.constant 0 : index
    %18 = vector.load %arg2[%c2_17, %c0_18, %c0_19] : memref<9x4x8xbf16, #tpu.memory_space<vmem>>, vector<1x4x8xbf16>
    %19 = vector.shape_cast %18 : vector<1x4x8xbf16> to vector<4x8xbf16>
    %cst_20 = arith.constant dense<0.000000e+00> : vector<256x8xf32>
    %20 = tpu.matmul %17, %19, %cst_20 {dimension_numbers = #tpu.dot_dimension_numbers<[1], [0], [0], [1], [0, 0, 1, 1], [], []>} : vector<256x4xbf16>, vector<4x8xbf16>, vector<256x8xf32> -> vector<256x8xf32>
    %21 = arith.addf %14, %20 : vector<256x8xf32>
    %c0_21 = arith.constant 0 : index
    %c1_22 = arith.constant 1 : index
    %c0_23 = arith.constant 0 : index
    %c0_24 = arith.constant 0 : index
    %22 = vector.load %arg1[%c0_21, %c1_22, %c0_23, %c0_24] : memref<1x18x18x4xbf16, #tpu.memory_space<vmem>>, vector<1x16x16x4xbf16>
    %23 = vector.shape_cast %22 : vector<1x16x16x4xbf16> to vector<16x16x4xbf16>
    %24 = vector.shape_cast %23 : vector<16x16x4xbf16> to vector<256x4xbf16>
    %c3 = arith.constant 3 : index
    %c0_25 = arith.constant 0 : index
    %c0_26 = arith.constant 0 : index
    %25 = vector.load %arg2[%c3, %c0_25, %c0_26] : memref<9x4x8xbf16, #tpu.memory_space<vmem>>, vector<1x4x8xbf16>
    %26 = vector.shape_cast %25 : vector<1x4x8xbf16> to vector<4x8xbf16>
    %cst_27 = arith.constant dense<0.000000e+00> : vector<256x8xf32>
    %27 = tpu.matmul %24, %26, %cst_27 {dimension_numbers = #tpu.dot_dimension_numbers<[1], [0], [0], [1], [0, 0, 1, 1], [], []>} : vector<256x4xbf16>, vector<4x8xbf16>, vector<256x8xf32> -> vector<256x8xf32>
    %28 = arith.addf %21, %27 : vector<256x8xf32>
    %c0_28 = arith.constant 0 : index
    %c1_29 = arith.constant 1 : index
    %c1_30 = arith.constant 1 : index
    %c0_31 = arith.constant 0 : index
    %29 = vector.load %arg1[%c0_28, %c1_29, %c1_30, %c0_31] : memref<1x18x18x4xbf16, #tpu.memory_space<vmem>>, vector<1x16x16x4xbf16>
    %30 = vector.shape_cast %29 : vector<1x16x16x4xbf16> to vector<16x16x4xbf16>
    %31 = vector.shape_cast %30 : vector<16x16x4xbf16> to vector<256x4xbf16>
    %c4 = arith.constant 4 : index
    %c0_32 = arith.constant 0 : index
    %c0_33 = arith.constant 0 : index
    %32 = vector.load %arg2[%c4, %c0_32, %c0_33] : memref<9x4x8xbf16, #tpu.memory_space<vmem>>, vector<1x4x8xbf16>
    %33 = vector.shape_cast %32 : vector<1x4x8xbf16> to vector<4x8xbf16>
    %cst_34 = arith.constant dense<0.000000e+00> : vector<256x8xf32>
    %34 = tpu.matmul %31, %33, %cst_34 {dimension_numbers = #tpu.dot_dimension_numbers<[1], [0], [0], [1], [0, 0, 1, 1], [], []>} : vector<256x4xbf16>, vector<4x8xbf16>, vector<256x8xf32> -> vector<256x8xf32>
    %35 = arith.addf %28, %34 : vector<256x8xf32>
    %c0_35 = arith.constant 0 : index
    %c1_36 = arith.constant 1 : index
    %c2_37 = arith.constant 2 : index
    %c0_38 = arith.constant 0 : index
    %36 = vector.load %arg1[%c0_35, %c1_36, %c2_37, %c0_38] : memref<1x18x18x4xbf16, #tpu.memory_space<vmem>>, vector<1x16x16x4xbf16>
    %37 = vector.shape_cast %36 : vector<1x16x16x4xbf16> to vector<16x16x4xbf16>
    %38 = vector.shape_cast %37 : vector<16x16x4xbf16> to vector<256x4xbf16>
    %c5 = arith.constant 5 : index
    %c0_39 = arith.constant 0 : index
    %c0_40 = arith.constant 0 : index
    %39 = vector.load %arg2[%c5, %c0_39, %c0_40] : memref<9x4x8xbf16, #tpu.memory_space<vmem>>, vector<1x4x8xbf16>
    %40 = vector.shape_cast %39 : vector<1x4x8xbf16> to vector<4x8xbf16>
    %cst_41 = arith.constant dense<0.000000e+00> : vector<256x8xf32>
    %41 = tpu.matmul %38, %40, %cst_41 {dimension_numbers = #tpu.dot_dimension_numbers<[1], [0], [0], [1], [0, 0, 1, 1], [], []>} : vector<256x4xbf16>, vector<4x8xbf16>, vector<256x8xf32> -> vector<256x8xf32>
    %42 = arith.addf %35, %41 : vector<256x8xf32>
    %c0_42 = arith.constant 0 : index
    %c2_43 = arith.constant 2 : index
    %c0_44 = arith.constant 0 : index
    %c0_45 = arith.constant 0 : index
    %43 = vector.load %arg1[%c0_42, %c2_43, %c0_44, %c0_45] : memref<1x18x18x4xbf16, #tpu.memory_space<vmem>>, vector<1x16x16x4xbf16>
    %44 = vector.shape_cast %43 : vector<1x16x16x4xbf16> to vector<16x16x4xbf16>
    %45 = vector.shape_cast %44 : vector<16x16x4xbf16> to vector<256x4xbf16>
    %c6 = arith.constant 6 : index
    %c0_46 = arith.constant 0 : index
    %c0_47 = arith.constant 0 : index
    %46 = vector.load %arg2[%c6, %c0_46, %c0_47] : memref<9x4x8xbf16, #tpu.memory_space<vmem>>, vector<1x4x8xbf16>
    %47 = vector.shape_cast %46 : vector<1x4x8xbf16> to vector<4x8xbf16>
    %cst_48 = arith.constant dense<0.000000e+00> : vector<256x8xf32>
    %48 = tpu.matmul %45, %47, %cst_48 {dimension_numbers = #tpu.dot_dimension_numbers<[1], [0], [0], [1], [0, 0, 1, 1], [], []>} : vector<256x4xbf16>, vector<4x8xbf16>, vector<256x8xf32> -> vector<256x8xf32>
    %49 = arith.addf %42, %48 : vector<256x8xf32>
    %c0_49 = arith.constant 0 : index
    %c2_50 = arith.constant 2 : index
    %c1_51 = arith.constant 1 : index
    %c0_52 = arith.constant 0 : index
    %50 = vector.load %arg1[%c0_49, %c2_50, %c1_51, %c0_52] : memref<1x18x18x4xbf16, #tpu.memory_space<vmem>>, vector<1x16x16x4xbf16>
    %51 = vector.shape_cast %50 : vector<1x16x16x4xbf16> to vector<16x16x4xbf16>
    %52 = vector.shape_cast %51 : vector<16x16x4xbf16> to vector<256x4xbf16>
    %c7 = arith.constant 7 : index
    %c0_53 = arith.constant 0 : index
    %c0_54 = arith.constant 0 : index
    %53 = vector.load %arg2[%c7, %c0_53, %c0_54] : memref<9x4x8xbf16, #tpu.memory_space<vmem>>, vector<1x4x8xbf16>
    %54 = vector.shape_cast %53 : vector<1x4x8xbf16> to vector<4x8xbf16>
    %cst_55 = arith.constant dense<0.000000e+00> : vector<256x8xf32>
    %55 = tpu.matmul %52, %54, %cst_55 {dimension_numbers = #tpu.dot_dimension_numbers<[1], [0], [0], [1], [0, 0, 1, 1], [], []>} : vector<256x4xbf16>, vector<4x8xbf16>, vector<256x8xf32> -> vector<256x8xf32>
    %56 = arith.addf %49, %55 : vector<256x8xf32>
    %c0_56 = arith.constant 0 : index
    %c2_57 = arith.constant 2 : index
    %c2_58 = arith.constant 2 : index
    %c0_59 = arith.constant 0 : index
    %57 = vector.load %arg1[%c0_56, %c2_57, %c2_58, %c0_59] : memref<1x18x18x4xbf16, #tpu.memory_space<vmem>>, vector<1x16x16x4xbf16>
    %58 = vector.shape_cast %57 : vector<1x16x16x4xbf16> to vector<16x16x4xbf16>
    %59 = vector.shape_cast %58 : vector<16x16x4xbf16> to vector<256x4xbf16>
    %c8 = arith.constant 8 : index
    %c0_60 = arith.constant 0 : index
    %c0_61 = arith.constant 0 : index
    %60 = vector.load %arg2[%c8, %c0_60, %c0_61] : memref<9x4x8xbf16, #tpu.memory_space<vmem>>, vector<1x4x8xbf16>
    %61 = vector.shape_cast %60 : vector<1x4x8xbf16> to vector<4x8xbf16>
    %cst_62 = arith.constant dense<0.000000e+00> : vector<256x8xf32>
    %62 = tpu.matmul %59, %61, %cst_62 {dimension_numbers = #tpu.dot_dimension_numbers<[1], [0], [0], [1], [0, 0, 1, 1], [], []>} : vector<256x4xbf16>, vector<4x8xbf16>, vector<256x8xf32> -> vector<256x8xf32>
    %63 = arith.addf %56, %62 : vector<256x8xf32>
    %64 = vector.shape_cast %63 : vector<256x8xf32> to vector<1x256x8xf32>
    %cst_63 = arith.constant dense<0.000000e+00> : vector<1xf32>
    %65 = vector.multi_reduction <add>, %64, %cst_63 [1, 2] : vector<1x256x8xf32> to vector<1xf32>
    %66 = vector.shape_cast %65 : vector<1xf32> to vector<1x1x1xf32>
    %67 = vector.extract %66[0, 0, 0] : f32 from vector<1x1x1xf32>
    %cst_64 = arith.constant 4.8828125E-4 : f32
    %68 = arith.mulf %67, %cst_64 : f32
    %69 = vector.broadcast %68 : f32 to vector<256x8xf32>
    %70 = arith.subf %63, %69 : vector<256x8xf32>
    %71 = arith.mulf %70, %70 : vector<256x8xf32>
    %72 = vector.shape_cast %71 : vector<256x8xf32> to vector<1x256x8xf32>
    %cst_65 = arith.constant dense<0.000000e+00> : vector<1xf32>
    %73 = vector.multi_reduction <add>, %72, %cst_65 [1, 2] : vector<1x256x8xf32> to vector<1xf32>
    %74 = vector.shape_cast %73 : vector<1xf32> to vector<1x1x1xf32>
    %75 = vector.extract %74[0, 0, 0] : f32 from vector<1x1x1xf32>
    %cst_66 = arith.constant 4.8828125E-4 : f32
    %76 = arith.mulf %75, %cst_66 : f32
    %cst_67 = arith.constant 9.99999974E-6 : f32
    %77 = arith.addf %76, %cst_67 : f32
    %78 = math.rsqrt %77 : f32
    %79 = vector.broadcast %78 : f32 to vector<256x8xf32>
    %80 = arith.mulf %70, %79 : vector<256x8xf32>
    %c0_68 = arith.constant 0 : index
    %c0_69 = arith.constant 0 : index
    %81 = vector.load %arg3[%c0_68, %c0_69] : memref<1x8xf32, #tpu.memory_space<vmem>>, vector<1x8xf32>
    %82 = vector.broadcast %81 : vector<1x8xf32> to vector<256x8xf32>
    %83 = arith.mulf %80, %82 : vector<256x8xf32>
    %c0_70 = arith.constant 0 : index
    %c0_71 = arith.constant 0 : index
    %84 = vector.load %arg4[%c0_70, %c0_71] : memref<1x8xf32, #tpu.memory_space<vmem>>, vector<1x8xf32>
    %85 = vector.broadcast %84 : vector<1x8xf32> to vector<256x8xf32>
    %86 = arith.addf %83, %85 : vector<256x8xf32>
    %cst_72 = arith.constant 5.000000e-01 : f32
    %87 = vector.broadcast %cst_72 : f32 to vector<256x8xf32>
    %88 = arith.mulf %87, %86 : vector<256x8xf32>
    %cst_73 = arith.constant 0.707106769 : f32
    %89 = vector.broadcast %cst_73 : f32 to vector<256x8xf32>
    %90 = arith.mulf %86, %89 : vector<256x8xf32>
    %91 = math.erf %90 : vector<256x8xf32>
    %cst_74 = arith.constant 1.000000e+00 : f32
    %92 = vector.broadcast %cst_74 : f32 to vector<256x8xf32>
    %93 = arith.addf %92, %91 : vector<256x8xf32>
    %94 = arith.mulf %88, %93 : vector<256x8xf32>
    %cst_75 = arith.constant 0.000000e+00 : f32
    %95 = vector.broadcast %cst_75 : f32 to vector<18x18x8xf32>
    %c0_76 = arith.constant 0 : index
    %c0_77 = arith.constant 0 : index
    %c0_78 = arith.constant 0 : index
    %96 = vector.load %arg9[%c0_76, %c0_77, %c0_78] : memref<18x18x8xf32, #tpu.memory_space<vmem>>, vector<18x18x8xf32>
    tpu.vector_store %arg9[%c0_76, %c0_77, %c0_78], %95 {strides = array<i32>} : memref<18x18x8xf32, #tpu.memory_space<vmem>>, vector<18x18x8xf32>,
    %97 = vector.shape_cast %94 : vector<256x8xf32> to vector<16x16x8xf32>
    %c1_79 = arith.constant 1 : index
    %c1_80 = arith.constant 1 : index
    %c0_81 = arith.constant 0 : index
    %98 = vector.load %arg9[%c1_79, %c1_80, %c0_81] : memref<18x18x8xf32, #tpu.memory_space<vmem>>, vector<16x16x8xf32>
    tpu.vector_store %arg9[%c1_79, %c1_80, %c0_81], %97 {strides = array<i32>} : memref<18x18x8xf32, #tpu.memory_space<vmem>>, vector<16x16x8xf32>,
    %cst_82 = arith.constant 0.000000e+00 : f32
    %99 = vector.broadcast %cst_82 : f32 to vector<256x8xf32>
    %c0_83 = arith.constant 0 : index
    %c0_84 = arith.constant 0 : index
    %c0_85 = arith.constant 0 : index
    %100 = vector.load %arg9[%c0_83, %c0_84, %c0_85] : memref<18x18x8xf32, #tpu.memory_space<vmem>>, vector<16x16x8xf32>
    %101 = vector.shape_cast %100 : vector<16x16x8xf32> to vector<256x8xf32>
    %102 = arith.truncf %101 : vector<256x8xf32> to vector<256x8xbf16>
    %c0_86 = arith.constant 0 : index
    %c0_87 = arith.constant 0 : index
    %c0_88 = arith.constant 0 : index
    %103 = vector.load %arg5[%c0_86, %c0_87, %c0_88] : memref<9x8x8xbf16, #tpu.memory_space<vmem>>, vector<1x8x8xbf16>
    %104 = vector.shape_cast %103 : vector<1x8x8xbf16> to vector<8x8xbf16>
    %cst_89 = arith.constant dense<0.000000e+00> : vector<256x8xf32>
    %105 = tpu.matmul %102, %104, %cst_89 {dimension_numbers = #tpu.dot_dimension_numbers<[1], [0], [0], [1], [0, 0, 1, 1], [], []>} : vector<256x8xbf16>, vector<8x8xbf16>, vector<256x8xf32> -> vector<256x8xf32>
    %106 = arith.addf %99, %105 : vector<256x8xf32>
    %c0_90 = arith.constant 0 : index
    %c1_91 = arith.constant 1 : index
    %c0_92 = arith.constant 0 : index
    %107 = vector.load %arg9[%c0_90, %c1_91, %c0_92] : memref<18x18x8xf32, #tpu.memory_space<vmem>>, vector<16x16x8xf32>
    %108 = vector.shape_cast %107 : vector<16x16x8xf32> to vector<256x8xf32>
    %109 = arith.truncf %108 : vector<256x8xf32> to vector<256x8xbf16>
    %c1_93 = arith.constant 1 : index
    %c0_94 = arith.constant 0 : index
    %c0_95 = arith.constant 0 : index
    %110 = vector.load %arg5[%c1_93, %c0_94, %c0_95] : memref<9x8x8xbf16, #tpu.memory_space<vmem>>, vector<1x8x8xbf16>
    %111 = vector.shape_cast %110 : vector<1x8x8xbf16> to vector<8x8xbf16>
    %cst_96 = arith.constant dense<0.000000e+00> : vector<256x8xf32>
    %112 = tpu.matmul %109, %111, %cst_96 {dimension_numbers = #tpu.dot_dimension_numbers<[1], [0], [0], [1], [0, 0, 1, 1], [], []>} : vector<256x8xbf16>, vector<8x8xbf16>, vector<256x8xf32> -> vector<256x8xf32>
    %113 = arith.addf %106, %112 : vector<256x8xf32>
    %c0_97 = arith.constant 0 : index
    %c2_98 = arith.constant 2 : index
    %c0_99 = arith.constant 0 : index
    %114 = vector.load %arg9[%c0_97, %c2_98, %c0_99] : memref<18x18x8xf32, #tpu.memory_space<vmem>>, vector<16x16x8xf32>
    %115 = vector.shape_cast %114 : vector<16x16x8xf32> to vector<256x8xf32>
    %116 = arith.truncf %115 : vector<256x8xf32> to vector<256x8xbf16>
    %c2_100 = arith.constant 2 : index
    %c0_101 = arith.constant 0 : index
    %c0_102 = arith.constant 0 : index
    %117 = vector.load %arg5[%c2_100, %c0_101, %c0_102] : memref<9x8x8xbf16, #tpu.memory_space<vmem>>, vector<1x8x8xbf16>
    %118 = vector.shape_cast %117 : vector<1x8x8xbf16> to vector<8x8xbf16>
    %cst_103 = arith.constant dense<0.000000e+00> : vector<256x8xf32>
    %119 = tpu.matmul %116, %118, %cst_103 {dimension_numbers = #tpu.dot_dimension_numbers<[1], [0], [0], [1], [0, 0, 1, 1], [], []>} : vector<256x8xbf16>, vector<8x8xbf16>, vector<256x8xf32> -> vector<256x8xf32>
    %120 = arith.addf %113, %119 : vector<256x8xf32>
    %c1_104 = arith.constant 1 : index
    %c0_105 = arith.constant 0 : index
    %c0_106 = arith.constant 0 : index
    %121 = vector.load %arg9[%c1_104, %c0_105, %c0_106] : memref<18x18x8xf32, #tpu.memory_space<vmem>>, vector<16x16x8xf32>
    %122 = vector.shape_cast %121 : vector<16x16x8xf32> to vector<256x8xf32>
    %123 = arith.truncf %122 : vector<256x8xf32> to vector<256x8xbf16>
    %c3_107 = arith.constant 3 : index
    %c0_108 = arith.constant 0 : index
    %c0_109 = arith.constant 0 : index
    %124 = vector.load %arg5[%c3_107, %c0_108, %c0_109] : memref<9x8x8xbf16, #tpu.memory_space<vmem>>, vector<1x8x8xbf16>
    %125 = vector.shape_cast %124 : vector<1x8x8xbf16> to vector<8x8xbf16>
    %cst_110 = arith.constant dense<0.000000e+00> : vector<256x8xf32>
    %126 = tpu.matmul %123, %125, %cst_110 {dimension_numbers = #tpu.dot_dimension_numbers<[1], [0], [0], [1], [0, 0, 1, 1], [], []>} : vector<256x8xbf16>, vector<8x8xbf16>, vector<256x8xf32> -> vector<256x8xf32>
    %127 = arith.addf %120, %126 : vector<256x8xf32>
    %c1_111 = arith.constant 1 : index
    %c1_112 = arith.constant 1 : index
    %c0_113 = arith.constant 0 : index
    %128 = vector.load %arg9[%c1_111, %c1_112, %c0_113] : memref<18x18x8xf32, #tpu.memory_space<vmem>>, vector<16x16x8xf32>
    %129 = vector.shape_cast %128 : vector<16x16x8xf32> to vector<256x8xf32>
    %130 = arith.truncf %129 : vector<256x8xf32> to vector<256x8xbf16>
    %c4_114 = arith.constant 4 : index
    %c0_115 = arith.constant 0 : index
    %c0_116 = arith.constant 0 : index
    %131 = vector.load %arg5[%c4_114, %c0_115, %c0_116] : memref<9x8x8xbf16, #tpu.memory_space<vmem>>, vector<1x8x8xbf16>
    %132 = vector.shape_cast %131 : vector<1x8x8xbf16> to vector<8x8xbf16>
    %cst_117 = arith.constant dense<0.000000e+00> : vector<256x8xf32>
    %133 = tpu.matmul %130, %132, %cst_117 {dimension_numbers = #tpu.dot_dimension_numbers<[1], [0], [0], [1], [0, 0, 1, 1], [], []>} : vector<256x8xbf16>, vector<8x8xbf16>, vector<256x8xf32> -> vector<256x8xf32>
    %134 = arith.addf %127, %133 : vector<256x8xf32>
    %c1_118 = arith.constant 1 : index
    %c2_119 = arith.constant 2 : index
    %c0_120 = arith.constant 0 : index
    %135 = vector.load %arg9[%c1_118, %c2_119, %c0_120] : memref<18x18x8xf32, #tpu.memory_space<vmem>>, vector<16x16x8xf32>
    %136 = vector.shape_cast %135 : vector<16x16x8xf32> to vector<256x8xf32>
    %137 = arith.truncf %136 : vector<256x8xf32> to vector<256x8xbf16>
    %c5_121 = arith.constant 5 : index
    %c0_122 = arith.constant 0 : index
    %c0_123 = arith.constant 0 : index
    %138 = vector.load %arg5[%c5_121, %c0_122, %c0_123] : memref<9x8x8xbf16, #tpu.memory_space<vmem>>, vector<1x8x8xbf16>
    %139 = vector.shape_cast %138 : vector<1x8x8xbf16> to vector<8x8xbf16>
    %cst_124 = arith.constant dense<0.000000e+00> : vector<256x8xf32>
    %140 = tpu.matmul %137, %139, %cst_124 {dimension_numbers = #tpu.dot_dimension_numbers<[1], [0], [0], [1], [0, 0, 1, 1], [], []>} : vector<256x8xbf16>, vector<8x8xbf16>, vector<256x8xf32> -> vector<256x8xf32>
    %141 = arith.addf %134, %140 : vector<256x8xf32>
    %c2_125 = arith.constant 2 : index
    %c0_126 = arith.constant 0 : index
    %c0_127 = arith.constant 0 : index
    %142 = vector.load %arg9[%c2_125, %c0_126, %c0_127] : memref<18x18x8xf32, #tpu.memory_space<vmem>>, vector<16x16x8xf32>
    %143 = vector.shape_cast %142 : vector<16x16x8xf32> to vector<256x8xf32>
    %144 = arith.truncf %143 : vector<256x8xf32> to vector<256x8xbf16>
    %c6_128 = arith.constant 6 : index
    %c0_129 = arith.constant 0 : index
    %c0_130 = arith.constant 0 : index
    %145 = vector.load %arg5[%c6_128, %c0_129, %c0_130] : memref<9x8x8xbf16, #tpu.memory_space<vmem>>, vector<1x8x8xbf16>
    %146 = vector.shape_cast %145 : vector<1x8x8xbf16> to vector<8x8xbf16>
    %cst_131 = arith.constant dense<0.000000e+00> : vector<256x8xf32>
    %147 = tpu.matmul %144, %146, %cst_131 {dimension_numbers = #tpu.dot_dimension_numbers<[1], [0], [0], [1], [0, 0, 1, 1], [], []>} : vector<256x8xbf16>, vector<8x8xbf16>, vector<256x8xf32> -> vector<256x8xf32>
    %148 = arith.addf %141, %147 : vector<256x8xf32>
    %c2_132 = arith.constant 2 : index
    %c1_133 = arith.constant 1 : index
    %c0_134 = arith.constant 0 : index
    %149 = vector.load %arg9[%c2_132, %c1_133, %c0_134] : memref<18x18x8xf32, #tpu.memory_space<vmem>>, vector<16x16x8xf32>
    %150 = vector.shape_cast %149 : vector<16x16x8xf32> to vector<256x8xf32>
    %151 = arith.truncf %150 : vector<256x8xf32> to vector<256x8xbf16>
    %c7_135 = arith.constant 7 : index
    %c0_136 = arith.constant 0 : index
    %c0_137 = arith.constant 0 : index
    %152 = vector.load %arg5[%c7_135, %c0_136, %c0_137] : memref<9x8x8xbf16, #tpu.memory_space<vmem>>, vector<1x8x8xbf16>
    %153 = vector.shape_cast %152 : vector<1x8x8xbf16> to vector<8x8xbf16>
    %cst_138 = arith.constant dense<0.000000e+00> : vector<256x8xf32>
    %154 = tpu.matmul %151, %153, %cst_138 {dimension_numbers = #tpu.dot_dimension_numbers<[1], [0], [0], [1], [0, 0, 1, 1], [], []>} : vector<256x8xbf16>, vector<8x8xbf16>, vector<256x8xf32> -> vector<256x8xf32>
    %155 = arith.addf %148, %154 : vector<256x8xf32>
    %c2_139 = arith.constant 2 : index
    %c2_140 = arith.constant 2 : index
    %c0_141 = arith.constant 0 : index
    %156 = vector.load %arg9[%c2_139, %c2_140, %c0_141] : memref<18x18x8xf32, #tpu.memory_space<vmem>>, vector<16x16x8xf32>
    %157 = vector.shape_cast %156 : vector<16x16x8xf32> to vector<256x8xf32>
    %158 = arith.truncf %157 : vector<256x8xf32> to vector<256x8xbf16>
    %c8_142 = arith.constant 8 : index
    %c0_143 = arith.constant 0 : index
    %c0_144 = arith.constant 0 : index
    %159 = vector.load %arg5[%c8_142, %c0_143, %c0_144] : memref<9x8x8xbf16, #tpu.memory_space<vmem>>, vector<1x8x8xbf16>
    %160 = vector.shape_cast %159 : vector<1x8x8xbf16> to vector<8x8xbf16>
    %cst_145 = arith.constant dense<0.000000e+00> : vector<256x8xf32>
    %161 = tpu.matmul %158, %160, %cst_145 {dimension_numbers = #tpu.dot_dimension_numbers<[1], [0], [0], [1], [0, 0, 1, 1], [], []>} : vector<256x8xbf16>, vector<8x8xbf16>, vector<256x8xf32> -> vector<256x8xf32>
    %162 = arith.addf %155, %161 : vector<256x8xf32>
    %163 = vector.shape_cast %162 : vector<256x8xf32> to vector<1x256x8xf32>
    %cst_146 = arith.constant dense<0.000000e+00> : vector<1xf32>
    %164 = vector.multi_reduction <add>, %163, %cst_146 [1, 2] : vector<1x256x8xf32> to vector<1xf32>
    %165 = vector.shape_cast %164 : vector<1xf32> to vector<1x1x1xf32>
    %166 = vector.extract %165[0, 0, 0] : f32 from vector<1x1x1xf32>
    %cst_147 = arith.constant 4.8828125E-4 : f32
    %167 = arith.mulf %166, %cst_147 : f32
    %168 = vector.broadcast %167 : f32 to vector<256x8xf32>
    %169 = arith.subf %162, %168 : vector<256x8xf32>
    %170 = arith.mulf %169, %169 : vector<256x8xf32>
    %171 = vector.shape_cast %170 : vector<256x8xf32> to vector<1x256x8xf32>
    %cst_148 = arith.constant dense<0.000000e+00> : vector<1xf32>
    %172 = vector.multi_reduction <add>, %171, %cst_148 [1, 2] : vector<1x256x8xf32> to vector<1xf32>
    %173 = vector.shape_cast %172 : vector<1xf32> to vector<1x1x1xf32>
    %174 = vector.extract %173[0, 0, 0] : f32 from vector<1x1x1xf32>
    %cst_149 = arith.constant 4.8828125E-4 : f32
    %175 = arith.mulf %174, %cst_149 : f32
    %cst_150 = arith.constant 9.99999974E-6 : f32
    %176 = arith.addf %175, %cst_150 : f32
    %177 = math.rsqrt %176 : f32
    %178 = vector.broadcast %177 : f32 to vector<256x8xf32>
    %179 = arith.mulf %169, %178 : vector<256x8xf32>
    %180 = tpu.transpose %179, [1, 0] : vector<256x8xf32> -> vector<8x256xf32>
    %c0_151 = arith.constant 0 : index
    %c0_152 = arith.constant 0 : index
    %181 = vector.load %arg6[%c0_151, %c0_152] : memref<8x1xf32, #tpu.memory_space<vmem>>, vector<8x1xf32>
    %182 = vector.broadcast %181 : vector<8x1xf32> to vector<8x256xf32>
    %183 = arith.mulf %180, %182 : vector<8x256xf32>
    %c0_153 = arith.constant 0 : index
    %c0_154 = arith.constant 0 : index
    %184 = vector.load %arg7[%c0_153, %c0_154] : memref<8x1xf32, #tpu.memory_space<vmem>>, vector<8x1xf32>
    %185 = vector.broadcast %184 : vector<8x1xf32> to vector<8x256xf32>
    %186 = arith.addf %183, %185 : vector<8x256xf32>
    %c0_155 = arith.constant 0 : index
    %c0_156 = arith.constant 0 : index
    %c0_157 = arith.constant 0 : index
    %187 = vector.load %arg8[%c0_155, %c0_156, %c0_157] : memref<1x8x256xf32, #tpu.memory_space<vmem>>, vector<1x8x256xf32>
    %188 = vector.shape_cast %187 : vector<1x8x256xf32> to vector<8x256xf32>
    %189 = vector.shape_cast %186 : vector<8x256xf32> to vector<1x8x256xf32>
    tpu.vector_store %arg8[%c0_155, %c0_156, %c0_157], %189 {strides = array<i32>} : memref<1x8x256xf32, #tpu.memory_space<vmem>>, vector<1x8x256xf32>,
    return
  }
  func.func @transform_0(%arg0: i32) -> (i32, i32, i32, i32) {
    %c0_i32 = arith.constant 0 : i32
    %c0_i32_0 = arith.constant 0 : i32
    %c0_i32_1 = arith.constant 0 : i32
    %c0_i32_2 = arith.constant 0 : i32
    return %arg0, %c0_i32, %c0_i32_0, %c0_i32_1 : i32, i32, i32, i32
  }
  func.func @transform_1(%arg0: i32) -> (i32, i32, i32) {
    %c0_i32 = arith.constant 0 : i32
    %c0_i32_0 = arith.constant 0 : i32
    %c0_i32_1 = arith.constant 0 : i32
    %c0_i32_2 = arith.constant 0 : i32
    return %c0_i32, %c0_i32_0, %c0_i32_1 : i32, i32, i32
  }
  func.func @transform_2(%arg0: i32) -> (i32, i32) {
    %c0_i32 = arith.constant 0 : i32
    %c0_i32_0 = arith.constant 0 : i32
    %c0_i32_1 = arith.constant 0 : i32
    return %c0_i32, %c0_i32_0 : i32, i32
  }
  func.func @transform_3(%arg0: i32) -> (i32, i32) {
    %c0_i32 = arith.constant 0 : i32
    %c0_i32_0 = arith.constant 0 : i32
    %c0_i32_1 = arith.constant 0 : i32
    return %c0_i32, %c0_i32_0 : i32, i32
  }
  func.func @transform_4(%arg0: i32) -> (i32, i32, i32) {
    %c0_i32 = arith.constant 0 : i32
    %c0_i32_0 = arith.constant 0 : i32
    %c0_i32_1 = arith.constant 0 : i32
    %c0_i32_2 = arith.constant 0 : i32
    return %c0_i32, %c0_i32_0, %c0_i32_1 : i32, i32, i32
  }
  func.func @transform_5(%arg0: i32) -> (i32, i32) {
    %c0_i32 = arith.constant 0 : i32
    %c0_i32_0 = arith.constant 0 : i32
    %c0_i32_1 = arith.constant 0 : i32
    return %c0_i32, %c0_i32_0 : i32, i32
  }
  func.func @transform_6(%arg0: i32) -> (i32, i32) {
    %c0_i32 = arith.constant 0 : i32
    %c0_i32_0 = arith.constant 0 : i32
    %c0_i32_1 = arith.constant 0 : i32
    return %c0_i32, %c0_i32_0 : i32, i32
  }
  func.func @transform_7(%arg0: i32) -> (i32, i32, i32) {
    %c0_i32 = arith.constant 0 : i32
    %c0_i32_0 = arith.constant 0 : i32
    %c0_i32_1 = arith.constant 0 : i32
    return %arg0, %c0_i32, %c0_i32_0 : i32, i32, i32
  }
}

</mosaic_0001>

<bundles_post_ra>
// kernel: double_conv.1
= control target key start
LH: loop header
LB: loop body
LE: loop exit
PB: predicated region body
PF: predicated region fallthrough
CT: control target
= control target key end

     0   :  { %s10726_s24 = smov 0   ;;  %s13928_s0 = inlined_call_operand.vmem [shape: bf16[2,18,18,4], index: 0, kind: input, shape index: {}]   ;;  %s13929_s1 = inlined_call_operand.vmem [shape: bf16[9,4,8], index: 1, kind: input, shape index: {}]   ;;  %s13930_s2 = inlined_call_operand.vmem [shape: f32[1,8], index: 2, kind: input, shape index: {}]   ;;  %s13931_s3 = inlined_call_operand.vmem [shape: f32[1,8], index: 3, kind: input, shape index: {}]   ;;  %s13932_s4 = inlined_call_operand.vmem [shape: bf16[9,8,8], index: 4, kind: input, shape index: {}]   ;;  %s13933_s5 = inlined_call_operand.vmem [shape: f32[8,1], index: 5, kind: input, shape index: {}]   ;;  %s13934_s6 = inlined_call_operand.vmem [shape: f32[8,1], index: 6, kind: input, shape index: {}]   ;;  %s13935_s7 = inlined_call_operand.vmem [shape: f32[2,8,256], index: 7, kind: output, shape index: {}]  }
   0x1 LB: > { %s8382_s25 = sadd.s32 4294967295, %s10682_s24   ;;  %p8386_p0 = scmp.ge.s32.totalorder %s10682_s24, 1  ;;  %s10682_s24 = sphi %s10726_s24, %s17_s24  }
   0x2   : > { %p237_p1 = scmp.lt.s32.totalorder %s10682_s24, 3 }
   0x4   : > { %p238_p2 = pnand %p8386_p0, %p237_p1 }
   0x6   : > { %241 = sbr.rel (%p238_p2) target bundleno = 2894 (0xb4e), region = 48 }
   0xd   : > { %v8390_v0 = vld [vmem:[%s13929_s1 + $0x2] sm:$0x3]  ;;  %vm815_vm0 = vcmask 1041408   ;;  %p269_p3 = scmp.lt.s32.totalorder %s8382_s25, 1  ;;  %v312_v2 = vld [vmem:[%s13929_s1] sm:$0x3] }
   0xe   : > { %10513 = vmatprep.subr.msk.bf16.mxu0 %vm815_vm0, %v8390_v0  ;;  %v817_v1 = vsel %vm815_vm0, %v8390_v0, 0  ;;  %vm329_vm1 = vsmask.f32 3328  ;;  %vm330_vm2 = vsmask.f32 7440  ;;  %vm766_vm3 = vcmask 31744  }
   0xf   : > { %9390 = vmatpush3.bf16.msra.mxu0 %v817_v1  ;;  %s14059_s25 = smov (!%p269_p3, %s8382_s25), 1  ;;  %v10772_v14 = vsel %vm815_vm0, %v312_v2, 0  ;;  %vm10784_vm4 = vmor %vm329_vm1, %vm330_vm2  ;;  %v13964_v28 = vmov 0  ;;  %vm1320_vm5 = vcmask 1042432   ;;  %vm1321_vm6 = vcmask 1046532  }
  0x10   : > { %10514 = vmatprep.subr.msk.bf16.mxu0 %vm815_vm0, %v312_v2  ;;  %s10531_s30 = smul.u32 216, %s14059_s25  ;;  %v13965_v28 = vsel %vm10784_vm4, 4294967295, %v13964_v28  ;;  %vm11099_vm7 = vmor %vm1320_vm5, %vm1321_vm6  ;;  %vm4839_vm8 = vcmask 64512   ;;  %vm5328_vm9 = vcmask 58368   ;;  %vm5561_vm10 = vcmask 1043456   ;;  %s9082_s21 = sshll.u32 %s14059_s25, 4 }
  0x11   : > { %13966 = vst [vmem:[#allocation3_spill] sm:$0xff] %v13965_v28  ;;  %s278_s26 = scalar_lea.vmem %s13935_s7, %s9082_s21 }
  0x12   : > { %s10749_s10 = scalar_lea.vmem %s13928_s0, %s10531_s30 }
  0x13   : > { %v10752_v3 = vld [vmem:[%s10749_s10] sm:$0xf]  ;;  %v10755_v4 = vld [vmem:[%s10749_s10 + $0x4] sm:$0xf]  ;;  %v313_v5 = vld [vmem:[%s10749_s10 + $0x8] sm:$0x1] }
  0x14   : > { %v333_v6 = vshrl.u32 %v10752_v3, 16  ;;  %v336_v7 = vshll.u32 %v10752_v3, 16  ;;  %v342_v8 = vshll.u32 %v10755_v4, 16  ;;  %v346_v9 = vshrl.u32 %v10755_v4, 16  ;;  %v10763_v10 = vld [vmem:[%s10749_s10 + $0xc] sm:$0xf] }
  0x15   : > { %v352_v11 = vshll.u32 %v313_v5, 16  ;;  %v10766_v12 = vld [vmem:[%s10749_s10 + $0x10] sm:$0xf]  ;;  %v10769_v13 = vld [vmem:[%s10749_s10 + $0x14] sm:$0x1]  ;;  %v357_v20 = vshrl.u32 %v10763_v10, 16 }
  0x16   : > { %v335_v15 = vrot.slane %v333_v6, 4  ;;  %v338_v16 = vrot.slane %v336_v7, 5  ;;  %v344_v17 = vrot.slane %v342_v8, 5  ;;  %v348_v18 = vrot.slane %v346_v9, 4  ;;  %v10780_v27 = vld [vmem:[%s10749_s10 + $0x18] sm:$0xf] }
  0x17   : > { %v354_v19 = vrot.slane %v352_v11, 5  ;;  %v360_v21 = vshll.u32 %v10763_v10, 16  ;;  %v366_v22 = vshll.u32 %v10766_v12, 16  ;;  %v370_v25 = vshrl.u32 %v10766_v12, 16  ;;  %v10789_v32 = vld [vmem:[%s10749_s10 + $0x1c] sm:$0xf] }
  0x18   : > { %v339_v23 = vor.u32 %v338_v16, %v335_v15  ;;  %v349_v24 = vor.u32 %v348_v18, %v344_v17  ;;  %v376_v26 = vshll.u32 %v10769_v13, 16  ;;  %v359_v29 = vrot.slane %v357_v20, 4  ;;  %v315_v40 = vld [vmem:[%s10749_s10 + $0x20] sm:$0x1]  ;;  %v10803_v47 = vld [vmem:[%s10749_s10 + $0x24] sm:$0xf] }
  0x19   : > { %v362_v30 = vrot.slane %v360_v21, 5  ;;  %v368_v31 = vrot.slane %v366_v22, 5  ;;  %v372_v36 = vrot.slane %v370_v25, 4  ;;  %v381_v41 = vshrl.u32 %v10780_v27, 16  ;;  %v10806_v52 = vld [vmem:[%s10749_s10 + $0x28] sm:$0xf] }
  0x1a   : > { %v340_v34 = vrot.slane %v339_v23, 4  ;;  %v350_v35 = vrot.slane %v349_v24, 4  ;;  %v378_v39 = vrot.slane %v376_v26, 5  ;;  %v384_v42 = vshll.u32 %v10780_v27, 16  ;;  %v10813_v59 = vld [vmem:[%s10749_s10 + $0x2c] sm:$0x1] }
  0x1b   : > { %v363_v38 = vor.u32 %v362_v30, %v359_v29  ;;  %v373_v45 = vor.u32 %v372_v36, %v368_v31  ;;  %v390_v46 = vshll.u32 %v10789_v32, 16  ;;  %v383_v50 = vrot.slane %v381_v41, 4  ;;  %v10821_v2 = vld [vmem:[%s10749_s10 + $0x30] sm:$0xf]  ;;  %v10824_v9 = vld [vmem:[%s10749_s10 + $0x34] sm:$0xf] }
  0x1c   : > { %v345_v43 = vsel %vm10784_vm4, %v340_v34, %v344_v17  ;;  %v355_v44 = vsel %vm10784_vm4, %v350_v35, %v354_v19  ;;  %v386_v51 = vrot.slane %v384_v42, 5  ;;  %v394_v55 = vshrl.u32 %v10789_v32, 16  ;;  %v10831_v18 = vld [vmem:[%s13929_s1 + $0x4] sm:$0x3]  ;;  %v10837_v21 = vld [vmem:[%s10749_s10 + $0x38] sm:$0x1] }
  0x1d   : > { %v8391_v48 = vcombine.low %v345_v43, %v355_v44  ;;  %v364_v49 = vrot.slane %v363_v38, 4  ;;  %v374_v53 = vrot.slane %v373_v45, 4  ;;  %v392_v54 = vrot.slane %v390_v46, 5  ;;  %v10845_v36 = vld [vmem:[%s10749_s10 + $0x3c] sm:$0xf] }
  0x1e   : > { %v400_v56 = vshll.u32 %v315_v40, 16  ;;  %v387_v58 = vor.u32 %v386_v51, %v383_v50  ;;  %v405_v60 = vshrl.u32 %v10803_v47, 16  ;;  %v408_v61 = vshll.u32 %v10803_v47, 16  ;;  %v10853_v41 = vld [vmem:[%s10749_s10 + $0x40] sm:$0xf] }
  0x1f   : > { %9391 = vmatprep.mubr.msk.bf16.mxu0 %vm766_vm3, %v8391_v48  ;;  %v369_v57 = vsel %vm10784_vm4, %v364_v49, %v368_v31  ;;  %v379_v62 = vsel %vm10784_vm4, %v374_v53, %v378_v39  ;;  %v396_v63 = vrot.slane %v394_v55, 4  ;;  %v414_v1 = vshll.u32 %v10806_v52, 16  ;;  %v10858_v46 = vld [vmem:[%s10749_s10 + $0x44] sm:$0x1] }
  0x20   : > { %v402_v0 = vrot.slane %v400_v56, 5  ;;  %v8392_v5 = vcombine.low %v369_v57, %v379_v62  ;;  %v388_v6 = vrot.slane %v387_v58, 4  ;;  %v407_v7 = vrot.slane %v405_v60, 4  ;;  %v10866_v57 = vld [vmem:[%s10749_s10 + $0x48] sm:$0xf] }
  0x21   : > { %v410_v8 = vrot.slane %v408_v61, 5  ;;  %v397_v11 = vor.u32 %v396_v63, %v392_v54  ;;  %v416_v15 = vrot.slane %v414_v1, 5  ;;  %v418_v16 = vshrl.u32 %v10806_v52, 16  ;;  %v10872_v63 = vld [vmem:[%s10749_s10 + $0x4c] sm:$0xf] }
  0x22   : > { %v424_v17 = vshll.u32 %v10813_v59, 16  ;;  %9392 = vmatmul.mubr.msk.bf16.vlgmr.msra.gmra.mrb[0].mxu0 %vm766_vm3, %v8392_v5  ;;  %v393_v19 = vsel %vm10784_vm4, %v388_v6, %v392_v54  ;;  %v429_v22 = vshrl.u32 %v10821_v2, 16  ;;  %v432_v23 = vshll.u32 %v10821_v2, 16 }
  0x23   : > { %v411_v20 = vor.u32 %v410_v8, %v407_v7  ;;  %9424 = vmatpush3.bf16.msra.mxu0 %v10772_v14  ;;  %v398_v24 = vrot.slane %v397_v11, 4  ;;  %v420_v25 = vrot.slane %v418_v16, 4  ;;  %v438_v29 = vshll.u32 %v10824_v9, 16 }
  0x24   : > { %v426_v26 = vrot.slane %v424_v17, 5  ;;  %v431_v31 = vrot.slane %v429_v22, 4  ;;  %v434_v34 = vrot.slane %v432_v23, 5  ;;  %v442_v35 = vshrl.u32 %v10824_v9, 16  ;;  %10515 = vmatprep.subr.msk.bf16.mxu0 %vm815_vm0, %v10831_v18  ;;  %v10887_v23 = vld [vmem:[%s10749_s10 + $0x54] sm:$0xf] }
  0x25   : > { %v412_v30 = vrot.slane %v411_v20, 4  ;;  %v403_v38 = vsel %vm10784_vm4, %v398_v24, %v402_v0  ;;  %v421_v14 = vor.u32 %v420_v25, %v416_v15  ;;  %v440_v39 = vrot.slane %v438_v29, 5 }
  0x26   : > { %v448_v40 = vshll.u32 %v10837_v21, 16  ;;  %v8393_v42 = vcombine.low %v393_v19, %v403_v38  ;;  %v435_v44 = vor.u32 %v434_v34, %v431_v31  ;;  %v444_v45 = vrot.slane %v442_v35, 4 }
  0x27   : > { %v417_v43 = vsel %vm10784_vm4, %v412_v30, %v416_v15  ;;  %v422_v48 = vrot.slane %v421_v14, 4  ;;  %v453_v50 = vshrl.u32 %v10845_v36, 16  ;;  %v456_v51 = vshll.u32 %v10845_v36, 16  ;;  %v10877_v15 = vld [vmem:[%s10749_s10 + $0x50] sm:$0x1] }
  0x28   : > { %v450_v49 = vrot.slane %v448_v40, 5  ;;  %9395 = vmatprep.mubr.msk.bf16.mxu0 %vm766_vm3, %v8393_v42  ;;  %v436_v53 = vrot.slane %v435_v44, 4  ;;  %v445_v54 = vor.u32 %v444_v45, %v440_v39  ;;  %v462_v55 = vshll.u32 %v10853_v41, 16  ;;  %v10890_v30 = vld [vmem:[%s10749_s10 + $0x58] sm:$0xf] }
  0x29   : > { %v466_v56 = vshrl.u32 %v10853_v41, 16  ;;  %v427_v58 = vsel %vm10784_vm4, %v422_v48, %v426_v26  ;;  %v455_v60 = vrot.slane %v453_v50, 4  ;;  %v458_v61 = vrot.slane %v456_v51, 5  ;;  %v10899_v48 = vld [vmem:[%s10749_s10 + $0x5c] sm:$0x1] }
  0x2a   : > { %v472_v62 = vshll.u32 %v10858_v46, 16  ;;  %v8394_v0 = vcombine.low %v417_v43, %v427_v58  ;;  %v441_v1 = vsel %vm10784_vm4, %v436_v53, %v440_v39  ;;  %v446_v5 = vrot.slane %v445_v54, 4  ;;  %13967 = vst [vmem:[#allocation4_spill] sm:$0xff] %v10899_v48  ;;  %v10903_v50 = vld [vmem:[%s10749_s10 + $0x60] sm:$0xf] }
  0x2b   : > { %v464_v6 = vrot.slane %v462_v55, 5  ;;  %v459_v7 = vor.u32 %v458_v61, %v455_v60  ;;  %v468_v8 = vrot.slane %v466_v56, 4  ;;  %v477_v16 = vshrl.u32 %v10866_v57, 16  ;;  %v10909_v56 = vld [vmem:[%s10749_s10 + $0x64] sm:$0xf] }
  0x2c   : > { %v474_v11 = vrot.slane %v472_v62, 5  ;;  %9396 = vmatmul.mubr.msk.bf16.gmra.mrb[4].mxu0 %vm766_vm3, %v8394_v0  ;;  %v451_v17 = vsel %vm10784_vm4, %v446_v5, %v450_v49  ;;  %v480_v19 = vshll.u32 %v10866_v57, 16  ;;  %v486_v20 = vshll.u32 %v10872_v63, 16 }
  0x2d   : > { %v490_v22 = vshrl.u32 %v10872_v63, 16  ;;  %v8395_v24 = vcombine.low %v441_v1, %v451_v17  ;;  %v460_v25 = vrot.slane %v459_v7, 4  ;;  %v469_v26 = vor.u32 %v468_v8, %v464_v6 }
  0x2e   : > { %v479_v29 = vrot.slane %v477_v16, 4  ;;  %v482_v31 = vrot.slane %v480_v19, 5  ;;  %v488_v34 = vrot.slane %v486_v20, 5  ;;  %v496_v38 = vshll.u32 %v10877_v15, 16  ;;  %v10924_v19 = vld [vmem:[%s10749_s10 + $0x6c] sm:$0xf] }
  0x2f   : > { %v492_v35 = vrot.slane %v490_v22, 4  ;;  %9399 = vmatprep.mubr.msk.bf16.mxu0 %vm766_vm3, %v8395_v24  ;;  %v465_v14 = vsel %vm10784_vm4, %v460_v25, %v464_v6  ;;  %v470_v39 = vrot.slane %v469_v26, 4  ;;  %v501_v40 = vshrl.u32 %v10887_v23, 16  ;;  %v10927_v26 = vld [vmem:[%s10749_s10 + $0x70] sm:$0xf] }
  0x30   : > { %v504_v42 = vshll.u32 %v10887_v23, 16  ;;  %v483_v43 = vor.u32 %v482_v31, %v479_v29  ;;  %v498_v45 = vrot.slane %v496_v38, 5  ;;  %v510_v49 = vshll.u32 %v10890_v30, 16 }
  0x31   : > { %v493_v44 = vor.u32 %v492_v35, %v488_v34  ;;  %v475_v51 = vsel %vm10784_vm4, %v470_v39, %v474_v11  ;;  %v503_v53 = vrot.slane %v501_v40, 4  ;;  %v514_v55 = vshrl.u32 %v10890_v30, 16  ;;  %v10919_v11 = vld [vmem:[%s10749_s10 + $0x68] sm:$0x1]  ;;  %v10935_v40 = vld [vmem:[%s10749_s10 + $0x74] sm:$0x1] }
  0x32   : > { %v506_v54 = vrot.slane %v504_v42, 5  ;;  %v8396_v58 = vcombine.low %v465_v14, %v475_v51  ;;  %v484_v60 = vrot.slane %v483_v43, 4  ;;  %v512_v62 = vrot.slane %v510_v49, 5  ;;  %13968 = vst [vmem:[#allocation5_spill] sm:$0xff] %v10919_v11  ;;  %13969 = vst [vmem:[#allocation6_spill] sm:$0xff] %v10935_v40 }
  0x33   : > { %v494_v61 = vrot.slane %v493_v44, 4  ;;  %v516_v1 = vrot.slane %v514_v55, 4  ;;  %v520_v5 = vshll.u32 %v10899_v48, 16  ;;  %v525_v6 = vshrl.u32 %v10903_v50, 16  ;;  %v10941_v51 = vld [vmem:[%s10749_s10 + $0x78] sm:$0xf] }
  0x34   : > { %v507_v0 = vor.u32 %v506_v54, %v503_v53  ;;  %9400 = vmatmul.mubr.msk.bf16.gmra.mrb[8].mxu0 %vm766_vm3, %v8396_v58  ;;  %v489_v7 = vsel %vm10784_vm4, %v484_v60, %v488_v34  ;;  %v528_v16 = vshll.u32 %v10903_v50, 16  ;;  %v534_v17 = vshll.u32 %v10909_v56, 16 }
  0x35   : > { %v499_v8 = vsel %vm10784_vm4, %v494_v61, %v498_v45  ;;  %v517_v24 = vor.u32 %v516_v1, %v512_v62  ;;  %v522_v25 = vrot.slane %v520_v5, 5  ;;  %v527_v29 = vrot.slane %v525_v6, 4  ;;  %v10947_v1 = vld [vmem:[%s10749_s10 + $0x7c] sm:$0xf]  ;;  %v10950_v5 = vld [vmem:[%s10749_s10 + $0x80] sm:$0x1] }
  0x36   : > { %v8397_v20 = vcombine.low %v489_v7, %v499_v8  ;;  %v508_v22 = vrot.slane %v507_v0, 4  ;;  %v530_v31 = vrot.slane %v528_v16, 5  ;;  %v536_v34 = vrot.slane %v534_v17, 5  ;;  %13970 = vst [vmem:[#allocation7_spill] sm:$0xff] %v10950_v5  ;;  %v10955_v17 = vld [vmem:[%s10749_s10 + $0x84] sm:$0xf] }
  0x37   : > { %v538_v35 = vshrl.u32 %v10909_v56, 16  ;;  %v518_v14 = vrot.slane %v517_v24, 4  ;;  %v544_v39 = vshll.u32 %v10919_v11, 16  ;;  %v549_v42 = vshrl.u32 %v10924_v19, 16 }
  0x38   : > { %9403 = vmatprep.mubr.msk.bf16.mxu0 %vm766_vm3, %v8397_v20  ;;  %v513_v38 = vsel %vm10784_vm4, %v508_v22, %v512_v62  ;;  %v531_v43 = vor.u32 %v530_v31, %v527_v29  ;;  %v552_v45 = vshll.u32 %v10924_v19, 16  ;;  %v558_v49 = vshll.u32 %v10927_v26, 16  ;;  %v10962_v29 = vld [vmem:[%s10749_s10 + $0x88] sm:$0xf] }
  0x39   : > { %v540_v44 = vrot.slane %v538_v35, 4  ;;  %v523_v53 = vsel %vm10784_vm4, %v518_v14, %v522_v25  ;;  %v546_v54 = vrot.slane %v544_v39, 5  ;;  %v551_v55 = vrot.slane %v549_v42, 4 }
  0x3a   : > { %v562_v58 = vshrl.u32 %v10927_v26, 16  ;;  %v8398_v60 = vcombine.low %v513_v38, %v523_v53  ;;  %v532_v61 = vrot.slane %v531_v43, 4  ;;  %v554_v0 = vrot.slane %v552_v45, 5 }
  0x3b   : > { %v541_v62 = vor.u32 %v540_v44, %v536_v34  ;;  %v560_v6 = vrot.slane %v558_v49, 5  ;;  %v568_v8 = vshll.u32 %v10935_v40, 16  ;;  %v573_v16 = vshrl.u32 %v10941_v51, 16  ;;  %v10969_v44 = vld [vmem:[%s10749_s10 + $0x8c] sm:$0x1] }
  0x3c   : > { %v564_v7 = vrot.slane %v562_v58, 4  ;;  %9404 = vmatmul.mubr.msk.bf16.gmra.mrb[12].mxu0 %vm766_vm3, %v8398_v60  ;;  %v537_v20 = vsel %vm10784_vm4, %v532_v61, %v536_v34  ;;  %v555_v24 = vor.u32 %v554_v0, %v551_v55  ;;  %v576_v25 = vshll.u32 %v10941_v51, 16  ;;  %13971 = vst [vmem:[#allocation8_spill] sm:$0xff] %v10969_v44  ;;  %v10973_v58 = vld [vmem:[%s10749_s10 + $0x90] sm:$0xf] }
  0x3d   : > { %v542_v22 = vrot.slane %v541_v62, 4  ;;  %v570_v35 = vrot.slane %v568_v8, 5  ;;  %v575_v38 = vrot.slane %v573_v16, 4  ;;  %v582_v14 = vshll.u32 %v10947_v1, 16  ;;  %v10979_v0 = vld [vmem:[%s10749_s10 + $0x94] sm:$0xf] }
  0x3e   : > { %v565_v31 = vor.u32 %v564_v7, %v560_v6  ;;  %v556_v42 = vrot.slane %v555_v24, 4  ;;  %v578_v43 = vrot.slane %v576_v25, 5  ;;  %v586_v34 = vshrl.u32 %v10947_v1, 16  ;;  %v11046_v40 = vld [vmem:[%s10749_s10 + $0xbc] sm:$0x1] }
  0x3f   : > { %v547_v39 = vsel %vm10784_vm4, %v542_v22, %v546_v54  ;;  %v584_v53 = vrot.slane %v582_v14, 5  ;;  %v592_v55 = vshll.u32 %v10950_v5, 16  ;;  %v597_v54 = vshrl.u32 %v10955_v17, 16 }
  0x40   : > { %v8399_v45 = vcombine.low %v537_v20, %v547_v39  ;;  %v566_v49 = vrot.slane %v565_v31, 4  ;;  %v561_v60 = vsel %vm10784_vm4, %v556_v42, %v560_v6  ;;  %v579_v61 = vor.u32 %v578_v43, %v575_v38  ;;  %v10989_v42 = vld [vmem:[%s10749_s10 + $0x98] sm:$0x1]  ;;  %v10992_v43 = vld [vmem:[%s10749_s10 + $0x9c] sm:$0xf] }
  0x41   : > { %v588_v62 = vrot.slane %v586_v34, 4  ;;  %v594_v8 = vrot.slane %v592_v55, 5  ;;  %v600_v16 = vshll.u32 %v10955_v17, 16  ;;  %v606_v20 = vshll.u32 %v10962_v29, 16  ;;  %13972 = vst [vmem:[#allocation9_spill] sm:$0xff] %v10989_v42 }
  0x42   : > { %9407 = vmatprep.mubr.msk.bf16.mxu0 %vm766_vm3, %v8399_v45  ;;  %v571_v7 = vsel %vm10784_vm4, %v566_v49, %v570_v35  ;;  %v580_v6 = vrot.slane %v579_v61, 4  ;;  %v599_v25 = vrot.slane %v597_v54, 4  ;;  %v610_v14 = vshrl.u32 %v10962_v29, 16 }
  0x43   : > { %v8400_v22 = vcombine.low %v561_v60, %v571_v7  ;;  %v589_v24 = vor.u32 %v588_v62, %v584_v53  ;;  %v602_v31 = vrot.slane %v600_v16, 5  ;;  %v608_v38 = vrot.slane %v606_v20, 5 }
  0x44   : > { %v616_v39 = vshll.u32 %v10969_v44, 16  ;;  %v585_v35 = vsel %vm10784_vm4, %v580_v6, %v584_v53  ;;  %v621_v45 = vshrl.u32 %v10973_v58, 16  ;;  %v624_v49 = vshll.u32 %v10973_v58, 16  ;;  %v11004_v53 = vld [vmem:[%s10749_s10 + $0xa0] sm:$0xf] }
  0x45   : > { %9408 = vmatmul.mubr.msk.bf16.gmra.mrb[16].mxu0 %vm766_vm3, %v8400_v22  ;;  %v590_v34 = vrot.slane %v589_v24, 4  ;;  %v603_v55 = vor.u32 %v602_v31, %v599_v25  ;;  %v612_v60 = vrot.slane %v610_v14, 4  ;;  %v630_v62 = vshll.u32 %v10979_v0, 16  ;;  %v11007_v25 = vld [vmem:[%s10749_s10 + $0xa4] sm:$0x1] }
  0x46   : > { %v618_v61 = vrot.slane %v616_v39, 5  ;;  %v623_v7 = vrot.slane %v621_v45, 4  ;;  %v626_v16 = vrot.slane %v624_v49, 5  ;;  %v634_v20 = vshrl.u32 %v10979_v0, 16  ;;  %13973 = vst [vmem:[#allocation10_spill] sm:$0xff] %v11007_v25 }
  0x47   : > { %v595_v54 = vsel %vm10784_vm4, %v590_v34, %v594_v8  ;;  %v604_v6 = vrot.slane %v603_v55, 4  ;;  %v613_v24 = vor.u32 %v612_v60, %v608_v38  ;;  %v632_v33 = vrot.slane %v630_v62, 5  ;;  %v11012_v8 = vld [vmem:[%s10749_s10 + $0xa8] sm:$0xf]  ;;  %v11020_v55 = vld [vmem:[%s10749_s10 + $0xac] sm:$0xf] }
  0x48   : > { %v8401_v22 = vcombine.low %v585_v35, %v595_v54  ;;  %v627_v31 = vor.u32 %v626_v16, %v623_v7  ;;  %v636_v14 = vrot.slane %v634_v20, 4  ;;  %v640_v39 = vshll.u32 %v10989_v42, 16 }
  0x49   : > { %v645_v37 = vshrl.u32 %v10992_v43, 16  ;;  %v609_v34 = vsel %vm10784_vm4, %v604_v6, %v608_v38  ;;  %v614_v35 = vrot.slane %v613_v24, 4  ;;  %v648_v45 = vshll.u32 %v10992_v43, 16  ;;  %v11026_v38 = vld [vmem:[%s10749_s10 + $0xb0] sm:$0x1] }
  0x4a   : > { %9411 = vmatprep.mubr.msk.bf16.mxu0 %vm766_vm3, %v8401_v22  ;;  %v654_v49 = vshll.u32 %v11004_v53, 16  ;;  %v628_v60 = vrot.slane %v627_v31, 4  ;;  %v637_v62 = vor.u32 %v636_v14, %v632_v33  ;;  %v642_v54 = vrot.slane %v640_v39, 5  ;;  %13974 = vst [vmem:[#allocation11_spill] sm:$0xff] %v11026_v38 }
  0x4b   : > { %v647_v7 = vrot.slane %v645_v37, 4  ;;  %v619_v16 = vsel %vm10784_vm4, %v614_v35, %v618_v61  ;;  %v650_v20 = vrot.slane %v648_v45, 5  ;;  %v658_v22 = vshrl.u32 %v11004_v53, 16 }
  0x4c   : > { %v656_v42 = vrot.slane %v654_v49, 5  ;;  %v8402_v6 = vcombine.low %v609_v34, %v619_v16  ;;  %v633_v24 = vsel %vm10784_vm4, %v628_v60, %v632_v33  ;;  %v638_v44 = vrot.slane %v637_v62, 4  ;;  %v11039_v49 = vld [vmem:[%s10749_s10 + $0xb4] sm:$0xf] }
  0x4d   : > { %v664_v31 = vshll.u32 %v11007_v25, 16  ;;  %v651_v14 = vor.u32 %v650_v20, %v647_v7  ;;  %v660_v37 = vrot.slane %v658_v22, 4  ;;  %v669_v39 = vshrl.u32 %v11012_v8, 16  ;;  %v11042_v20 = vld [vmem:[%s10749_s10 + $0xb8] sm:$0xf] }
  0x4e   : > { %v672_v61 = vshll.u32 %v11012_v8, 16  ;;  %9412 = vmatmul.mubr.msk.bf16.gmra.mrb[20].mxu0 %vm766_vm3, %v8402_v6  ;;  %v643_v35 = vsel %vm10784_vm4, %v638_v44, %v642_v54  ;;  %v678_v45 = vshll.u32 %v11020_v55, 16  ;;  %v682_v33 = vshrl.u32 %v11020_v55, 16 }
  0x4f   : > { %v666_v34 = vrot.slane %v664_v31, 5  ;;  %v8403_v60 = vcombine.low %v633_v24, %v643_v35  ;;  %v652_v62 = vrot.slane %v651_v14, 4  ;;  %v661_v7 = vor.u32 %v660_v37, %v656_v42 }
  0x50   : > { %v671_v16 = vrot.slane %v669_v39, 4  ;;  %v674_v22 = vrot.slane %v672_v61, 5  ;;  %v680_v25 = vrot.slane %v678_v45, 5  ;;  %v684_v5 = vrot.slane %v682_v33, 4 }
  0x51   : > { %v688_v6 = vshll.u32 %v11026_v38, 16  ;;  %9415 = vmatprep.mubr.msk.bf16.mxu0 %vm766_vm3, %v8403_v60  ;;  %v657_v44 = vsel %vm10784_vm4, %v652_v62, %v656_v42  ;;  %v662_v54 = vrot.slane %v661_v7, 4  ;;  %v693_v24 = vshrl.u32 %v11039_v49, 16 }
  0x52   : > { %v696_v31 = vshll.u32 %v11039_v49, 16  ;;  %v675_v14 = vor.u32 %v674_v22, %v671_v16  ;;  %v685_v37 = vor.u32 %v684_v5, %v680_v25  ;;  %v702_v61 = vshll.u32 %v11042_v20, 16 }
  0x53   : > { %v690_v39 = vrot.slane %v688_v6, 5  ;;  %v667_v35 = vsel %vm10784_vm4, %v662_v54, %v666_v34  ;;  %v695_v45 = vrot.slane %v693_v24, 4  ;;  %v706_v60 = vshrl.u32 %v11042_v20, 16 }
  0x54   : > { %v698_v33 = vrot.slane %v696_v31, 5  ;;  %v8404_v38 = vcombine.low %v657_v44, %v667_v35  ;;  %v676_v11 = vrot.slane %v675_v14, 4  ;;  %v686_v42 = vrot.slane %v685_v37, 4  ;;  %v1281_v35 = vld [vmem:[%s10749_s10 + $0x6c] sm:$0xe] }
  0x55   : > { %v704_v62 = vrot.slane %v702_v61, 5  ;;  %v708_v48 = vrot.slane %v706_v60, 4  ;;  %v712_v16 = vshll.u32 %v11046_v40, 16  ;;  %v8424_v5 = vcombine.low %v10763_v10, %v10766_v12 }
  0x56   : > { %v699_v7 = vor.u32 %v698_v33, %v695_v45  ;;  %v1335_v22 = vrot.slane %v10769_v13, 5  ;;  %9416 = vmatmul.mubr.msk.bf16.gmra.mrb[24].mxu0 %vm766_vm3, %v8404_v38  ;;  %v681_v34 = vsel %vm10784_vm4, %v676_v11, %v680_v25  ;;  %v691_v6 = vsel %vm10784_vm4, %v686_v42, %v690_v39  ;;  %v1273_v25 = vld [vmem:[%s10749_s10 + $0xc] sm:$0xe]  ;;  %v1280_v33 = vld [vmem:[%s10749_s10 + $0x60] sm:$0xe] }
  0x57   : > { %v8426_v44 = vcombine.low %v10803_v47, %v10806_v52  ;;  %v8405_v54 = vcombine.low %v681_v34, %v691_v6  ;;  %v709_v31 = vor.u32 %v708_v48, %v704_v62  ;;  %v714_v14 = vrot.slane %v712_v16, 5  ;;  %v1275_v6 = vld [vmem:[%s10749_s10 + $0x24] sm:$0xe]  ;;  %v1284_v38 = vld [vmem:[%s10749_s10 + $0x90] sm:$0xe] }
  0x58   : > { %v700_v24 = vrot.slane %v699_v7, 4  ;;  %v8427_v37 = vcombine.low %v10821_v2, %v10824_v9  ;;  %v1276_v7 = vld [vmem:[%s10749_s10 + $0x30] sm:$0xe]  ;;  %v1356_v60 = vrot.slane %v10837_v21, 5  ;;  %v13985_v2 = vld [vmem:[#allocation9_spill] sm:$0xff] }
  0x59   : > { %9419 = vmatprep.mubr.msk.bf16.mxu0 %vm766_vm3, %v8405_v54  ;;  %v710_v39 = vrot.slane %v709_v31, 4  ;;  %v13977_v31 = vrot.slane %v10766_v12, 5 }
  0x5a   : > { %v705_v48 = vsel %vm10784_vm4, %v700_v24, %v704_v62  ;;  %v8456_v24 = vrot.slane %v1273_v25, 9  ;;  %v8458_v25 = vrot.slane %v1275_v6, 9  ;;  %v8459_v6 = vrot.slane %v1276_v7, 9 }
  0x5b   : > { %v715_v62 = vsel %vm10784_vm4, %v710_v39, %v714_v14  ;;  %v1334_v14 = vrot.slane %v13977_v31, 4  ;;  %v13978_v39 = vcombine.low %v10752_v3, %v10755_v4  ;;  %v1278_v4 = vld [vmem:[%s10749_s10 + $0x48] sm:$0xe]  ;;  %v8425_v3 = vcombine.low %v10780_v27, %v10789_v32 }
  0x5c   : > { %v8406_v34 = vcombine.low %v705_v48, %v715_v62  ;;  %v13979_v48 = vmov %v13977_v31  ;;  %v1346_v31 = vrot.slane %v10806_v52, 5  ;;  %v1363_v32 = vrot.slane %v10858_v46, 5 }
  0x5d   : > { %v11114_v62 = vsel %vm11099_vm7, %v8456_v24, %v13979_v48  ;;  %v11118_v16 = vsel %vm11099_vm7, %v1334_v14, %v1335_v22  ;;  %v1349_v24 = vrot.slane %v10813_v59, 5  ;;  %v1279_v48 = vld [vmem:[%s10749_s10 + $0x54] sm:$0xe]  ;;  %v1534_v22 = vsel %vm815_vm0, %v10831_v18, 0 }
  0x5e   : > { %9420 = vmatmul.mubr.msk.bf16.gmra.mrb[28].mxu0 %vm766_vm3, %v8406_v34  ;;  %v1277_v34 = vld [vmem:[%s10749_s10 + $0x3c] sm:$0xe]  ;;  %v1348_v42 = vrot.slane %v1346_v31, 4  ;;  %v1353_v14 = vrot.slane %v10824_v9, 5  ;;  %v1360_v18 = vrot.slane %v10853_v41, 5  ;;  %v1370_v46 = vrot.slane %v10877_v15, 5 }
  0x5f   : > { %9425 = vmatprep.mubr.msk.bf16.mxu0 %vm766_vm3, %v13978_v39  ;;  %v11128_v39 = vsel %vm11099_vm7, %v8458_v25, %v1346_v31  ;;  %v11141_v25 = vld [vmem:[%s13929_s1 + $0x6] sm:$0x3]  ;;  %v8460_v31 = vrot.slane %v1277_v34, 9  ;;  %v8461_v34 = vrot.slane %v1278_v4, 9  ;;  %v1412_v9 = vrot.slane %v13985_v2, 5  ;;  %v13986_v2 = vld [vmem:[#allocation10_spill] sm:$0xff] }
  0x60   : > { %v11145_v59 = vsel %vm11099_vm7, %v1348_v42, %v1349_v24  ;;  %v11152_v21 = vsel %vm11099_vm7, %v8459_v6, %v1353_v14  ;;  %v1355_v27 = vrot.slane %v1353_v14, 4  ;;  %v1362_v42 = vrot.slane %v1360_v18, 4 }
  0x61   : > { %v11158_v45 = vsel %vm11099_vm7, %v8460_v31, %v1360_v18  ;;  %v1367_v24 = vrot.slane %v10872_v63, 5  ;;  %v8462_v14 = vrot.slane %v1279_v48, 9  ;;  %v1374_v31 = vrot.slane %v10890_v30, 5 }
  0x62   : > { %v11168_v6 = vsel %vm11099_vm7, %v1355_v27, %v1356_v60  ;;  %v11177_v10 = vsel %vm11099_vm7, %v1362_v42, %v1363_v32  ;;  %v1282_v60 = vld [vmem:[%s10749_s10 + $0x78] sm:$0xe]  ;;  %v1283_v27 = vld [vmem:[%s10749_s10 + $0x84] sm:$0xe]  ;;  %v8463_v42 = vrot.slane %v1280_v33, 9  ;;  %v1419_v47 = vrot.slane %v13986_v2, 5 }
  0x63   : > { %v11181_v12 = vsel %vm11099_vm7, %v8461_v34, %v1367_v24  ;;  %v1376_v48 = vrot.slane %v1374_v31, 4  ;;  %v1381_v34 = vrot.slane %v10909_v56, 5  ;;  %v13988_v2 = vcombine.low %v10845_v36, %v10853_v41 }
  0x65   : > { %v11211_v33 = vsel %vm11099_vm7, %v8463_v42, %v1381_v34  ;;  %v8466_v42 = vrot.slane %v1283_v27, 9 }
  0x66   : > { %9426 = vmatmul.mubr.msk.bf16.vlgmr.msra.gmra.mrb[0].mxu0 %vm766_vm3, %v8424_v5  ;;  %v1369_v5 = vrot.slane %v1367_v24, 4  ;;  %v13981_v24 = vld [vmem:[#allocation5_spill] sm:$0xff] }
  0x67   : > { %9458 = vmatpush3.bf16.msra.mxu0 %v1534_v22  ;;  %9429 = vmatprep.mubr.msk.bf16.mxu0 %vm766_vm3, %v8425_v3  ;;  %v11190_v3 = vsel %vm11099_vm7, %v8462_v14, %v1374_v31  ;;  %v13980_v22 = vld [vmem:[#allocation4_spill] sm:$0xff]  ;;  %v1384_v4 = vrot.slane %v13981_v24, 5  ;;  %v8464_v31 = vrot.slane %v1281_v35, 9  ;;  %v13982_v24 = vld [vmem:[#allocation6_spill] sm:$0xff]  ;;  %v1395_v35 = vrot.slane %v10947_v1, 5 }
  0x68   : > { %10516 = vmatprep.subr.msk.bf16.mxu0 %vm815_vm0, %v11141_v25  ;;  %v1377_v18 = vrot.slane %v13980_v22, 5  ;;  %v11196_v32 = vsel %vm11099_vm7, %v1369_v5, %v1370_v46  ;;  %v1388_v22 = vrot.slane %v10927_v26, 5  ;;  %v1383_v5 = vrot.slane %v1381_v34, 4  ;;  %v13983_v46 = vld [vmem:[#allocation7_spill] sm:$0xff] }
  0x69   : > { %v1391_v7 = vrot.slane %v13982_v24, 5  ;;  %v1398_v11 = vrot.slane %v13983_v46, 5  ;;  %v1402_v34 = vrot.slane %v10962_v29, 5  ;;  %v1397_v27 = vrot.slane %v1395_v35, 4 }
  0x6a   : > { %v11204_v14 = vsel %vm11099_vm7, %v1376_v48, %v1377_v18  ;;  %v11216_v15 = vsel %vm11099_vm7, %v8464_v31, %v1388_v22  ;;  %v1390_v48 = vrot.slane %v1388_v22, 4  ;;  %v8465_v18 = vrot.slane %v1282_v60, 9  ;;  %v1285_v22 = vld [vmem:[%s10749_s10 + $0x9c] sm:$0xe] }
  0x6b   : > { %v11221_v61 = vsel %vm11099_vm7, %v1383_v5, %v1384_v4  ;;  %v11249_v52 = vsel %vm11099_vm7, %v8466_v42, %v1402_v34  ;;  %v11254_v5 = vsel %vm11099_vm7, %v1397_v27, %v1398_v11  ;;  %v8467_v24 = vrot.slane %v1284_v38, 9  ;;  %v13987_v11 = vld [vmem:[#allocation11_spill] sm:$0xff] }
  0x6c   : > { %v11234_v31 = vsel %vm11099_vm7, %v1390_v48, %v1391_v7  ;;  %v11238_v4 = vsel %vm11099_vm7, %v8465_v18, %v1395_v35  ;;  %v13984_v7 = vld [vmem:[#allocation8_spill] sm:$0xff]  ;;  %v1409_v48 = vrot.slane %v10979_v0, 5  ;;  %v8468_v42 = vrot.slane %v1285_v22, 9 }
  0x6d   : > { %v1405_v46 = vrot.slane %v13984_v7, 5  ;;  %v1287_v7 = vld [vmem:[%s10749_s10 + $0xb4] sm:$0xe]  ;;  %v1423_v22 = vrot.slane %v11020_v55, 5  ;;  %v1426_v13 = vrot.slane %v13987_v11, 5  ;;  %v13989_v11 = vcombine.low %v10866_v57, %v10872_v63 }
  0x6e   : > { %9430 = vmatmul.mubr.msk.bf16.gmra.mrb[4].mxu0 %vm766_vm3, %v8426_v44  ;;  %v1404_v44 = vrot.slane %v1402_v34, 4  ;;  %v1416_v34 = vrot.slane %v11004_v53, 5  ;;  %v11271_v38 = vsel %vm11099_vm7, %v8467_v24, %v1409_v48  ;;  %v1411_v27 = vrot.slane %v1409_v48, 4 }
  0x6f   : > { %9433 = vmatprep.mubr.msk.bf16.mxu0 %vm766_vm3, %v8427_v37  ;;  %v1286_v37 = vld [vmem:[%s10749_s10 + $0xa8] sm:$0xe]  ;;  %v8470_v28 = vrot.slane %v1287_v7, 9  ;;  %v1430_v24 = vrot.slane %v11042_v20, 5  ;;  %v13992_v57 = vcombine.low %v10924_v19, %v10927_v26  ;;  %v13993_v63 = vcombine.low %v10941_v51, %v10947_v1  ;;  %v1272_v19 = vld [vmem:[%s10749_s10] sm:$0xe] }
  0x70   : > { %v11263_v35 = vsel %vm11099_vm7, %v1404_v44, %v1405_v46  ;;  %v11276_v18 = vsel %vm11099_vm7, %v8468_v42, %v1416_v34  ;;  %v1418_v44 = vrot.slane %v1416_v34, 4  ;;  %v8469_v46 = vrot.slane %v1286_v37, 9  ;;  %v10673_v26 = vld [vmem:[%s10749_s10 + $0x8] sm:$0x1] }
  0x71   : > { %v11281_v60 = vsel %vm11099_vm7, %v1411_v27, %v1412_v9  ;;  %v1425_v34 = vrot.slane %v1423_v22, 4  ;;  %v1431_v7 = vsel %vm11099_vm7, %v8470_v28, %v1430_v24  ;;  %v13990_v28 = vcombine.low %v10887_v23, %v10890_v30 }
  0x72   : > { %v8484_v48 = vcombine.low %v11271_v38, %v11281_v60  ;;  %v1420_v42 = vsel %vm11099_vm7, %v1418_v44, %v1419_v47  ;;  %v1424_v37 = vsel %vm11099_vm7, %v8469_v46, %v1423_v22  ;;  %v1432_v60 = vrot.slane %v1430_v24, 4  ;;  %v1274_v46 = vld [vmem:[%s10749_s10 + $0x18] sm:$0xe] }
  0x73   : > { %v8485_v9 = vcombine.low %v11276_v18, %v1420_v42  ;;  %v1433_v47 = vrot.slane %v11046_v40, 5  ;;  %v1427_v36 = vsel %vm11099_vm7, %v1425_v34, %v1426_v13  ;;  %v13991_v40 = vcombine.low %v10903_v50, %v10909_v56  ;;  %v10672_v50 = vld [vmem:[%s10749_s10 + $0x4] sm:$0xf] }
  0x74   : > { %v8486_v41 = vcombine.low %v1424_v37, %v1427_v36  ;;  %v13994_v23 = vcombine.low %v10955_v17, %v10962_v29  ;;  %v13995_v30 = vcombine.low %v10973_v58, %v10979_v0  ;;  %v1325_v56 = vrot.slane %v10672_v50, 5  ;;  %v10674_v0 = vld [vmem:[%s10749_s10 + $0x1c] sm:$0xf] }
  0x75   : > { %v1434_v18 = vsel %vm11099_vm7, %v1432_v60, %v1433_v47  ;;  %v1328_v13 = vrot.slane %v10673_v26, 5  ;;  %v8455_v51 = vrot.slane %v1272_v19, 9  ;;  %v13996_v27 = vcombine.low %v10992_v43, %v11004_v53  ;;  %v10675_v43 = vld [vmem:[%s10749_s10 + $0x20] sm:$0x1]  ;;  %v10578_v47 = vld [vmem:[%s10749_s10 + $0x54] sm:$0xff]  }
  0x76   : > { %9434 = vmatmul.mubr.msk.bf16.gmra.mrb[8].mxu0 %vm766_vm3, %v13988_v2  ;;  %v8487_v38 = vcombine.low %v1431_v7, %v1434_v18  ;;  %v1327_v1 = vrot.slane %v1325_v56, 4  ;;  %v13997_v17 = vcombine.low %v11012_v8, %v11020_v55  ;;  %v1339_v44 = vrot.slane %v10674_v0, 5  ;;  %v8617_v7 = vld [vmem:[%s13929_s1 + $0x8] sm:$0x3]  ;;  %v11467_v19 = vld [vmem:[%s10749_s10 + $0x10] sm:$0xf] }
  0x77   : > { %9437 = vmatprep.mubr.msk.bf16.mxu0 %vm766_vm3, %v13989_v11  ;;  %v1326_v29 = vsel %vm11099_vm7, %v8455_v51, %v1325_v56  ;;  %v8457_v24 = vrot.slane %v1274_v46, 9  ;;  %v1342_v53 = vrot.slane %v10675_v43, 5  ;;  %v13998_v37 = vcombine.low %v11039_v49, %v11042_v20  ;;  %v11453_v18 = vld [vmem:[%s10749_s10 + $0x68] sm:$0x1]  ;;  %v10580_v56 = vld [vmem:[%s10749_s10 + $0x6c] sm:$0xff]   ;;  %v10587_v51 = vld [vmem:[%s10749_s10 + $0xc0] sm:$0xff]  }
  0x78   : > { %v1329_v58 = vsel %vm11099_vm7, %v1327_v1, %v1328_v13  ;;  %v1341_v42 = vrot.slane %v1339_v44, 4  ;;  %v1893_v2 = vsel %vm815_vm0, %v11141_v25, 0  ;;  %v13999_v49 = vcombine.low %v11114_v62, %v11118_v16  ;;  %v8572_v13 = vld [vmem:[%s10749_s10 + $0x18] sm:$0xf]  ;;  %v11483_v0 = vld [vmem:[%s10749_s10 + $0x80] sm:$0x1] }
  0x79   : > { %v8472_v22 = vcombine.low %v1326_v29, %v1329_v58  ;;  %v1340_v8 = vsel %vm11099_vm7, %v8457_v24, %v1339_v44  ;;  %v14000_v20 = vcombine.low %v11128_v39, %v11145_v59  ;;  %v14001_v25 = vcombine.low %v11152_v21, %v11168_v6  ;;  %v11480_v58 = vld [vmem:[%s10749_s10 + $0x7c] sm:$0xf] }
  0x7a   : > { %v1343_v55 = vsel %vm11099_vm7, %v1341_v42, %v1342_v53  ;;  %v14002_v16 = vcombine.low %v11158_v45, %v11177_v10  ;;  %v14003_v62 = vcombine.low %v11181_v12, %v11196_v32  ;;  %v14004_v39 = vcombine.low %v11190_v3, %v11204_v14  ;;  %v10573_v10 = vld [vmem:[%s10749_s10 + $0x18] sm:$0xff]   ;;  %v10574_v12 = vld [vmem:[%s10749_s10 + $0x24] sm:$0xff]   ;;  %v10575_v32 = vld [vmem:[%s10749_s10 + $0x30] sm:$0xff]  }
  0x7b   : > { %v8474_v34 = vcombine.low %v1340_v8, %v1343_v55  ;;  %v14005_v59 = vcombine.low %v11211_v33, %v11221_v61  ;;  %v14006_v45 = vcombine.low %v11216_v15, %v11234_v31  ;;  %v14007_v21 = vcombine.low %v11238_v4, %v11254_v5  ;;  %v10572_v61 = vld [vmem:[%s10749_s10 + $0xc] sm:$0xff]   ;;  %v11417_v3 = vld [vmem:[%s13929_s1 + $0xa] sm:$0x3]  ;;  %v10576_v14 = vld [vmem:[%s10749_s10 + $0x3c] sm:$0xff]  }
  0x7c   : > { %v14008_v6 = vcombine.low %v11249_v52, %v11263_v35  ;;  %v2619_v15 = vsel %vm815_vm0, %v8617_v7, 0  ;;  %v11427_v33 = vld [vmem:[%s10749_s10 + $0x4c] sm:$0xf]  ;;  %v11430_v31 = vld [vmem:[%s10749_s10 + $0x50] sm:$0x1]  ;;  %v2150_v29 = vshrl.u32 %v11467_v19, 16 }
  0x7d   : > { %v8655_v4 = vld [vmem:[%s10749_s10 + $0x48] sm:$0xe]  ;;  %v2915_v52 = vrot.slane %v11427_v33, 5  ;;  %v2918_v5 = vrot.slane %v11430_v31, 5  ;;  %v2161_v44 = vshrl.u32 %v8572_v13, 16  ;;  %v2164_v46 = vshll.u32 %v8572_v13, 16 }
  0x7e   : > { %9438 = vmatmul.mubr.msk.bf16.gmra.mrb[12].mxu0 %vm766_vm3, %v13990_v28  ;;  %v8671_v35 = vrot.slane %v8655_v4, 9  ;;  %v2943_v24 = vrot.slane %v11480_v58, 5  ;;  %v2946_v42 = vrot.slane %v11483_v0, 5  ;;  %v11490_v43 = vld [vmem:[%s10749_s10 + $0x1c] sm:$0xf] }
  0x7f   : > { %9441 = vmatprep.mubr.msk.bf16.mxu0 %vm766_vm3, %v13991_v40  ;;  %v2932_v40 = vrot.slane %v11453_v18, 5  ;;  %v10581_v55 = vld [vmem:[%s10749_s10 + $0x78] sm:$0xff]  }
  0x80   : > { %v11439_v60 = vsel %vm11099_vm7, %v8671_v35, %v2915_v52  ;;  %v2945_v8 = vrot.slane %v2943_v24, 4  ;;  %v11525_v4 = vld [vmem:[%s10749_s10 + $0x98] sm:$0x1]  ;;  %v8661_v35 = vld [vmem:[%s10749_s10 + $0x90] sm:$0xe] }
  0x86   : > { %9442 = vmatmul.mubr.msk.bf16.gmra.mrb[16].mxu0 %vm766_vm3, %v13992_v57 }
  0x87   : > { %9445 = vmatprep.mubr.msk.bf16.mxu0 %vm766_vm3, %v13993_v63 }
  0x8e   : > { %9446 = vmatmul.mubr.msk.bf16.gmra.mrb[20].mxu0 %vm766_vm3, %v13994_v23  ;;  %v10579_v23 = vld [vmem:[%s10749_s10 + $0x60] sm:$0xff]  }
  0x8f   : > { %9449 = vmatprep.mubr.msk.bf16.mxu0 %vm766_vm3, %v13995_v30  ;;  %v8569_v30 = vld [vmem:[%s10749_s10 + $0xc] sm:$0xf] }
  0x90   : > { %v2137_v1 = vshrl.u32 %v8569_v30, 16 }
  0x96   : > { %9450 = vmatmul.mubr.msk.bf16.gmra.mrb[24].mxu0 %vm766_vm3, %v13996_v27  ;;  %v2140_v27 = vshll.u32 %v8569_v30, 16 }
  0x97   : > { %9453 = vmatprep.mubr.msk.bf16.mxu0 %vm766_vm3, %v13997_v17  ;;  %v2146_v17 = vshll.u32 %v11467_v19, 16 }
  0x9e   : > { %9454 = vmatmul.mubr.msk.bf16.gmra.mrb[28].mxu0 %vm766_vm3, %v13998_v37  ;;  %v2139_v37 = vrot.slane %v2137_v1, 4  ;;  %v8578_v1 = vld [vmem:[%s10749_s10 + $0x30] sm:$0xf] }
  0x9f   : > { %9459 = vmatprep.mubr.msk.bf16.mxu0 %vm766_vm3, %v8472_v22  ;;  %v8659_v22 = vld [vmem:[%s10749_s10 + $0x78] sm:$0xe] }
  0xa0   : > { %v8675_v53 = vrot.slane %v8659_v22, 9 }
  0xa6   : > { %9460 = vmatmul.mubr.msk.bf16.vlgmr.msra.gmra.mrb[0].mxu0 %vm766_vm3, %v13999_v49  ;;  %v2152_v49 = vrot.slane %v2150_v29, 4  ;;  %v10584_v29 = vld [vmem:[%s10749_s10 + $0x9c] sm:$0xff]  }
  0xa7   : > { %9492 = vmatpush3.bf16.msra.mxu0 %v1893_v2  ;;  %9463 = vmatprep.mubr.msk.bf16.mxu0 %vm766_vm3, %v8474_v34  ;;  %v11494_v34 = vld [vmem:[%s10749_s10 + $0x14] sm:$0x1]  ;;  %v2142_v2 = vrot.slane %v2140_v27, 5 }
  0xa8   : > { %10517 = vmatprep.subr.msk.bf16.mxu0 %vm815_vm0, %v8617_v7  ;;  %v11496_v7 = vrot.slane %v2146_v17, 5  ;;  %v11539_v27 = vld [vmem:[%s10749_s10 + $0x34] sm:$0xf] }
  0xae   : > { %9464 = vmatmul.mubr.msk.bf16.gmra.mrb[4].mxu0 %vm766_vm3, %v14000_v20  ;;  %v11500_v20 = vsel %vm11099_vm7, %v8675_v53, %v2943_v24 }
  0xaf   : > { %9467 = vmatprep.mubr.msk.bf16.mxu0 %vm766_vm3, %v14001_v25  ;;  %14010 = vst [vmem:[#allocation5_spill] sm:$0xff] %v11500_v20  ;;  %v10582_v25 = vld [vmem:[%s10749_s10 + $0x84] sm:$0xff]  }
  0xb6   : > { %9468 = vmatmul.mubr.msk.bf16.gmra.mrb[8].mxu0 %vm766_vm3, %v14002_v16  ;;  %v2163_v16 = vrot.slane %v2161_v44, 4 }
  0xb7   : > { %9471 = vmatprep.mubr.msk.bf16.mxu0 %vm766_vm3, %v14003_v62  ;;  %v2166_v62 = vrot.slane %v2164_v46, 5 }
  0xbe   : > { %9472 = vmatmul.mubr.msk.bf16.gmra.mrb[12].mxu0 %vm766_vm3, %v14004_v39  ;;  %v2170_v39 = vshll.u32 %v11490_v43, 16 }
  0xbf   : > { %9475 = vmatprep.mubr.msk.bf16.mxu0 %vm766_vm3, %v14005_v59  ;;  %v11506_v59 = vsel %vm11099_vm7, %v2945_v8, %v2946_v42  ;;  %v11620_v8 = vld [vmem:[%s10749_s10 + $0xc4] sm:$0xf] }
  0xc0   : > { %14011 = vst [vmem:[#allocation6_spill] sm:$0xff] %v11506_v59 }
  0xc6   : > { %9476 = vmatmul.mubr.msk.bf16.gmra.mrb[16].mxu0 %vm766_vm3, %v14006_v45  ;;  %v2174_v45 = vshrl.u32 %v11490_v43, 16 }
  0xc7   : > { %9479 = vmatprep.mubr.msk.bf16.mxu0 %vm766_vm3, %v14007_v21 }
  0xce   : > { %9480 = vmatmul.mubr.msk.bf16.gmra.mrb[20].mxu0 %vm766_vm3, %v14008_v6  ;;  %v2156_v6 = vshll.u32 %v11494_v34, 16 }
  0xcf   : > { %9483 = vmatprep.mubr.msk.bf16.mxu0 %vm766_vm3, %v8484_v48  ;;  %v2917_v48 = vrot.slane %v2915_v52, 4  ;;  %v2167_v52 = vor.u32 %v2166_v62, %v2163_v16  ;;  %v2218_v16 = vshll.u32 %v11539_v27, 16 }
  0xd0   : > { %v2158_v46 = vrot.slane %v2156_v6, 5  ;;  %v11567_v6 = vld [vmem:[%s10749_s10 + $0xb0] sm:$0x1] }
  0xd1   : > { %v11444_v11 = vsel %vm11099_vm7, %v2917_v48, %v2918_v5  ;;  %v11528_v5 = vrot.slane %v2170_v39, 5  ;;  %v11546_v22 = vrot.slane %v2167_v52, 4  ;;  %v2222_v39 = vshrl.u32 %v11539_v27, 16  ;;  %v8663_v52 = vld [vmem:[%s10749_s10 + $0xa8] sm:$0xe] }
  0xd6   : > { %9484 = vmatmul.mubr.msk.bf16.gmra.mrb[24].mxu0 %vm766_vm3, %v8485_v9  ;;  %v10577_v9 = vld [vmem:[%s10749_s10 + $0x48] sm:$0xff]  }
  0xd7   : > { %9487 = vmatprep.mubr.msk.bf16.mxu0 %vm766_vm3, %v8486_v41  ;;  %v11450_v41 = vld [vmem:[%s10749_s10 + $0x64] sm:$0xf] }
  0xd8   : > { %v2929_v28 = vrot.slane %v11450_v41, 5 }
  0xda   : > { %v2931_v63 = vrot.slane %v2929_v28, 4 }
  0xdc   : > { %v11471_v26 = vsel %vm11099_vm7, %v2931_v63, %v2932_v40  ;;  %v8677_v40 = vrot.slane %v8661_v35, 9 }
  0xdd   : > { %14009 = vst [vmem:[#allocation4_spill] sm:$0xff] %v11471_v26 }
  0xde   : > { %9488 = vmatmul.mubr.msk.bf16.gmra.mrb[28].mxu0 %vm766_vm3, %v8487_v38  ;;  %v8657_v38 = vld [vmem:[%s10749_s10 + $0x60] sm:$0xe] }
  0xdf   : > { %9493 = vmatprep.mubr.msk.bf16.mxu0 %vm766_vm3, %v10572_v61  ;;  %v8673_v57 = vrot.slane %v8657_v38, 9  ;;  %v11513_v61 = vld [vmem:[%s10749_s10 + $0x20] sm:$0x1] }
  0xe0   : > { %v2180_v63 = vshll.u32 %v11513_v61, 16 }
  0xe1   : > { %v11463_v50 = vsel %vm11099_vm7, %v8673_v57, %v2929_v28  ;;  %v10583_v57 = vld [vmem:[%s10749_s10 + $0x90] sm:$0xff]  }
  0xe6   : > { %9494 = vmatmul.mubr.msk.bf16.vlgmr.msra.gmra.mrb[0].mxu0 %vm766_vm3, %v10573_v10  ;;  %v8575_v10 = vld [vmem:[%s10749_s10 + $0x24] sm:$0xf] }
  0xe7   : > { %9526 = vmatpush3.bf16.msra.mxu0 %v2619_v15  ;;  %9497 = vmatprep.mubr.msk.bf16.mxu0 %vm766_vm3, %v10574_v12  ;;  %v2143_v12 = vor.u32 %v2142_v2, %v2139_v37  ;;  %v2153_v15 = vor.u32 %v2152_v49, %v11496_v7  ;;  %v2185_v38 = vshrl.u32 %v8575_v10, 16  ;;  %v2188_v28 = vshll.u32 %v8575_v10, 16 }
  0xe8   : > { %10518 = vmatprep.subr.msk.bf16.mxu0 %vm815_vm0, %v11417_v3  ;;  %v2209_v49 = vshrl.u32 %v8578_v1, 16 }
  0xe9   : > { %v2154_v44 = vrot.slane %v2153_v15, 4  ;;  %v2187_v53 = vrot.slane %v2185_v38, 4  ;;  %v2190_v37 = vrot.slane %v2188_v28, 5  ;;  %v11573_v15 = vrot.slane %v2180_v63, 5  ;;  %v8581_v28 = vld [vmem:[%s10749_s10 + $0x3c] sm:$0xf] }
  0xeb   : > { %v2191_v38 = vor.u32 %v2190_v37, %v2187_v53  ;;  %v2233_v37 = vshrl.u32 %v8581_v28, 16 }
  0xee   : > { %9498 = vmatmul.mubr.msk.bf16.gmra.mrb[4].mxu0 %vm766_vm3, %v10575_v32  ;;  %v11519_v32 = vld [vmem:[%s10749_s10 + $0x28] sm:$0xf] }
  0xef   : > { %9501 = vmatprep.mubr.msk.bf16.mxu0 %vm766_vm3, %v10576_v14  ;;  %v11522_v14 = vld [vmem:[%s10749_s10 + $0x94] sm:$0xf]  ;;  %v2198_v13 = vshrl.u32 %v11519_v32, 16 }
  0xf0   : > { %v2957_v48 = vrot.slane %v11522_v14, 5 }
  0xf1   : > { %v2200_v62 = vrot.slane %v2198_v13, 4 }
  0xf2   : > { %v2959_v30 = vrot.slane %v2957_v48, 4  ;;  %v11543_v17 = vsel %vm11099_vm7, %v8677_v40, %v2957_v48  ;;  %v2974_v48 = vrot.slane %v11567_v6, 5  ;;  %v8679_v40 = vrot.slane %v8663_v52, 9 }
  0xf3   : > { %14012 = vst [vmem:[#allocation7_spill] sm:$0xff] %v11543_v17 }
  0xf6   : > { %9502 = vmatmul.mubr.msk.bf16.gmra.mrb[8].mxu0 %vm766_vm3, %v10577_v9  ;;  %v2960_v9 = vrot.slane %v11525_v4, 5 }
  0xf7   : > { %9505 = vmatprep.mubr.msk.bf16.mxu0 %vm766_vm3, %v10578_v47  ;;  %v2176_v47 = vrot.slane %v2174_v45, 4  ;;  %v11564_v45 = vld [vmem:[%s10749_s10 + $0xac] sm:$0xf] }
  0xf8   : > { %v11550_v24 = vsel %vm11099_vm7, %v2959_v30, %v2960_v9  ;;  %v2971_v35 = vrot.slane %v11564_v45, 5  ;;  %v2159_v9 = vsel %vm10784_vm4, %v2154_v44, %v2158_v46  ;;  %v2224_v44 = vrot.slane %v2222_v39, 4 }
  0xf9   : > { %14013 = vst [vmem:[#allocation8_spill] sm:$0xff] %v11550_v24  ;;  %v2177_v42 = vor.u32 %v2176_v47, %v11528_v5 }
  0xfa   : > { %v2973_v30 = vrot.slane %v2971_v35, 4  ;;  %v11596_v46 = vsel %vm11099_vm7, %v8679_v40, %v2971_v35  ;;  %v2192_v35 = vrot.slane %v2191_v38, 4  ;;  %v11623_v38 = vld [vmem:[%s10749_s10 + $0xc8] sm:$0x1] }
  0xfb   : > { %v11580_v47 = vrot.slane %v2177_v42, 4  ;;  %14015 = vst [vmem:[#allocation9_spill] sm:$0xff] %v11596_v46  ;;  %v10586_v42 = vld [vmem:[%s10749_s10 + $0xb4] sm:$0xff]   ;;  %v2266_v46 = vshll.u32 %v11427_v33, 16 }
  0xfc   : > { %v11602_v52 = vsel %vm11099_vm7, %v2973_v30, %v2974_v48 }
  0xfd   : > { %14016 = vst [vmem:[#allocation10_spill] sm:$0xff] %v11602_v52 }
  0xfe   : > { %9506 = vmatmul.mubr.msk.bf16.gmra.mrb[12].mxu0 %vm766_vm3, %v10579_v23  ;;  %v2194_v23 = vshll.u32 %v11519_v32, 16 }
  0xff   : > { %9509 = vmatprep.mubr.msk.bf16.mxu0 %vm766_vm3, %v10580_v56  ;;  %v2144_v56 = vrot.slane %v2143_v12, 4 }
 0x100   : > { %v11558_v2 = vrot.slane %v2194_v23, 5  ;;  %v11585_v23 = vld [vmem:[%s10749_s10 + $0x40] sm:$0xf] }
 0x101   : > { %v2149_v12 = vsel %vm10784_vm4, %v2144_v56, %v11496_v7  ;;  %v10585_v56 = vld [vmem:[%s10749_s10 + $0xa8] sm:$0xff]   ;;  %v2246_v39 = vshrl.u32 %v11585_v23, 16 }
 0x102   : > { %v2201_v13 = vor.u32 %v2200_v62, %v11558_v2  ;;  %v8618_v53 = vcombine.low %v2149_v12, %v2159_v9  ;;  %v2242_v62 = vshll.u32 %v11585_v23, 16 }
 0x106   : > { %9510 = vmatmul.mubr.msk.bf16.gmra.mrb[16].mxu0 %vm766_vm3, %v10581_v55  ;;  %v11556_v55 = vld [vmem:[%s10749_s10 + $0x2c] sm:$0x1] }
 0x107   : > { %9513 = vmatprep.mubr.msk.bf16.mxu0 %vm766_vm3, %v10582_v25  ;;  %v2212_v25 = vshll.u32 %v8578_v1, 16  ;;  %v2204_v7 = vshll.u32 %v11556_v55, 16  ;;  %v11590_v1 = vld [vmem:[%s10749_s10 + $0x38] sm:$0x1] }
 0x108   : > { %v2228_v48 = vshll.u32 %v11590_v1, 16 }
 0x109   : > { %v2214_v63 = vrot.slane %v2212_v25, 5  ;;  %v8584_v25 = vld [vmem:[%s10749_s10 + $0x48] sm:$0xf]  ;;  %v2206_v9 = vrot.slane %v2204_v7, 5  ;;  %v2235_v7 = vrot.slane %v2233_v37, 4 }
 0x10a   : > { %v2257_v30 = vshrl.u32 %v8584_v25, 16  ;;  %v2260_v12 = vshll.u32 %v8584_v25, 16  ;;  %v11648_v25 = vld [vmem:[%s10749_s10 + $0x58] sm:$0xf] }
 0x10e   : > { %9514 = vmatmul.mubr.msk.bf16.gmra.mrb[20].mxu0 %vm766_vm3, %v10583_v57  ;;  %v2211_v57 = vrot.slane %v2209_v49, 4  ;;  %v2236_v49 = vshll.u32 %v8581_v28, 16 }
 0x10f   : > { %9517 = vmatprep.mubr.msk.bf16.mxu0 %vm766_vm3, %v10584_v29  ;;  %v11592_v29 = vrot.slane %v2218_v16, 5  ;;  %v2173_v16 = vsel %vm10784_vm4, %v11546_v22, %v11528_v5  ;;  %v2183_v5 = vsel %vm10784_vm4, %v11580_v47, %v11573_v15  ;;  %v2202_v22 = vrot.slane %v2201_v13, 4  ;;  %v11630_v47 = vld [vmem:[%s10749_s10 + $0x44] sm:$0x1] }
 0x110   : > { %v2215_v28 = vor.u32 %v2214_v63, %v2211_v57  ;;  %v2238_v57 = vrot.slane %v2236_v49, 5  ;;  %v8665_v63 = vld [vmem:[%s10749_s10 + $0xc0] sm:$0xe]  ;;  %v2988_v15 = vrot.slane %v11623_v38, 5  ;;  %v11632_v13 = vrot.slane %v2242_v62, 5 }
 0x111   : > { %v2225_v40 = vor.u32 %v2224_v44, %v11592_v29  ;;  %v2248_v44 = vrot.slane %v2246_v39, 4  ;;  %v8681_v21 = vrot.slane %v8665_v63, 9  ;;  %v11640_v49 = vrot.slane %v2228_v48, 5  ;;  %v8587_v39 = vld [vmem:[%s10749_s10 + $0x54] sm:$0xf] }
 0x112   : > { %v11638_v37 = vrot.slane %v2215_v28, 4  ;;  %v2207_v52 = vsel %vm10784_vm4, %v2202_v22, %v2206_v9  ;;  %v2270_v62 = vshrl.u32 %v11427_v33, 16  ;;  %v2252_v28 = vshll.u32 %v11630_v47, 16 }
 0x113   : > { %v2249_v9 = vor.u32 %v2248_v44, %v11632_v13  ;;  %v2259_v22 = vrot.slane %v2257_v30, 4  ;;  %v2262_v33 = vrot.slane %v2260_v12, 5  ;;  %v11669_v30 = vrot.slane %v2266_v46, 5 }
 0x114   : > { %v2272_v12 = vrot.slane %v2270_v62, 4  ;;  %v2221_v44 = vsel %vm10784_vm4, %v11638_v37, %v11592_v29  ;;  %v11689_v37 = vld [vmem:[%s10749_s10 + $0x70] sm:$0xf] }
 0x115   : > { %v2250_v62 = vrot.slane %v2249_v9, 4  ;;  %v2318_v9 = vshrl.u32 %v11450_v41, 16 }
 0x116   : > { %9518 = vmatmul.mubr.msk.bf16.gmra.mrb[24].mxu0 %vm766_vm3, %v10585_v56  ;;  %v2985_v56 = vrot.slane %v11620_v8, 5 }
 0x117   : > { %9521 = vmatprep.mubr.msk.bf16.mxu0 %vm766_vm3, %v10586_v42  ;;  %v2197_v42 = vsel %vm10784_vm4, %v2192_v35, %v11558_v2  ;;  %v11654_v2 = vrot.slane %v2225_v40, 4  ;;  %v2239_v35 = vor.u32 %v2238_v57, %v2235_v7  ;;  %v2290_v40 = vshll.u32 %v11648_v25, 16 }
 0x118   : > { %v2987_v36 = vrot.slane %v2985_v56, 4  ;;  %v11652_v63 = vsel %vm11099_vm7, %v8681_v21, %v2985_v56  ;;  %v2281_v21 = vshrl.u32 %v8587_v39, 16  ;;  %v2284_v56 = vshll.u32 %v8587_v39, 16 }
 0x119   : > { %14017 = vst [vmem:[#allocation11_spill] sm:$0xff] %v11652_v63  ;;  %v2294_v7 = vshrl.u32 %v11648_v25, 16  ;;  %v3089_v57 = vsel %vm815_vm0, %v11417_v3, 0  ;;  %v8590_v3 = vld [vmem:[%s10749_s10 + $0x60] sm:$0xf]  ;;  %v2240_v46 = vrot.slane %v2239_v35, 4  ;;  %v2263_v39 = vor.u32 %v2262_v33, %v2259_v22 }
 0x11a   : > { %v11659_v48 = vsel %vm11099_vm7, %v2987_v36, %v2988_v15  ;;  %v8619_v36 = vcombine.low %v2173_v16, %v2183_v5  ;;  %v8620_v15 = vcombine.low %v2197_v42, %v2207_v52  ;;  %v2254_v16 = vrot.slane %v2252_v28, 5  ;;  %v11681_v5 = vld [vmem:[%s10749_s10 + $0x5c] sm:$0x1]  ;;  %v8593_v52 = vld [vmem:[%s10749_s10 + $0x6c] sm:$0xf] }
 0x11b   : > { %14018 = vst [vmem:[#allocation3_spill] sm:$0xff] %v11659_v48  ;;  %v2283_v42 = vrot.slane %v2281_v21, 4  ;;  %v2286_v24 = vrot.slane %v2284_v56, 5  ;;  %v11686_v48 = vrot.slane %v2290_v40, 5  ;;  %v2296_v29 = vrot.slane %v2294_v7, 4 }
 0x11c   : > { %v2273_v63 = vor.u32 %v2272_v12, %v11669_v30  ;;  %v2308_v28 = vshll.u32 %v8590_v3, 16  ;;  %v2314_v35 = vshll.u32 %v11450_v41, 16  ;;  %v2332_v22 = vshll.u32 %v8593_v52, 16  ;;  %v8596_v41 = vld [vmem:[%s10749_s10 + $0x78] sm:$0xf] }
 0x11d   : > { %v2245_v33 = vsel %vm10784_vm4, %v2240_v46, %v11632_v13  ;;  %v2255_v21 = vsel %vm10784_vm4, %v2250_v62, %v2254_v16  ;;  %v2338_v56 = vshll.u32 %v11689_v37, 16  ;;  %v2342_v40 = vshrl.u32 %v11689_v37, 16 }
 0x11e   : > { %9522 = vmatmul.mubr.msk.bf16.gmra.mrb[28].mxu0 %vm766_vm3, %v10587_v51  ;;  %v2231_v51 = vsel %vm10784_vm4, %v11654_v2, %v11640_v49  ;;  %v2300_v49 = vshll.u32 %v11681_v5, 16  ;;  %v2305_v2 = vshrl.u32 %v8590_v3, 16  ;;  %v2264_v7 = vrot.slane %v2263_v39, 4 }
 0x11f   : > { %9527 = vmatprep.mubr.msk.bf16.mxu0 %vm766_vm3, %v8618_v53  ;;  %v2276_v53 = vshll.u32 %v11430_v31, 16  ;;  %v2329_v31 = vshrl.u32 %v8593_v52, 16  ;;  %v2287_v3 = vor.u32 %v2286_v24, %v2283_v42  ;;  %v2297_v17 = vor.u32 %v2296_v29, %v11686_v48  ;;  %v11707_v52 = vld [vmem:[%s13929_s1 + $0xc] sm:$0x3]  ;;  %v11714_v29 = vld [vmem:[%s10749_s10 + $0x74] sm:$0x1] }
 0x120   : > { %v2274_v13 = vrot.slane %v2273_v63, 4  ;;  %v2302_v16 = vrot.slane %v2300_v49, 5  ;;  %v2307_v46 = vrot.slane %v2305_v2, 4  ;;  %v2310_v62 = vrot.slane %v2308_v28, 5 }
 0x121   : > { %v2278_v12 = vrot.slane %v2276_v53, 5  ;;  %v11711_v39 = vrot.slane %v2314_v35, 5  ;;  %v2320_v24 = vrot.slane %v2318_v9, 4  ;;  %v2331_v53 = vrot.slane %v2329_v31, 4 }
 0x122   : > { %v2334_v42 = vrot.slane %v2332_v22, 5  ;;  %v11716_v59 = vrot.slane %v2338_v56, 5  ;;  %v2344_v20 = vrot.slane %v2342_v40, 4  ;;  %v2353_v26 = vshrl.u32 %v8596_v41, 16  ;;  %v8599_v40 = vld [vmem:[%s10749_s10 + $0x84] sm:$0xf] }
 0x123   : > { %v2356_v63 = vshll.u32 %v8596_v41, 16  ;;  %v2366_v49 = vshrl.u32 %v11480_v58, 16  ;;  %v8621_v2 = vcombine.low %v2221_v44, %v2231_v51  ;;  %v8622_v28 = vcombine.low %v2245_v33, %v2255_v21 }
 0x124   : > { %v2269_v35 = vsel %vm10784_vm4, %v2264_v7, %v11669_v30  ;;  %v2279_v9 = vsel %vm10784_vm4, %v2274_v13, %v2278_v12  ;;  %v2311_v31 = vor.u32 %v2310_v62, %v2307_v46  ;;  %v2321_v22 = vor.u32 %v2320_v24, %v11711_v39 }
 0x125   : > { %v2324_v56 = vshll.u32 %v11453_v18, 16  ;;  %v2345_v44 = vor.u32 %v2344_v20, %v11716_v59  ;;  %v2355_v51 = vrot.slane %v2353_v26, 4  ;;  %v2358_v33 = vrot.slane %v2356_v63, 5  ;;  %v8602_v63 = vld [vmem:[%s10749_s10 + $0x90] sm:$0xf] }
 0x126   : > { %9528 = vmatmul.mubr.msk.bf16.vlgmr.msra.gmra.mrb[0].mxu0 %vm766_vm3, %v8619_v36  ;;  %v2288_v36 = vrot.slane %v2287_v3, 4  ;;  %v11732_v3 = vld [vmem:[%s10749_s10 + $0x88] sm:$0xf]  ;;  %v2368_v18 = vrot.slane %v2366_v49, 4  ;;  %v2377_v12 = vshrl.u32 %v8599_v40, 16  ;;  %v2380_v41 = vshll.u32 %v8599_v40, 16 }
 0x127   : > { %9560 = vmatpush3.bf16.msra.mxu0 %v3089_v57  ;;  %9531 = vmatprep.mubr.msk.bf16.mxu0 %vm766_vm3, %v8620_v15  ;;  %v2298_v57 = vrot.slane %v2297_v17, 4  ;;  %v2362_v15 = vshll.u32 %v11480_v58, 16  ;;  %v2348_v17 = vshll.u32 %v11714_v29, 16  ;;  %v2335_v58 = vor.u32 %v2334_v42, %v2331_v53  ;;  %v11750_v49 = vld [vmem:[%s10749_s10 + $0x8c] sm:$0x1] }
 0x128   : > { %10519 = vmatprep.subr.msk.bf16.mxu0 %vm815_vm0, %v11707_v52  ;;  %v2293_v30 = vsel %vm10784_vm4, %v2288_v36, %v11686_v48  ;;  %v2386_v20 = vshll.u32 %v11732_v3, 16  ;;  %v2390_v26 = vshrl.u32 %v11732_v3, 16  ;;  %v2312_v13 = vrot.slane %v2311_v31, 4 }
 0x129   : > { %v2303_v21 = vsel %vm10784_vm4, %v2298_v57, %v2302_v16  ;;  %v11740_v7 = vrot.slane %v2362_v15, 5  ;;  %v2322_v48 = vrot.slane %v2321_v22, 4  ;;  %v2326_v46 = vrot.slane %v2324_v56, 5 }
 0x12a   : > { %v2350_v62 = vrot.slane %v2348_v17, 5  ;;  %v2336_v16 = vrot.slane %v2335_v58, 4  ;;  %v2346_v24 = vrot.slane %v2345_v44, 4  ;;  %v2359_v53 = vor.u32 %v2358_v33, %v2355_v51 }
 0x12b   : > { %v2372_v42 = vshll.u32 %v11483_v0, 16  ;;  %v8623_v36 = vcombine.low %v2269_v35, %v2279_v9  ;;  %v8624_v57 = vcombine.low %v2293_v30, %v2303_v21  ;;  %v2369_v15 = vor.u32 %v2368_v18, %v11740_v7  ;;  %v8605_v35 = vld [vmem:[%s10749_s10 + $0x9c] sm:$0xf]  ;;  %v11761_v9 = vld [vmem:[%s10749_s10 + $0xa0] sm:$0xf] }
 0x12c   : > { %v11752_v31 = vrot.slane %v2386_v20, 5  ;;  %v2392_v22 = vrot.slane %v2390_v26, 4  ;;  %v2317_v56 = vsel %vm10784_vm4, %v2312_v13, %v11711_v39  ;;  %v2327_v17 = vsel %vm10784_vm4, %v2322_v48, %v2326_v46 }
 0x12d   : > { %v2401_v0 = vshrl.u32 %v8602_v63, 16  ;;  %v2404_v40 = vshll.u32 %v8602_v63, 16  ;;  %v2341_v58 = vsel %vm10784_vm4, %v2336_v16, %v11716_v59  ;;  %v2351_v44 = vsel %vm10784_vm4, %v2346_v24, %v2350_v62 }
 0x12e   : > { %9532 = vmatmul.mubr.msk.bf16.gmra.mrb[4].mxu0 %vm766_vm3, %v8621_v2  ;;  %v2379_v2 = vrot.slane %v2377_v12, 4  ;;  %v2360_v51 = vrot.slane %v2359_v53, 4  ;;  %v2374_v33 = vrot.slane %v2372_v42, 5  ;;  %v2370_v30 = vrot.slane %v2369_v15, 4 }
 0x12f   : > { %9535 = vmatprep.mubr.msk.bf16.mxu0 %vm766_vm3, %v8622_v28  ;;  %v2382_v28 = vrot.slane %v2380_v41, 5  ;;  %v2396_v39 = vshll.u32 %v11750_v49, 16  ;;  %v2410_v21 = vshll.u32 %v11522_v14, 16  ;;  %v2414_v18 = vshrl.u32 %v11522_v14, 16 }
 0x130   : > { %v2425_v12 = vshrl.u32 %v8605_v35, 16  ;;  %v2428_v41 = vshll.u32 %v8605_v35, 16  ;;  %v2434_v20 = vshll.u32 %v11761_v9, 16  ;;  %v2438_v59 = vshrl.u32 %v11761_v9, 16 }
 0x131   : > { %v2383_v26 = vor.u32 %v2382_v28, %v2379_v2  ;;  %v2393_v13 = vor.u32 %v2392_v22, %v11752_v31  ;;  %v2403_v48 = vrot.slane %v2401_v0, 4  ;;  %v2406_v46 = vrot.slane %v2404_v40, 5  ;;  %v8608_v22 = vld [vmem:[%s10749_s10 + $0xa8] sm:$0xf] }
 0x132   : > { %v8625_v62 = vcombine.low %v2317_v56, %v2327_v17  ;;  %v8626_v16 = vcombine.low %v2341_v58, %v2351_v44  ;;  %v2365_v14 = vsel %vm10784_vm4, %v2360_v51, %v11740_v7  ;;  %v2375_v24 = vsel %vm10784_vm4, %v2370_v30, %v2374_v33  ;;  %v8611_v33 = vld [vmem:[%s10749_s10 + $0xb4] sm:$0xf]  ;;  %v11792_v30 = vld [vmem:[%s10749_s10 + $0xb8] sm:$0xf] }
 0x133   : > { %v2398_v53 = vrot.slane %v2396_v39, 5  ;;  %v11781_v42 = vrot.slane %v2410_v21, 5  ;;  %v2416_v63 = vrot.slane %v2414_v18, 4  ;;  %v2430_v15 = vrot.slane %v2428_v41, 5 }
 0x134   : > { %v2436_v2 = vrot.slane %v2434_v20, 5  ;;  %v2440_v28 = vrot.slane %v2438_v59, 4  ;;  %v2384_v56 = vrot.slane %v2383_v26, 4  ;;  %v2394_v17 = vrot.slane %v2393_v13, 4 }
 0x135   : > { %v2407_v0 = vor.u32 %v2406_v46, %v2403_v48  ;;  %v2420_v7 = vshll.u32 %v11525_v4, 16  ;;  %v8627_v35 = vcombine.low %v2365_v14, %v2375_v24  ;;  %v2417_v58 = vor.u32 %v2416_v63, %v11781_v42 }
 0x136   : > { %9536 = vmatmul.mubr.msk.bf16.gmra.mrb[8].mxu0 %vm766_vm3, %v8623_v36  ;;  %v11784_v36 = vld [vmem:[%s10749_s10 + $0xa4] sm:$0x1]  ;;  %v2449_v44 = vshrl.u32 %v8608_v22, 16  ;;  %v2452_v51 = vshll.u32 %v8608_v22, 16  ;;  %v2441_v21 = vor.u32 %v2440_v28, %v2436_v2  ;;  %v2458_v18 = vshll.u32 %v11564_v45, 16 }
 0x137   : > { %9539 = vmatprep.mubr.msk.bf16.mxu0 %vm766_vm3, %v8624_v57  ;;  %v2427_v57 = vrot.slane %v2425_v12, 4  ;;  %v2444_v40 = vshll.u32 %v11784_v36, 16  ;;  %v2462_v12 = vshrl.u32 %v11564_v45, 16  ;;  %v2389_v4 = vsel %vm10784_vm4, %v2384_v56, %v11752_v31 }
 0x138   : > { %v2399_v41 = vsel %vm10784_vm4, %v2394_v17, %v2398_v53  ;;  %v2408_v20 = vrot.slane %v2407_v0, 4  ;;  %v2422_v59 = vrot.slane %v2420_v7, 5  ;;  %v2473_v26 = vshrl.u32 %v8611_v33, 16  ;;  %v8614_v17 = vld [vmem:[%s10749_s10 + $0xc0] sm:$0xf] }
 0x139   : > { %v2431_v39 = vor.u32 %v2430_v15, %v2427_v57  ;;  %v2476_v13 = vshll.u32 %v8611_v33, 16  ;;  %v2482_v48 = vshll.u32 %v11792_v30, 16  ;;  %v2486_v46 = vshrl.u32 %v11792_v30, 16 }
 0x13a   : > { %v2446_v45 = vrot.slane %v2444_v40, 5  ;;  %v2454_v14 = vrot.slane %v2452_v51, 5  ;;  %v2442_v63 = vrot.slane %v2441_v21, 4  ;;  %v2460_v31 = vrot.slane %v2458_v18, 5 }
 0x13b   : > { %v2432_v24 = vrot.slane %v2431_v39, 4  ;;  %v2464_v57 = vrot.slane %v2462_v12, 4  ;;  %v8628_v15 = vcombine.low %v2389_v4, %v2399_v41  ;;  %v2475_v53 = vrot.slane %v2473_v26, 4 }
 0x13c   : > { %v2478_v28 = vrot.slane %v2476_v13, 5  ;;  %v2484_v22 = vrot.slane %v2482_v48, 5  ;;  %v2488_v56 = vrot.slane %v2486_v46, 4  ;;  %v2413_v0 = vsel %vm10784_vm4, %v2408_v20, %v11781_v42 }
 0x13d   : > { %v2447_v51 = vsel %vm10784_vm4, %v2442_v63, %v2446_v45  ;;  %v2465_v33 = vor.u32 %v2464_v57, %v2460_v31  ;;  %v2468_v39 = vshll.u32 %v11567_v6, 16  ;;  %v2497_v42 = vshrl.u32 %v8614_v17, 16 }
 0x13e   : > { %9540 = vmatmul.mubr.msk.bf16.gmra.mrb[12].mxu0 %vm766_vm3, %v8625_v62  ;;  %v2418_v62 = vrot.slane %v2417_v58, 4  ;;  %v11812_v58 = vld [vmem:[%s10749_s10 + $0xbc] sm:$0x1]  ;;  %v2500_v21 = vshll.u32 %v8614_v17, 16  ;;  %v2506_v18 = vshll.u32 %v11620_v8, 16  ;;  %v2510_v12 = vshrl.u32 %v11620_v8, 16 }
 0x13f   : > { %9543 = vmatprep.mubr.msk.bf16.mxu0 %vm766_vm3, %v8626_v16  ;;  %v2451_v16 = vrot.slane %v2449_v44, 4  ;;  %v2437_v44 = vsel %vm10784_vm4, %v2432_v24, %v2436_v2  ;;  %v2479_v4 = vor.u32 %v2478_v28, %v2475_v53  ;;  %v2489_v41 = vor.u32 %v2488_v56, %v2484_v22  ;;  %v8650_v17 = vld [vmem:[%s10749_s10 + $0xc] sm:$0xe] }
 0x140   : > { %v2423_v7 = vsel %vm10784_vm4, %v2418_v62, %v2422_v59  ;;  %v8630_v2 = vcombine.low %v2437_v44, %v2447_v51  ;;  %v2466_v26 = vrot.slane %v2465_v33, 4  ;;  %v2470_v13 = vrot.slane %v2468_v39, 5 }
 0x141   : > { %v2455_v40 = vor.u32 %v2454_v14, %v2451_v16  ;;  %v8629_v20 = vcombine.low %v2413_v0, %v2423_v7  ;;  %v2499_v48 = vrot.slane %v2497_v42, 4  ;;  %v2502_v46 = vrot.slane %v2500_v21, 5 }
 0x142   : > { %v2508_v6 = vrot.slane %v2506_v18, 5  ;;  %v2512_v62 = vrot.slane %v2510_v12, 4  ;;  %v2480_v45 = vrot.slane %v2479_v4, 4  ;;  %v2490_v16 = vrot.slane %v2489_v41, 4  ;;  %v8651_v18 = vld [vmem:[%s10749_s10 + $0x18] sm:$0xe] }
 0x143   : > { %v2456_v59 = vrot.slane %v2455_v40, 4  ;;  %v2471_v24 = vsel %vm10784_vm4, %v2466_v26, %v2470_v13  ;;  %v2503_v63 = vor.u32 %v2502_v46, %v2499_v48  ;;  %v2880_v56 = vrot.slane %v11467_v19, 5  ;;  %v8652_v12 = vld [vmem:[%s10749_s10 + $0x24] sm:$0xe] }
 0x144   : > { %v2513_v57 = vor.u32 %v2512_v62, %v2508_v6  ;;  %v2485_v53 = vsel %vm10784_vm4, %v2480_v45, %v2484_v22  ;;  %v8666_v51 = vrot.slane %v8650_v17, 9  ;;  %v2887_v39 = vrot.slane %v11490_v43, 5  ;;  %v8654_v62 = vld [vmem:[%s10749_s10 + $0x3c] sm:$0xe] }
 0x145   : > { %v2461_v8 = vsel %vm10784_vm4, %v2456_v59, %v2460_v31  ;;  %v2504_v7 = vrot.slane %v2503_v63, 4  ;;  %v2882_v33 = vrot.slane %v2880_v56, 4  ;;  %v8668_v59 = vrot.slane %v8652_v12, 9 }
 0x146   : > { %9544 = vmatmul.mubr.msk.bf16.gmra.mrb[16].mxu0 %vm766_vm3, %v8627_v35  ;;  %v2492_v35 = vshll.u32 %v11812_v58, 16  ;;  %v8631_v31 = vcombine.low %v2461_v8, %v2471_v24  ;;  %v2514_v40 = vrot.slane %v2513_v57, 4  ;;  %v2881_v42 = vsel %vm11099_vm7, %v8666_v51, %v2880_v56  ;;  %v8656_v56 = vld [vmem:[%s10749_s10 + $0x54] sm:$0xe] }
 0x147   : > { %9547 = vmatprep.mubr.msk.bf16.mxu0 %vm766_vm3, %v8628_v15  ;;  %v2516_v15 = vshll.u32 %v11623_v38, 16  ;;  %v2883_v38 = vrot.slane %v11494_v34, 5  ;;  %v2509_v22 = vsel %vm10784_vm4, %v2504_v7, %v2508_v6  ;;  %v2894_v34 = vrot.slane %v11519_v32, 5  ;;  %v8653_v6 = vld [vmem:[%s10749_s10 + $0x30] sm:$0xe] }
 0x148   : > { %v2494_v14 = vrot.slane %v2492_v35, 5  ;;  %v8667_v35 = vrot.slane %v8651_v18, 9  ;;  %v2897_v26 = vrot.slane %v11556_v55, 5  ;;  %v2901_v48 = vrot.slane %v11539_v27, 5  ;;  %v8660_v18 = vld [vmem:[%s10749_s10 + $0x84] sm:$0xe] }
 0x149   : > { %v2518_v44 = vrot.slane %v2516_v15, 5  ;;  %v2884_v21 = vsel %vm11099_vm7, %v2882_v33, %v2883_v38  ;;  %v2896_v43 = vrot.slane %v2894_v34, 4  ;;  %v2895_v46 = vsel %vm11099_vm7, %v8668_v59, %v2894_v34  ;;  %v8658_v33 = vld [vmem:[%s10749_s10 + $0x6c] sm:$0xe] }
 0x14a   : > { %v2495_v28 = vsel %vm10784_vm4, %v2490_v16, %v2494_v14  ;;  %v8683_v41 = vcombine.low %v2881_v42, %v2884_v21  ;;  %v2888_v32 = vsel %vm11099_vm7, %v8667_v35, %v2887_v39  ;;  %v2908_v55 = vrot.slane %v11585_v23, 5 }
 0x14b   : > { %v8632_v0 = vcombine.low %v2485_v53, %v2495_v28  ;;  %v2519_v19 = vsel %vm10784_vm4, %v2514_v40, %v2518_v44  ;;  %v8669_v14 = vrot.slane %v8653_v6, 9  ;;  %v2903_v8 = vrot.slane %v2901_v48, 4  ;;  %v11875_v53 = vld [vmem:[%s13929_s1 + $0xe] sm:$0x3] }
 0x14c   : > { %v8633_v4 = vcombine.low %v2509_v22, %v2519_v19  ;;  %v2904_v24 = vrot.slane %v11590_v1, 5  ;;  %v3448_v27 = vsel %vm815_vm0, %v11707_v52, 0  ;;  %v8670_v63 = vrot.slane %v8654_v62, 9  ;;  %v14025_v62 = vld [vmem:[#allocation7_spill] sm:$0xff] }
 0x14d   : > { %v2910_v57 = vrot.slane %v2908_v55, 4  ;;  %v2911_v15 = vrot.slane %v11630_v47, 5  ;;  %v2902_v23 = vsel %vm11099_vm7, %v8669_v14, %v2901_v48  ;;  %v2922_v28 = vrot.slane %v11648_v25, 5 }
 0x14e   : > { %9548 = vmatmul.mubr.msk.bf16.gmra.mrb[20].mxu0 %vm766_vm3, %v8629_v20  ;;  %v2889_v20 = vrot.slane %v2887_v39, 4  ;;  %v2905_v1 = vsel %vm11099_vm7, %v2903_v8, %v2904_v24  ;;  %v2909_v47 = vsel %vm11099_vm7, %v8670_v63, %v2908_v55  ;;  %v2925_v40 = vrot.slane %v11681_v5, 5  ;;  %v14028_v24 = vld [vmem:[#allocation9_spill] sm:$0xff] }
 0x14f   : > { %9551 = vmatprep.mubr.msk.bf16.mxu0 %vm766_vm3, %v8630_v2  ;;  %v2890_v2 = vrot.slane %v11513_v61, 5  ;;  %v2898_v61 = vsel %vm11099_vm7, %v2896_v43, %v2897_v26  ;;  %v2912_v52 = vsel %vm11099_vm7, %v2910_v57, %v2911_v15  ;;  %v8686_v17 = vcombine.low %v2902_v23, %v2905_v1  ;;  %v14023_v26 = vld [vmem:[#allocation6_spill] sm:$0xff]  ;;  %v14031_v57 = vld [vmem:[#allocation11_spill] sm:$0xff] }
 0x150   : > { %v8685_v16 = vcombine.low %v2895_v46, %v2898_v61  ;;  %v2924_v7 = vrot.slane %v2922_v28, 4  ;;  %v2936_v51 = vrot.slane %v11689_v37, 5  ;;  %v8674_v22 = vrot.slane %v8658_v33, 9  ;;  %v8664_v46 = vld [vmem:[%s10749_s10 + $0xb4] sm:$0xe]  ;;  %v10589_v1 = vld [vmem:[%s10749_s10 + $0x24] sm:$0xff]  }
 0x151   : > { %v2891_v13 = vsel %vm11099_vm7, %v2889_v20, %v2890_v2  ;;  %v2939_v39 = vrot.slane %v11714_v29, 5  ;;  %v14019_v5 = vcombine.low %v11439_v60, %v11444_v11  ;;  %v2950_v21 = vrot.slane %v11732_v3, 5  ;;  %v14020_v60 = vld [vmem:[#allocation4_spill] sm:$0xff]  ;;  %v14032_v15 = vld [vmem:[#allocation3_spill] sm:$0xff] }
 0x152   : > { %v8684_v45 = vcombine.low %v2888_v32, %v2891_v13  ;;  %v2926_v25 = vsel %vm11099_vm7, %v2924_v7, %v2925_v40  ;;  %v2938_v19 = vrot.slane %v2936_v51, 4  ;;  %v2937_v42 = vsel %vm11099_vm7, %v8674_v22, %v2936_v51  ;;  %v8662_v20 = vld [vmem:[%s10749_s10 + $0x9c] sm:$0xe]  ;;  %v10593_v51 = vld [vmem:[%s10749_s10 + $0x54] sm:$0xff]  }
 0x153   : > { %v8676_v12 = vrot.slane %v8660_v18, 9  ;;  %v2952_v29 = vrot.slane %v2950_v21, 4  ;;  %v14021_v11 = vcombine.low %v11463_v50, %v14020_v60  ;;  %v2964_v35 = vrot.slane %v11761_v9, 5  ;;  %v14022_v50 = vld [vmem:[#allocation5_spill] sm:$0xff]  ;;  %v10596_v60 = vld [vmem:[%s10749_s10 + $0x78] sm:$0xff]  }
 0x154   : > { %v2940_v37 = vsel %vm11099_vm7, %v2938_v19, %v2939_v39  ;;  %v8678_v59 = vrot.slane %v8662_v20, 9  ;;  %v2967_v43 = vrot.slane %v11784_v36, 5  ;;  %v14024_v32 = vcombine.low %v14022_v50, %v14023_v26  ;;  %v11997_v39 = vld [vmem:[%s10749_s10 + $0x70] sm:$0xf]  ;;  %v12030_v50 = vld [vmem:[%s10749_s10 + $0x8c] sm:$0x1] }
 0x155   : > { %v8691_v34 = vcombine.low %v2937_v42, %v2940_v37  ;;  %v2978_v48 = vrot.slane %v11792_v30, 5  ;;  %v8680_v61 = vrot.slane %v8664_v46, 9  ;;  %v2981_v55 = vrot.slane %v11812_v58, 5  ;;  %v10588_v58 = vld [vmem:[%s10749_s10 + $0x18] sm:$0xff]   ;;  %v8868_v42 = vld [vmem:[%s10749_s10 + $0x6c] sm:$0xe] }
 0x156   : > { %9552 = vmatmul.mubr.msk.bf16.gmra.mrb[24].mxu0 %vm766_vm3, %v8631_v31  ;;  %v8687_v31 = vcombine.low %v2909_v47, %v2912_v52  ;;  %v2965_v13 = vsel %vm11099_vm7, %v8678_v59, %v2964_v35  ;;  %v14033_v23 = vcombine.low %v14031_v57, %v14032_v15  ;;  %v10590_v47 = vld [vmem:[%s10749_s10 + $0x30] sm:$0xff]   ;;  %v4174_v52 = vsel %vm815_vm0, %v11875_v53, 0  ;;  %v12037_v46 = vld [vmem:[%s10749_s10 + $0x28] sm:$0xf] }
 0x157   : > { %9555 = vmatprep.mubr.msk.bf16.mxu0 %vm766_vm3, %v8632_v0  ;;  %v8672_v0 = vrot.slane %v8656_v56, 9  ;;  %v2980_v6 = vrot.slane %v2978_v48, 4  ;;  %v2979_v14 = vsel %vm11099_vm7, %v8680_v61, %v2978_v48  ;;  %v10591_v56 = vld [vmem:[%s10749_s10 + $0x3c] sm:$0xff]   ;;  %v4484_v37 = vrot.slane %v11997_v39, 5 }
 0x158   : > { %v8884_v18 = vrot.slane %v8868_v42, 9  ;;  %v4501_v48 = vrot.slane %v12030_v50, 5  ;;  %v3729_v57 = vshrl.u32 %v12037_v46, 16 }
 0x159   : > { %v2923_v44 = vsel %vm11099_vm7, %v8672_v0, %v2922_v28  ;;  %v2982_v30 = vsel %vm11099_vm7, %v2980_v6, %v2981_v55  ;;  %v11964_v28 = vld [vmem:[%s13929_s1 + $0x10] sm:$0x3]  ;;  %v8866_v0 = vld [vmem:[%s10749_s10 + $0x54] sm:$0xe]  ;;  %v10597_v55 = vld [vmem:[%s10749_s10 + $0x84] sm:$0xff]  }
 0x15a   : > { %v8689_v38 = vcombine.low %v2923_v44, %v2926_v25  ;;  %v8697_v8 = vcombine.low %v2979_v14, %v2982_v30  ;;  %v8882_v44 = vrot.slane %v8866_v0, 9  ;;  %v12069_v0 = vld [vmem:[%s10749_s10 + $0xa0] sm:$0xf]  ;;  %v3731_v42 = vrot.slane %v3729_v57, 4 }
 0x15e   : > { %9556 = vmatmul.mubr.msk.bf16.gmra.mrb[28].mxu0 %vm766_vm3, %v8633_v4  ;;  %v2953_v4 = vrot.slane %v11750_v49, 5  ;;  %v2966_v49 = vrot.slane %v2964_v35, 4  ;;  %v10603_v35 = vld [vmem:[%s10749_s10 + $0xcc] sm:$0xff]  }
 0x15f   : > { %9561 = vmatprep.mubr.msk.bf16.mxu0 %vm766_vm3, %v8683_v41  ;;  %v2951_v41 = vsel %vm11099_vm7, %v8676_v12, %v2950_v21  ;;  %v10595_v12 = vld [vmem:[%s10749_s10 + $0x6c] sm:$0xff]  }
 0x160   : > { %v2954_v3 = vsel %vm11099_vm7, %v2952_v29, %v2953_v4  ;;  %v2968_v9 = vsel %vm11099_vm7, %v2966_v49, %v2967_v43  ;;  %v8780_v29 = vld [vmem:[%s10749_s10 + $0x18] sm:$0xf]  ;;  %v12010_v4 = vsel %vm11099_vm7, %v8884_v18, %v4484_v37  ;;  %v12027_v43 = vld [vmem:[%s10749_s10 + $0x88] sm:$0xf] }
 0x161   : > { %v8693_v2 = vcombine.low %v2951_v41, %v2954_v3  ;;  %v8695_v36 = vcombine.low %v2965_v13, %v2968_v9  ;;  %v8783_v3 = vld [vmem:[%s10749_s10 + $0x24] sm:$0xf]  ;;  %v3692_v20 = vshrl.u32 %v8780_v29, 16  ;;  %v4498_v9 = vrot.slane %v12027_v43, 5 }
 0x162   : > { %v3716_v26 = vshrl.u32 %v8783_v3, 16  ;;  %v8870_v13 = vld [vmem:[%s10749_s10 + $0x84] sm:$0xe] }
 0x163   : > { %v3694_v61 = vrot.slane %v3692_v20, 4  ;;  %v4500_v6 = vrot.slane %v4498_v9, 4 }
 0x166   : > { %9562 = vmatmul.mubr.msk.bf16.vlgmr.msra.gmra.mrb[0].mxu0 %vm766_vm3, %v8684_v45  ;;  %v14026_v45 = vld [vmem:[#allocation8_spill] sm:$0xff] }
 0x167   : > { %9594 = vmatpush3.bf16.msra.mxu0 %v3448_v27  ;;  %9565 = vmatprep.mubr.msk.bf16.mxu0 %vm766_vm3, %v8685_v16  ;;  %v14027_v16 = vcombine.low %v14025_v62, %v14026_v45  ;;  %v14029_v27 = vld [vmem:[#allocation10_spill] sm:$0xff]  ;;  %v12041_v62 = vld [vmem:[%s10749_s10 + $0x20] sm:$0x1] }
 0x168   : > { %10520 = vmatprep.subr.msk.bf16.mxu0 %vm815_vm0, %v11875_v53  ;;  %v14030_v63 = vcombine.low %v14028_v24, %v14029_v27  ;;  %v11974_v53 = vld [vmem:[%s10749_s10 + $0x58] sm:$0xf]  ;;  %v3718_v24 = vrot.slane %v3716_v26, 4  ;;  %v10600_v26 = vld [vmem:[%s10749_s10 + $0xa8] sm:$0xff]  }
 0x169   : > { %v4470_v7 = vrot.slane %v11974_v53, 5 }
 0x16b   : > { %v4472_v25 = vrot.slane %v4470_v7, 4  ;;  %v11986_v33 = vsel %vm11099_vm7, %v8882_v44, %v4470_v7  ;;  %v12072_v7 = vld [vmem:[%s10749_s10 + $0xa4] sm:$0x1] }
 0x16e   : > { %9566 = vmatmul.mubr.msk.bf16.gmra.mrb[4].mxu0 %vm766_vm3, %v8686_v17  ;;  %v10592_v17 = vld [vmem:[%s10749_s10 + $0x48] sm:$0xff]  }
 0x16f   : > { %9569 = vmatprep.mubr.msk.bf16.mxu0 %vm766_vm3, %v8687_v31  ;;  %v11977_v31 = vld [vmem:[%s10749_s10 + $0x5c] sm:$0x1] }
 0x170   : > { %v4473_v40 = vrot.slane %v11977_v31, 5 }
 0x172   : > { %v11991_v22 = vsel %vm11099_vm7, %v4472_v25, %v4473_v40  ;;  %v8872_v25 = vld [vmem:[%s10749_s10 + $0x9c] sm:$0xe] }
 0x173   : > { %v8888_v18 = vrot.slane %v8872_v25, 9 }
 0x176   : > { %9570 = vmatmul.mubr.msk.bf16.gmra.mrb[8].mxu0 %vm766_vm3, %v14019_v5  ;;  %v12000_v5 = vld [vmem:[%s10749_s10 + $0x74] sm:$0x1] }
 0x177   : > { %9573 = vmatprep.mubr.msk.bf16.mxu0 %vm766_vm3, %v8689_v38  ;;  %v10594_v38 = vld [vmem:[%s10749_s10 + $0x60] sm:$0xff]   ;;  %v4487_v21 = vrot.slane %v12000_v5, 5 }
 0x17e   : > { %9574 = vmatmul.mubr.msk.bf16.gmra.mrb[12].mxu0 %vm766_vm3, %v14021_v11  ;;  %v12014_v11 = vld [vmem:[%s10749_s10 + $0x1c] sm:$0xf] }
 0x17f   : > { %9577 = vmatprep.mubr.msk.bf16.mxu0 %vm766_vm3, %v8691_v34  ;;  %v4486_v34 = vrot.slane %v4484_v37, 4  ;;  %v3701_v59 = vshll.u32 %v12014_v11, 16  ;;  %v3705_v49 = vshrl.u32 %v12014_v11, 16 }
 0x181   : > { %v12018_v41 = vsel %vm11099_vm7, %v4486_v34, %v4487_v21  ;;  %v3707_v14 = vrot.slane %v3705_v49, 4  ;;  %v10599_v34 = vld [vmem:[%s10749_s10 + $0x9c] sm:$0xff]  }
 0x182   : > { %14034 = vst [vmem:[#allocation4_spill] sm:$0xff] %v12018_v41  ;;  %v12256_v41 = vld [vmem:[%s10749_s10 + $0x80] sm:$0x1] }
 0x186   : > { %9578 = vmatmul.mubr.msk.bf16.gmra.mrb[16].mxu0 %vm766_vm3, %v14024_v32  ;;  %v3719_v32 = vshll.u32 %v8783_v3, 16 }
 0x187   : > { %9581 = vmatprep.mubr.msk.bf16.mxu0 %vm766_vm3, %v8693_v2  ;;  %v3695_v2 = vshll.u32 %v8780_v29, 16 }
 0x188   : > { %v3721_v27 = vrot.slane %v3719_v32, 5 }
 0x189   : > { %v3697_v45 = vrot.slane %v3695_v2, 5  ;;  %v8789_v2 = vld [vmem:[%s10749_s10 + $0x3c] sm:$0xf] }
 0x18a   : > { %v3722_v40 = vor.u32 %v3721_v27, %v3718_v24  ;;  %v3767_v24 = vshll.u32 %v8789_v2, 16 }
 0x18e   : > { %9582 = vmatmul.mubr.msk.bf16.gmra.mrb[20].mxu0 %vm766_vm3, %v14027_v16  ;;  %v12043_v16 = vrot.slane %v3701_v59, 5  ;;  %v12086_v59 = vld [vmem:[%s10749_s10 + $0x40] sm:$0xf] }
 0x18f   : > { %9585 = vmatprep.mubr.msk.bf16.mxu0 %vm766_vm3, %v8695_v36  ;;  %v8886_v36 = vrot.slane %v8870_v13, 9  ;;  %v3773_v27 = vshll.u32 %v12086_v59, 16  ;;  %v3777_v57 = vshrl.u32 %v12086_v59, 16 }
 0x191   : > { %v12047_v30 = vsel %vm11099_vm7, %v8886_v36, %v4498_v9  ;;  %v12093_v9 = vrot.slane %v3722_v40, 4  ;;  %v8874_v40 = vld [vmem:[%s10749_s10 + $0xb4] sm:$0xe] }
 0x192   : > { %14035 = vst [vmem:[#allocation5_spill] sm:$0xff] %v12047_v30 }
 0x196   : > { %9586 = vmatmul.mubr.msk.bf16.gmra.mrb[24].mxu0 %vm766_vm3, %v14030_v63  ;;  %v3725_v63 = vshll.u32 %v12037_v46, 16 }
 0x197   : > { %9589 = vmatprep.mubr.msk.bf16.mxu0 %vm766_vm3, %v8697_v8  ;;  %v10598_v8 = vld [vmem:[%s10749_s10 + $0x90] sm:$0xff]  }
 0x198   : > { %v12075_v44 = vrot.slane %v3725_v63, 5 }
 0x19a   : > { %v3732_v36 = vor.u32 %v3731_v42, %v12075_v44 }
 0x19c   : > { %v12127_v42 = vrot.slane %v3732_v36, 4  ;;  %v10602_v36 = vld [vmem:[%s10749_s10 + $0xc0] sm:$0xff]  }
 0x19e   : > { %9590 = vmatmul.mubr.msk.bf16.gmra.mrb[28].mxu0 %vm766_vm3, %v14033_v23  ;;  %v3711_v23 = vshll.u32 %v12041_v62, 16 }
 0x19f   : > { %9595 = vmatprep.mubr.msk.bf16.mxu0 %vm766_vm3, %v10588_v58  ;;  %v12053_v58 = vsel %vm11099_vm7, %v4500_v6, %v4501_v48 }
 0x1a0   : > { %14036 = vst [vmem:[#allocation6_spill] sm:$0xff] %v12053_v58  ;;  %v3713_v13 = vrot.slane %v3711_v23, 5  ;;  %v12111_v23 = vld [vmem:[%s10749_s10 + $0xb8] sm:$0xf] }
 0x1a1   : > { %v4526_v25 = vrot.slane %v12111_v23, 5 }
 0x1a6   : > { %9596 = vmatmul.mubr.msk.bf16.vlgmr.msra.gmra.mrb[0].mxu0 %vm766_vm3, %v10589_v1  ;;  %v12060_v1 = vld [vmem:[%s10749_s10 + $0x2c] sm:$0x1] }
 0x1a7   : > { %9628 = vmatpush3.bf16.msra.mxu0 %v4174_v52  ;;  %9599 = vmatprep.mubr.msk.bf16.mxu0 %vm766_vm3, %v10590_v47  ;;  %v8786_v47 = vld [vmem:[%s10749_s10 + $0x30] sm:$0xf]  ;;  %v3698_v52 = vor.u32 %v3697_v45, %v3694_v61  ;;  %v12103_v45 = vld [vmem:[%s10749_s10 + $0x38] sm:$0x1]  ;;  %v4445_v10 = vrot.slane %v12060_v1, 5 }
 0x1a8   : > { %10521 = vmatprep.subr.msk.bf16.mxu0 %vm815_vm0, %v11964_v28  ;;  %v3740_v37 = vshrl.u32 %v8786_v47, 16  ;;  %v3743_v21 = vshll.u32 %v8786_v47, 16  ;;  %v12114_v47 = vld [vmem:[%s10749_s10 + $0xbc] sm:$0x1] }
 0x1a9   : > { %v3699_v3 = vrot.slane %v3698_v52, 4 }
 0x1aa   : > { %v3742_v61 = vrot.slane %v3740_v37, 4  ;;  %v3745_v6 = vrot.slane %v3743_v21, 5  ;;  %v8792_v21 = vld [vmem:[%s10749_s10 + $0x48] sm:$0xf] }
 0x1ab   : > { %v3704_v52 = vsel %vm10784_vm4, %v3699_v3, %v12043_v16  ;;  %v10601_v3 = vld [vmem:[%s10749_s10 + $0xb4] sm:$0xff]  }
 0x1ac   : > { %v3746_v37 = vor.u32 %v3745_v6, %v3742_v61  ;;  %v3788_v6 = vshrl.u32 %v8792_v21, 16 }
 0x1ae   : > { %9600 = vmatmul.mubr.msk.bf16.gmra.mrb[4].mxu0 %vm766_vm3, %v10591_v56  ;;  %v3708_v56 = vor.u32 %v3707_v14, %v12043_v16  ;;  %v3759_v16 = vshll.u32 %v12103_v45, 16 }
 0x1af   : > { %9603 = vmatprep.mubr.msk.bf16.mxu0 %vm766_vm3, %v10592_v17  ;;  %v12066_v17 = vld [vmem:[%s10749_s10 + $0x34] sm:$0xf] }
 0x1b0   : > { %v3749_v29 = vshll.u32 %v12066_v17, 16  ;;  %v3753_v20 = vshrl.u32 %v12066_v17, 16  ;;  %v3709_v32 = vrot.slane %v3708_v56, 4 }
 0x1b2   : > { %v12105_v14 = vrot.slane %v3749_v29, 5  ;;  %v3755_v63 = vrot.slane %v3753_v20, 4  ;;  %v12132_v29 = vld [vmem:[%s10749_s10 + $0x4c] sm:$0xf] }
 0x1b4   : > { %v3756_v20 = vor.u32 %v3755_v63, %v12105_v14  ;;  %v3797_v63 = vshll.u32 %v12132_v29, 16 }
 0x1b6   : > { %9604 = vmatmul.mubr.msk.bf16.gmra.mrb[8].mxu0 %vm766_vm3, %v10593_v51  ;;  %v4512_v51 = vrot.slane %v12069_v0, 5 }
 0x1b7   : > { %9607 = vmatprep.mubr.msk.bf16.mxu0 %vm766_vm3, %v10594_v38  ;;  %v4515_v38 = vrot.slane %v12072_v7, 5 }
 0x1b8   : > { %v12090_v49 = vsel %vm11099_vm7, %v8888_v18, %v4512_v51  ;;  %v8890_v18 = vrot.slane %v8874_v40, 9 }
 0x1b9   : > { %14037 = vst [vmem:[#allocation7_spill] sm:$0xff] %v12090_v49 }
 0x1be   : > { %9608 = vmatmul.mubr.msk.bf16.gmra.mrb[12].mxu0 %vm766_vm3, %v10595_v12  ;;  %v3735_v12 = vshll.u32 %v12060_v1, 16 }
 0x1bf   : > { %9611 = vmatprep.mubr.msk.bf16.mxu0 %vm766_vm3, %v10596_v60  ;;  %v4514_v60 = vrot.slane %v4512_v51, 4  ;;  %v4529_v51 = vrot.slane %v12114_v47, 5 }
 0x1c0   : > { %v12120_v56 = vrot.slane %v3735_v12, 5  ;;  %v3769_v12 = vrot.slane %v3767_v24, 5  ;;  %v8795_v24 = vld [vmem:[%s10749_s10 + $0x54] sm:$0xf] }
 0x1c1   : > { %v12097_v48 = vsel %vm11099_vm7, %v4514_v60, %v4515_v38  ;;  %v3714_v38 = vsel %vm10784_vm4, %v3709_v32, %v3713_v13  ;;  %v4528_v60 = vrot.slane %v4526_v25, 4  ;;  %v3779_v32 = vrot.slane %v3777_v57, 4 }
 0x1c2   : > { %14038 = vst [vmem:[#allocation8_spill] sm:$0xff] %v12097_v48  ;;  %v12143_v13 = vsel %vm11099_vm7, %v8890_v18, %v4526_v25  ;;  %v8829_v61 = vcombine.low %v3704_v52, %v3714_v38  ;;  %v3801_v57 = vshrl.u32 %v12132_v29, 16  ;;  %v3747_v25 = vrot.slane %v3746_v37, 4  ;;  %v12170_v37 = vld [vmem:[%s10749_s10 + $0xd4] sm:$0x1] }
 0x1c3   : > { %14039 = vst [vmem:[#allocation9_spill] sm:$0xff] %v12143_v13  ;;  %v12149_v40 = vsel %vm11099_vm7, %v4528_v60, %v4529_v51  ;;  %v3761_v38 = vrot.slane %v3759_v16, 5  ;;  %v3812_v60 = vshrl.u32 %v8795_v24, 16  ;;  %v3790_v16 = vrot.slane %v3788_v6, 4 }
 0x1c4   : > { %14040 = vst [vmem:[#allocation10_spill] sm:$0xff] %v12149_v40  ;;  %v3815_v52 = vshll.u32 %v8795_v24, 16  ;;  %v3821_v13 = vshll.u32 %v11974_v53, 16  ;;  %v12195_v24 = vld [vmem:[%s10749_s10 + $0x64] sm:$0xf] }
 0x1c6   : > { %9612 = vmatmul.mubr.msk.bf16.gmra.mrb[16].mxu0 %vm766_vm3, %v10597_v55  ;;  %v12167_v55 = vld [vmem:[%s10749_s10 + $0xd0] sm:$0xf] }
 0x1c7   : > { %9615 = vmatprep.mubr.msk.bf16.mxu0 %vm766_vm3, %v10598_v8  ;;  %v3764_v8 = vshrl.u32 %v8789_v2, 16  ;;  %v12137_v2 = vld [vmem:[%s10749_s10 + $0x44] sm:$0x1] }
 0x1c8   : > { %v3783_v51 = vshll.u32 %v12137_v2, 16 }
 0x1ce   : > { %9616 = vmatmul.mubr.msk.bf16.gmra.mrb[20].mxu0 %vm766_vm3, %v10599_v34  ;;  %v3766_v34 = vrot.slane %v3764_v8, 4  ;;  %v3791_v8 = vshll.u32 %v8792_v21, 16 }
 0x1cf   : > { %9619 = vmatprep.mubr.msk.bf16.mxu0 %vm766_vm3, %v10600_v26  ;;  %v12139_v26 = vrot.slane %v3773_v27, 5  ;;  %v3728_v27 = vsel %vm10784_vm4, %v12093_v9, %v12075_v44  ;;  %v3738_v44 = vsel %vm10784_vm4, %v12127_v42, %v12120_v56  ;;  %v3757_v9 = vrot.slane %v3756_v20, 4  ;;  %v12177_v42 = vld [vmem:[%s10749_s10 + $0x50] sm:$0x1] }
 0x1d0   : > { %v3770_v21 = vor.u32 %v3769_v12, %v3766_v34  ;;  %v3793_v34 = vrot.slane %v3791_v8, 5  ;;  %v8876_v12 = vld [vmem:[%s10749_s10 + $0xcc] sm:$0xe]  ;;  %v4543_v56 = vrot.slane %v12170_v37, 5  ;;  %v12179_v20 = vrot.slane %v3797_v63, 5 }
 0x1d1   : > { %v3780_v18 = vor.u32 %v3779_v32, %v12139_v26  ;;  %v3803_v32 = vrot.slane %v3801_v57, 4  ;;  %v8892_v15 = vrot.slane %v8876_v12, 9  ;;  %v12187_v8 = vrot.slane %v3783_v51, 5  ;;  %v8798_v57 = vld [vmem:[%s10749_s10 + $0x60] sm:$0xf] }
 0x1d2   : > { %v12185_v6 = vrot.slane %v3770_v21, 4  ;;  %v3762_v40 = vsel %vm10784_vm4, %v3757_v9, %v3761_v38  ;;  %v3825_v63 = vshrl.u32 %v11974_v53, 16  ;;  %v3807_v21 = vshll.u32 %v12177_v42, 16 }
 0x1d3   : > { %v3804_v38 = vor.u32 %v3803_v32, %v12179_v20  ;;  %v3814_v9 = vrot.slane %v3812_v60, 4  ;;  %v3817_v53 = vrot.slane %v3815_v52, 5  ;;  %v12216_v60 = vrot.slane %v3821_v13, 5 }
 0x1d4   : > { %v3827_v52 = vrot.slane %v3825_v63, 4  ;;  %v3776_v32 = vsel %vm10784_vm4, %v12185_v6, %v12139_v26  ;;  %v12236_v6 = vld [vmem:[%s10749_s10 + $0x7c] sm:$0xf] }
 0x1d5   : > { %v3805_v63 = vrot.slane %v3804_v38, 4  ;;  %v3873_v38 = vshrl.u32 %v11997_v39, 16 }
 0x1d6   : > { %9620 = vmatmul.mubr.msk.bf16.gmra.mrb[24].mxu0 %vm766_vm3, %v10601_v3  ;;  %v4540_v3 = vrot.slane %v12167_v55, 5 }
 0x1d7   : > { %9623 = vmatprep.mubr.msk.bf16.mxu0 %vm766_vm3, %v10602_v36  ;;  %v3752_v36 = vsel %vm10784_vm4, %v3747_v25, %v12105_v14  ;;  %v12201_v14 = vrot.slane %v3780_v18, 4  ;;  %v3794_v25 = vor.u32 %v3793_v34, %v3790_v16  ;;  %v3845_v18 = vshll.u32 %v12195_v24, 16 }
 0x1d8   : > { %v4542_v19 = vrot.slane %v4540_v3, 4  ;;  %v12199_v12 = vsel %vm11099_vm7, %v8892_v15, %v4540_v3  ;;  %v3836_v15 = vshrl.u32 %v8798_v57, 16  ;;  %v3839_v3 = vshll.u32 %v8798_v57, 16 }
 0x1d9   : > { %14041 = vst [vmem:[#allocation11_spill] sm:$0xff] %v12199_v12  ;;  %v3849_v16 = vshrl.u32 %v12195_v24, 16  ;;  %v4644_v34 = vsel %vm815_vm0, %v11964_v28, 0  ;;  %v8801_v28 = vld [vmem:[%s10749_s10 + $0x6c] sm:$0xf]  ;;  %v3795_v13 = vrot.slane %v3794_v25, 4  ;;  %v3818_v57 = vor.u32 %v3817_v53, %v3814_v9 }
 0x1da   : > { %v12206_v51 = vsel %vm11099_vm7, %v4542_v19, %v4543_v56  ;;  %v8830_v19 = vcombine.low %v3728_v27, %v3738_v44  ;;  %v8831_v56 = vcombine.low %v3752_v36, %v3762_v40  ;;  %v3809_v27 = vrot.slane %v3807_v21, 5  ;;  %v12228_v44 = vld [vmem:[%s10749_s10 + $0x68] sm:$0x1]  ;;  %v8804_v40 = vld [vmem:[%s10749_s10 + $0x78] sm:$0xf] }
 0x1db   : > { %14042 = vst [vmem:[#allocation3_spill] sm:$0xff] %v12206_v51  ;;  %v3838_v36 = vrot.slane %v3836_v15, 4  ;;  %v3841_v48 = vrot.slane %v3839_v3, 5  ;;  %v12233_v51 = vrot.slane %v3845_v18, 5  ;;  %v3851_v26 = vrot.slane %v3849_v16, 4 }
 0x1dc   : > { %v3828_v12 = vor.u32 %v3827_v52, %v12216_v60  ;;  %v3863_v21 = vshll.u32 %v8801_v28, 16  ;;  %v3869_v25 = vshll.u32 %v11997_v39, 16  ;;  %v3887_v9 = vshll.u32 %v8804_v40, 16  ;;  %v8807_v39 = vld [vmem:[%s10749_s10 + $0x84] sm:$0xf] }
 0x1dd   : > { %v3800_v53 = vsel %vm10784_vm4, %v3795_v13, %v12179_v20  ;;  %v3810_v15 = vsel %vm10784_vm4, %v3805_v63, %v3809_v27  ;;  %v3893_v3 = vshll.u32 %v12236_v6, 16  ;;  %v3897_v18 = vshrl.u32 %v12236_v6, 16 }
 0x1de   : > { %9624 = vmatmul.mubr.msk.bf16.gmra.mrb[28].mxu0 %vm766_vm3, %v10603_v35  ;;  %v3786_v35 = vsel %vm10784_vm4, %v12201_v14, %v12187_v8  ;;  %v3855_v8 = vshll.u32 %v12228_v44, 16  ;;  %v3860_v14 = vshrl.u32 %v8801_v28, 16  ;;  %v3819_v16 = vrot.slane %v3818_v57, 4 }
 0x1df   : > { %9629 = vmatprep.mubr.msk.bf16.mxu0 %vm766_vm3, %v8829_v61  ;;  %v3831_v61 = vshll.u32 %v11977_v31, 16  ;;  %v3884_v31 = vshrl.u32 %v8804_v40, 16  ;;  %v3842_v28 = vor.u32 %v3841_v48, %v3838_v36  ;;  %v3852_v49 = vor.u32 %v3851_v26, %v12233_v51 }
 0x1e0   : > { %v3829_v40 = vrot.slane %v3828_v12, 4  ;;  %v3857_v58 = vrot.slane %v3855_v8, 5  ;;  %v3862_v30 = vrot.slane %v3860_v14, 4  ;;  %v3865_v20 = vrot.slane %v3863_v21, 5 }
 0x1e1   : > { %v3833_v52 = vrot.slane %v3831_v61, 5  ;;  %v12253_v27 = vrot.slane %v3869_v25, 5  ;;  %v3875_v13 = vrot.slane %v3873_v38, 4  ;;  %v3886_v63 = vrot.slane %v3884_v31, 4 }
 0x1e2   : > { %v3889_v57 = vrot.slane %v3887_v9, 5  ;;  %v12258_v48 = vrot.slane %v3893_v3, 5  ;;  %v3899_v61 = vrot.slane %v3897_v18, 4  ;;  %v3911_v12 = vshll.u32 %v8807_v39, 16  ;;  %v8810_v3 = vld [vmem:[%s10749_s10 + $0x90] sm:$0xf] }
 0x1e3   : > { %v3843_v36 = vrot.slane %v3842_v28, 4  ;;  %v3853_v26 = vrot.slane %v3852_v49, 4  ;;  %v8832_v8 = vcombine.low %v3776_v32, %v3786_v35  ;;  %v8833_v14 = vcombine.low %v3800_v53, %v3810_v15  ;;  %v12272_v18 = vld [vmem:[%s10749_s10 + $0x94] sm:$0xf] }
 0x1e4   : > { %v3824_v21 = vsel %vm10784_vm4, %v3819_v16, %v12216_v60  ;;  %v3834_v25 = vsel %vm10784_vm4, %v3829_v40, %v3833_v52  ;;  %v3866_v38 = vor.u32 %v3865_v20, %v3862_v30  ;;  %v3876_v31 = vor.u32 %v3875_v13, %v12253_v27 }
 0x1e5   : > { %v3879_v9 = vshll.u32 %v12000_v5, 16  ;;  %v3903_v49 = vshll.u32 %v12256_v41, 16  ;;  %v3900_v32 = vor.u32 %v3899_v61, %v12258_v48  ;;  %v3913_v53 = vrot.slane %v3911_v12, 5 }
 0x1e6   : > { %9630 = vmatmul.mubr.msk.bf16.vlgmr.msra.gmra.mrb[0].mxu0 %vm766_vm3, %v8830_v19  ;;  %v3908_v19 = vshrl.u32 %v8807_v39, 16  ;;  %v3848_v60 = vsel %vm10784_vm4, %v3843_v36, %v12233_v51  ;;  %v3858_v30 = vsel %vm10784_vm4, %v3853_v26, %v3857_v58  ;;  %v3932_v16 = vshrl.u32 %v8810_v3, 16 }
 0x1e7   : > { %9662 = vmatpush3.bf16.msra.mxu0 %v4644_v34  ;;  %9633 = vmatprep.mubr.msk.bf16.mxu0 %vm766_vm3, %v8831_v56  ;;  %v3917_v34 = vshll.u32 %v12027_v43, 16  ;;  %v3921_v56 = vshrl.u32 %v12027_v43, 16  ;;  %v3890_v43 = vor.u32 %v3889_v57, %v3886_v63  ;;  %v3935_v52 = vshll.u32 %v8810_v3, 16 }
 0x1e8   : > { %v3910_v35 = vrot.slane %v3908_v19, 4  ;;  %v3941_v28 = vshll.u32 %v12272_v18, 16  ;;  %v3945_v39 = vshrl.u32 %v12272_v18, 16  ;;  %v3867_v40 = vrot.slane %v3866_v38, 4  ;;  %v8813_v19 = vld [vmem:[%s10749_s10 + $0x9c] sm:$0xf] }
 0x1e9   : > { %v12280_v15 = vrot.slane %v3917_v34, 5  ;;  %v3923_v5 = vrot.slane %v3921_v56, 4  ;;  %v3877_v51 = vrot.slane %v3876_v31, 4  ;;  %v3881_v20 = vrot.slane %v3879_v9, 5  ;;  %v12290_v34 = vld [vmem:[%s10749_s10 + $0x98] sm:$0x1] }
 0x1ea   : > { %v3905_v13 = vrot.slane %v3903_v49, 5  ;;  %v3891_v58 = vrot.slane %v3890_v43, 4  ;;  %v3901_v63 = vrot.slane %v3900_v32, 4  ;;  %v3914_v57 = vor.u32 %v3913_v53, %v3910_v35 }
 0x1eb   : > { %v3927_v61 = vshll.u32 %v12030_v50, 16  ;;  %v8834_v12 = vcombine.low %v3824_v21, %v3834_v25  ;;  %v8835_v36 = vcombine.low %v3848_v60, %v3858_v30  ;;  %v3924_v26 = vor.u32 %v3923_v5, %v12280_v15  ;;  %v8816_v21 = vld [vmem:[%s10749_s10 + $0xa8] sm:$0xf]  ;;  %v12301_v25 = vld [vmem:[%s10749_s10 + $0xac] sm:$0xf] }
 0x1ec   : > { %v3934_v56 = vrot.slane %v3932_v16, 4  ;;  %v3947_v38 = vrot.slane %v3945_v39, 4  ;;  %v3872_v31 = vsel %vm10784_vm4, %v3867_v40, %v12253_v27  ;;  %v3882_v9 = vsel %vm10784_vm4, %v3877_v51, %v3881_v20 }
 0x1ed   : > { %v3956_v50 = vshrl.u32 %v8813_v19, 16  ;;  %v3959_v49 = vshll.u32 %v8813_v19, 16  ;;  %v3896_v3 = vsel %vm10784_vm4, %v3891_v58, %v12258_v48  ;;  %v3906_v43 = vsel %vm10784_vm4, %v3901_v63, %v3905_v13  ;;  %v12324_v19 = vld [vmem:[%s10749_s10 + $0xb0] sm:$0x1] }
 0x1ee   : > { %9634 = vmatmul.mubr.msk.bf16.gmra.mrb[4].mxu0 %vm766_vm3, %v8832_v8  ;;  %v3937_v8 = vrot.slane %v3935_v52, 5  ;;  %v3915_v32 = vrot.slane %v3914_v57, 4  ;;  %v3929_v35 = vrot.slane %v3927_v61, 5  ;;  %v3925_v53 = vrot.slane %v3924_v26, 4 }
 0x1ef   : > { %9637 = vmatprep.mubr.msk.bf16.mxu0 %vm766_vm3, %v8833_v14  ;;  %v12292_v14 = vrot.slane %v3941_v28, 5  ;;  %v3951_v27 = vshll.u32 %v12290_v34, 16  ;;  %v3965_v60 = vshll.u32 %v12069_v0, 16  ;;  %v3969_v30 = vshrl.u32 %v12069_v0, 16 }
 0x1f0   : > { %v3980_v5 = vshrl.u32 %v8816_v21, 16  ;;  %v3983_v16 = vshll.u32 %v8816_v21, 16  ;;  %v3989_v52 = vshll.u32 %v12301_v25, 16  ;;  %v3993_v48 = vshrl.u32 %v12301_v25, 16 }
 0x1f1   : > { %v3938_v28 = vor.u32 %v3937_v8, %v3934_v56  ;;  %v3948_v39 = vor.u32 %v3947_v38, %v12292_v14  ;;  %v3958_v40 = vrot.slane %v3956_v50, 4  ;;  %v3961_v51 = vrot.slane %v3959_v49, 5  ;;  %v8819_v8 = vld [vmem:[%s10749_s10 + $0xb4] sm:$0xf] }
 0x1f2   : > { %v8836_v20 = vcombine.low %v3872_v31, %v3882_v9  ;;  %v8837_v13 = vcombine.low %v3896_v3, %v3906_v43  ;;  %v3920_v0 = vsel %vm10784_vm4, %v3915_v32, %v12280_v15  ;;  %v3930_v58 = vsel %vm10784_vm4, %v3925_v53, %v3929_v35  ;;  %v8822_v32 = vld [vmem:[%s10749_s10 + $0xc0] sm:$0xf]  ;;  %v12332_v35 = vld [vmem:[%s10749_s10 + $0xc4] sm:$0xf] }
 0x1f3   : > { %v3953_v63 = vrot.slane %v3951_v27, 5  ;;  %v12321_v57 = vrot.slane %v3965_v60, 5  ;;  %v3971_v61 = vrot.slane %v3969_v30, 4  ;;  %v3991_v26 = vrot.slane %v3989_v52, 5 }
 0x1f4   : > { %v3995_v56 = vrot.slane %v3993_v48, 4  ;;  %v3939_v38 = vrot.slane %v3938_v28, 4  ;;  %v3949_v31 = vrot.slane %v3948_v39, 4  ;;  %v3962_v9 = vor.u32 %v3961_v51, %v3958_v40 }
 0x1f5   : > { %v3975_v15 = vshll.u32 %v12072_v7, 16  ;;  %v3999_v50 = vshll.u32 %v12324_v19, 16  ;;  %v8838_v49 = vcombine.low %v3920_v0, %v3930_v58  ;;  %v3972_v21 = vor.u32 %v3971_v61, %v12321_v57 }
 0x1f6   : > { %9638 = vmatmul.mubr.msk.bf16.gmra.mrb[8].mxu0 %vm766_vm3, %v8834_v12  ;;  %v3982_v12 = vrot.slane %v3980_v5, 4  ;;  %v4004_v3 = vshrl.u32 %v8819_v8, 16  ;;  %v4007_v43 = vshll.u32 %v8819_v8, 16  ;;  %v3996_v27 = vor.u32 %v3995_v56, %v3991_v26 }
 0x1f7   : > { %9641 = vmatprep.mubr.msk.bf16.mxu0 %vm766_vm3, %v8835_v36  ;;  %v3985_v36 = vrot.slane %v3983_v16, 5  ;;  %v4013_v60 = vshll.u32 %v12111_v23, 16  ;;  %v4017_v30 = vshrl.u32 %v12111_v23, 16  ;;  %v3944_v7 = vsel %vm10784_vm4, %v3939_v38, %v12292_v14  ;;  %v8825_v38 = vld [vmem:[%s10749_s10 + $0xcc] sm:$0xf] }
 0x1f8   : > { %v3954_v5 = vsel %vm10784_vm4, %v3949_v31, %v3953_v63  ;;  %v3963_v16 = vrot.slane %v3962_v9, 4  ;;  %v3977_v52 = vrot.slane %v3975_v15, 5  ;;  %v4028_v48 = vshrl.u32 %v8822_v32, 16 }
 0x1f9   : > { %v3986_v53 = vor.u32 %v3985_v36, %v3982_v12  ;;  %v4031_v28 = vshll.u32 %v8822_v32, 16  ;;  %v4037_v39 = vshll.u32 %v12332_v35, 16  ;;  %v4041_v40 = vshrl.u32 %v12332_v35, 16 }
 0x1fa   : > { %v3973_v51 = vrot.slane %v3972_v21, 4  ;;  %v4001_v23 = vrot.slane %v3999_v50, 5  ;;  %v3997_v58 = vrot.slane %v3996_v27, 4  ;;  %v4015_v14 = vrot.slane %v4013_v60, 5  ;;  %v12352_v50 = vld [vmem:[%s10749_s10 + $0xc8] sm:$0x1] }
 0x1fb   : > { %v3987_v0 = vrot.slane %v3986_v53, 4  ;;  %v4019_v61 = vrot.slane %v4017_v30, 4  ;;  %v8839_v12 = vcombine.low %v3944_v7, %v3954_v5  ;;  %v4030_v63 = vrot.slane %v4028_v48, 4 }
 0x1fc   : > { %v4033_v36 = vrot.slane %v4031_v28, 5  ;;  %v4039_v56 = vrot.slane %v4037_v39, 5  ;;  %v4043_v8 = vrot.slane %v4041_v40, 4  ;;  %v3968_v31 = vsel %vm10784_vm4, %v3963_v16, %v12321_v57 }
 0x1fd   : > { %v3978_v9 = vsel %vm10784_vm4, %v3973_v51, %v3977_v52  ;;  %v3992_v21 = vsel %vm10784_vm4, %v3987_v0, %v3991_v26  ;;  %v4023_v32 = vshll.u32 %v12114_v47, 16  ;;  %v4052_v57 = vshrl.u32 %v8825_v38, 16 }
 0x1fe   : > { %9642 = vmatmul.mubr.msk.bf16.gmra.mrb[12].mxu0 %vm766_vm3, %v8836_v20  ;;  %v4006_v20 = vrot.slane %v4004_v3, 4  ;;  %v4002_v3 = vsel %vm10784_vm4, %v3997_v58, %v4001_v23  ;;  %v4055_v53 = vshll.u32 %v8825_v38, 16  ;;  %v4061_v27 = vshll.u32 %v12167_v55, 16 }
 0x1ff   : > { %9645 = vmatprep.mubr.msk.bf16.mxu0 %vm766_vm3, %v8837_v13  ;;  %v4009_v13 = vrot.slane %v4007_v43, 5  ;;  %v4020_v43 = vor.u32 %v4019_v61, %v4015_v14  ;;  %v4065_v60 = vshrl.u32 %v12167_v55, 16  ;;  %v4034_v30 = vor.u32 %v4033_v36, %v4030_v63 }
 0x200   : > { %v4044_v7 = vor.u32 %v4043_v8, %v4039_v56  ;;  %v8840_v5 = vcombine.low %v3968_v31, %v3978_v9  ;;  %v8841_v26 = vcombine.low %v3992_v21, %v4002_v3  ;;  %v4025_v48 = vrot.slane %v4023_v32, 5  ;;  %v8861_v8 = vld [vmem:[%s10749_s10 + $0x18] sm:$0xe] }
 0x201   : > { %v4010_v15 = vor.u32 %v4009_v13, %v4006_v20  ;;  %v4021_v52 = vrot.slane %v4020_v43, 4  ;;  %v4054_v28 = vrot.slane %v4052_v57, 4  ;;  %v4057_v39 = vrot.slane %v4055_v53, 5  ;;  %v8862_v53 = vld [vmem:[%s10749_s10 + $0x24] sm:$0xe] }
 0x202   : > { %v4063_v47 = vrot.slane %v4061_v27, 5  ;;  %v4067_v40 = vrot.slane %v4065_v60, 4  ;;  %v4035_v51 = vrot.slane %v4034_v30, 4  ;;  %v4045_v23 = vrot.slane %v4044_v7, 4  ;;  %v8863_v27 = vld [vmem:[%s10749_s10 + $0x30] sm:$0xe] }
 0x203   : > { %v4011_v16 = vrot.slane %v4010_v15, 4  ;;  %v4026_v13 = vsel %vm10784_vm4, %v4021_v52, %v4025_v48  ;;  %v4058_v0 = vor.u32 %v4057_v39, %v4054_v28  ;;  %v4071_v61 = vshll.u32 %v12170_v37, 16  ;;  %v8864_v28 = vld [vmem:[%s10749_s10 + $0x3c] sm:$0xe]  ;;  %v8865_v39 = vld [vmem:[%s10749_s10 + $0x48] sm:$0xe] }
 0x204   : > { %v4068_v58 = vor.u32 %v4067_v40, %v4063_v47  ;;  %v4435_v36 = vrot.slane %v12014_v11, 5  ;;  %v8877_v21 = vrot.slane %v8861_v8, 9  ;;  %v4438_v37 = vrot.slane %v12041_v62, 5 }
 0x205   : > { %v4016_v55 = vsel %vm10784_vm4, %v4011_v16, %v4015_v14  ;;  %v4059_v31 = vrot.slane %v4058_v0, 4  ;;  %v4073_v15 = vrot.slane %v4071_v61, 5  ;;  %v4442_v43 = vrot.slane %v12037_v46, 5 }
 0x206   : > { %9646 = vmatmul.mubr.msk.bf16.gmra.mrb[16].mxu0 %vm766_vm3, %v8838_v49  ;;  %v4047_v49 = vshll.u32 %v12352_v50, 16  ;;  %v8842_v14 = vcombine.low %v4016_v55, %v4026_v13  ;;  %v4069_v9 = vrot.slane %v4068_v58, 4  ;;  %v4437_v3 = vrot.slane %v4435_v36, 4 }
 0x207   : > { %9649 = vmatprep.mubr.msk.bf16.mxu0 %vm766_vm3, %v8839_v12  ;;  %v4040_v12 = vsel %vm10784_vm4, %v4035_v51, %v4039_v56  ;;  %v4064_v56 = vsel %vm10784_vm4, %v4059_v31, %v4063_v47  ;;  %v4436_v32 = vsel %vm11099_vm7, %v8877_v21, %v4435_v36  ;;  %v4449_v62 = vrot.slane %v12066_v17, 5 }
 0x208   : > { %v4049_v20 = vrot.slane %v4047_v49, 5  ;;  %v4074_v11 = vsel %vm10784_vm4, %v4069_v9, %v4073_v15  ;;  %v4439_v57 = vsel %vm11099_vm7, %v4437_v3, %v4438_v37  ;;  %v8878_v7 = vrot.slane %v8862_v53, 9  ;;  %v8869_v9 = vld [vmem:[%s10749_s10 + $0x78] sm:$0xe] }
 0x209   : > { %v8844_v60 = vcombine.low %v4064_v56, %v4074_v11  ;;  %v8894_v30 = vcombine.low %v4436_v32, %v4439_v57  ;;  %v4444_v49 = vrot.slane %v4442_v43, 4  ;;  %v4451_v46 = vrot.slane %v4449_v62, 4 }
 0x20a   : > { %v4050_v63 = vsel %vm10784_vm4, %v4045_v23, %v4049_v20  ;;  %v4443_v17 = vsel %vm11099_vm7, %v8878_v7, %v4442_v43  ;;  %v4456_v52 = vrot.slane %v12086_v59, 5  ;;  %v8880_v51 = vrot.slane %v8864_v28, 9  ;;  %v8871_v43 = vld [vmem:[%s10749_s10 + $0x90] sm:$0xe]  ;;  %v14050_v28 = vld [vmem:[#allocation8_spill] sm:$0xff] }
 0x20b   : > { %v8843_v38 = vcombine.low %v4040_v12, %v4050_v63  ;;  %v4446_v16 = vsel %vm11099_vm7, %v4444_v49, %v4445_v10  ;;  %v4459_v20 = vrot.slane %v12137_v2, 5  ;;  %v8881_v55 = vrot.slane %v8865_v39, 9  ;;  %v14047_v10 = vld [vmem:[#allocation6_spill] sm:$0xff] }
 0x20c   : > { %v8895_v47 = vcombine.low %v4443_v17, %v4446_v16  ;;  %v4458_v23 = vrot.slane %v4456_v52, 4  ;;  %v4466_v59 = vrot.slane %v12177_v42, 5  ;;  %v4457_v0 = vsel %vm11099_vm7, %v8880_v51, %v4456_v52  ;;  %v8867_v42 = vld [vmem:[%s10749_s10 + $0x60] sm:$0xe]  ;;  %v14053_v51 = vld [vmem:[#allocation10_spill] sm:$0xff] }
 0x20d   : > { %v4477_v61 = vrot.slane %v12195_v24, 5  ;;  %v8883_v36 = vrot.slane %v8867_v42, 9  ;;  %v4491_v24 = vrot.slane %v12236_v6, 5  ;;  %v8885_v21 = vrot.slane %v8869_v9, 9  ;;  %v8875_v17 = vld [vmem:[%s10749_s10 + $0xc0] sm:$0xe] }
 0x20e   : > { %9650 = vmatmul.mubr.msk.bf16.gmra.mrb[20].mxu0 %vm766_vm3, %v8840_v5  ;;  %v8879_v5 = vrot.slane %v8863_v27, 9  ;;  %v4494_v37 = vrot.slane %v12256_v41, 5  ;;  %v4505_v11 = vrot.slane %v12272_v18, 5  ;;  %v8887_v57 = vrot.slane %v8871_v43, 9 }
 0x20f   : > { %9653 = vmatprep.mubr.msk.bf16.mxu0 %vm766_vm3, %v8841_v26  ;;  %v4452_v26 = vrot.slane %v12103_v45, 5  ;;  %v4463_v45 = vrot.slane %v12132_v29, 5  ;;  %v4460_v29 = vsel %vm11099_vm7, %v4458_v23, %v4459_v20  ;;  %v4479_v8 = vrot.slane %v4477_v61, 4  ;;  %v14056_v20 = vld [vmem:[#allocation3_spill] sm:$0xff] }
 0x210   : > { %v4450_v48 = vsel %vm11099_vm7, %v8879_v5, %v4449_v62  ;;  %v8897_v12 = vcombine.low %v4457_v0, %v4460_v29  ;;  %v4493_v3 = vrot.slane %v4491_v24, 4  ;;  %v4492_v56 = vsel %vm11099_vm7, %v8885_v21, %v4491_v24 }
 0x211   : > { %v4453_v1 = vsel %vm11099_vm7, %v4451_v46, %v4452_v26  ;;  %v4465_v13 = vrot.slane %v4463_v45, 4  ;;  %v4464_v58 = vsel %vm11099_vm7, %v8881_v55, %v4463_v45  ;;  %v4507_v41 = vrot.slane %v4505_v11, 4 }
 0x212   : > { %v8896_v40 = vcombine.low %v4450_v48, %v4453_v1  ;;  %v4495_v6 = vsel %vm11099_vm7, %v4493_v3, %v4494_v37  ;;  %v4508_v53 = vrot.slane %v12290_v34, 5  ;;  %v4506_v62 = vsel %vm11099_vm7, %v8887_v57, %v4505_v11  ;;  %v14049_v1 = vld [vmem:[#allocation7_spill] sm:$0xff] }
 0x213   : > { %v4467_v2 = vsel %vm11099_vm7, %v4465_v13, %v4466_v59  ;;  %v8902_v32 = vcombine.low %v4492_v56, %v4495_v6  ;;  %v4519_v27 = vrot.slane %v12301_v25, 5  ;;  %v4522_v49 = vrot.slane %v12324_v19, 5 }
 0x214   : > { %v8898_v63 = vcombine.low %v4464_v58, %v4467_v2  ;;  %v4509_v18 = vsel %vm11099_vm7, %v4507_v41, %v4508_v53  ;;  %v4533_v25 = vrot.slane %v12332_v35, 5  ;;  %v8891_v52 = vrot.slane %v8875_v17, 9 }
 0x215   : > { %v4521_v34 = vrot.slane %v4519_v27, 4  ;;  %v4536_v19 = vrot.slane %v12352_v50, 5  ;;  %v14051_v45 = vcombine.low %v14049_v1, %v14050_v28  ;;  %v14055_v50 = vld [vmem:[#allocation11_spill] sm:$0xff]  ;;  %v10684_v13 = vmov 0.0  }
 0x216   : > { %9654 = vmatmul.mubr.msk.bf16.gmra.mrb[24].mxu0 %vm766_vm3, %v8842_v14  ;;  %v4480_v14 = vrot.slane %v12228_v44, 5  ;;  %v14043_v44 = vcombine.low %v11986_v33, %v11991_v22  ;;  %v14044_v33 = vld [vmem:[#allocation4_spill] sm:$0xff]  ;;  %v4535_v48 = vrot.slane %v4533_v25, 4  ;;  %v4534_v39 = vsel %vm11099_vm7, %v8891_v52, %v4533_v25  ;;  %5333 = vst.msk [vmem:[#allocation2 + $0x30] sm:$0xff] %vm4839_vm8, %v10684_v13  ;;  %5334 = vst.msk [vmem:[#allocation2 + $0x38] sm:$0xff] %vm4839_vm8, %v10684_v13 }
 0x217   : > { %9657 = vmatprep.mubr.msk.bf16.mxu0 %vm766_vm3, %v8843_v38  ;;  %v4478_v38 = vsel %vm11099_vm7, %v8883_v36, %v4477_v61  ;;  %v14045_v22 = vcombine.low %v12010_v4, %v14044_v33  ;;  %v14046_v4 = vld [vmem:[#allocation5_spill] sm:$0xff]  ;;  %v4523_v26 = vsel %vm11099_vm7, %v4521_v34, %v4522_v49  ;;  %v14057_v55 = vcombine.low %v14055_v50, %v14056_v20 }
 0x218   : > { %v4481_v31 = vsel %vm11099_vm7, %v4479_v8, %v4480_v14  ;;  %v14048_v5 = vcombine.low %v14046_v4, %v14047_v10  ;;  %5326 = vst.msk [vmem:[#allocation2] sm:$0xff] %vm4839_vm8, %v10684_v13  ;;  %5327 = vst.msk [vmem:[#allocation2 + $0x8] sm:$0xff] %vm4839_vm8, %v10684_v13 }
 0x219   : > { %v8900_v15 = vcombine.low %v4478_v38, %v4481_v31  ;;  %5330 = vst.msk [vmem:[#allocation2 + $0x18] sm:$0xff] %vm4839_vm8, %v10684_v13  ;;  %5331 = vst.msk [vmem:[#allocation2 + $0x20] sm:$0xff] %vm4839_vm8, %v10684_v13 }
 0x21a   : > { %5336 = vst.msk [vmem:[#allocation2 + $0x48] sm:$0xff] %vm4839_vm8, %v10684_v13  ;;  %5337 = vst.msk [vmem:[#allocation2 + $0x50] sm:$0xff] %vm4839_vm8, %v10684_v13 }
 0x21b   : > { %5339 = vst.msk [vmem:[#allocation2 + $0x60] sm:$0xff] %vm4839_vm8, %v10684_v13  ;;  %5340 = vst.msk [vmem:[#allocation2 + $0x68] sm:$0xff] %vm4839_vm8, %v10684_v13 }
 0x21c   : > { %5342 = vst.msk [vmem:[#allocation2 + $0x78] sm:$0xff] %vm4839_vm8, %v10684_v13  ;;  %5343 = vst.msk [vmem:[#allocation2 + $0x80] sm:$0xff] %vm4839_vm8, %v10684_v13 }
 0x21d   : > { %5345 = vst.msk [vmem:[#allocation2 + $0x90] sm:$0xff] %vm4839_vm8, %v10684_v13  ;;  %5346 = vst.msk [vmem:[#allocation2 + $0x98] sm:$0xff] %vm4839_vm8, %v10684_v13 }
 0x21e   : > { %9658 = vmatmul.mubr.msk.bf16.gmra.mrb[28].mxu0 %vm766_vm3, %v8844_v60  ;;  %v8873_v60 = vld [vmem:[%s10749_s10 + $0xa8] sm:$0xe]  ;;  %5348 = vst.msk [vmem:[#allocation2 + $0xa8] sm:$0xff] %vm4839_vm8, %v10684_v13  ;;  %5349 = vst.msk [vmem:[#allocation2 + $0xb0] sm:$0xff] %vm4839_vm8, %v10684_v13 }
 0x21f   : > { %9663 = vmatprep.mubr.msk.bf16.mxu0 %vm766_vm3, %v8894_v30  ;;  %v8904_v30 = vcombine.low %v4506_v62, %v4509_v18  ;;  %v8889_v7 = vrot.slane %v8873_v60, 9  ;;  %5351 = vst.msk [vmem:[#allocation2 + $0xc0] sm:$0xff] %vm4839_vm8, %v10684_v13  ;;  %5352 = vst.msk [vmem:[#allocation2 + $0xc8] sm:$0xff] %vm4839_vm8, %v10684_v13 }
 0x220   : > { %5354 = vst.msk [vmem:[#allocation2 + $0xd8] sm:$0xff] %vm4839_vm8, %v10684_v13  ;;  %5355 = vst.msk [vmem:[#allocation2 + $0xe0] sm:$0xff] %vm4839_vm8, %v10684_v13 }
 0x221   : > { %v4520_v46 = vsel %vm11099_vm7, %v8889_v7, %v4519_v27  ;;  %5357 = vst.msk [vmem:[#allocation2 + $0xf0] sm:$0xff] %vm4839_vm8, %v10684_v13  ;;  %5358 = vst.msk [vmem:[#allocation2 + $0xf8] sm:$0xff] %vm4839_vm8, %v10684_v13 }
 0x222   : > { %v8906_v16 = vcombine.low %v4520_v46, %v4523_v26  ;;  %5360 = vst.msk [vmem:[#allocation2 + $0x108] sm:$0xff] %vm4839_vm8, %v10684_v13  ;;  %5361 = vst.msk [vmem:[#allocation2 + $0x110] sm:$0xff] %vm4839_vm8, %v10684_v13 }
 0x223   : > { %5363 = vst.msk [vmem:[#allocation2 + $0x120] sm:$0xff] %vm4839_vm8, %v10684_v13  ;;  %5364 = vst.msk [vmem:[#allocation2 + $0x128] sm:$0xff] %vm4839_vm8, %v10684_v13 }
 0x224   : > { %5366 = vst.msk [vmem:[#allocation2 + $0x138] sm:$0xff] %vm4839_vm8, %v10684_v13  ;;  %5367 = vst.msk [vmem:[#allocation2 + $0x140] sm:$0xff] %vm4839_vm8, %v10684_v13 }
 0x225   : > { %5369 = vst.msk [vmem:[#allocation2 + $0x150] sm:$0xff] %vm4839_vm8, %v10684_v13  ;;  %5370 = vst.msk [vmem:[#allocation2 + $0x158] sm:$0xff] %vm4839_vm8, %v10684_v13 }
 0x226   : > { %9664 = vmatmul.mubr.msk.bf16.vlgmr.msra.gmra.mrb[0].mxu0 %vm766_vm3, %v8895_v47  ;;  %v4537_v47 = vsel %vm11099_vm7, %v4535_v48, %v4536_v19  ;;  %5372 = vst.msk [vmem:[#allocation2 + $0x168] sm:$0xff] %vm4839_vm8, %v10684_v13  ;;  %5373 = vst.msk [vmem:[#allocation2 + $0x170] sm:$0xff] %vm4839_vm8, %v10684_v13 }
 0x227   : > { %9667 = vmatprep.mubr.msk.bf16.mxu0 %vm766_vm3, %v8896_v40  ;;  %v8908_v35 = vcombine.low %v4534_v39, %v4537_v47  ;;  %v14052_v40 = vld [vmem:[#allocation9_spill] sm:$0xff]  ;;  %5375 = vst.msk [vmem:[#allocation2 + $0x180] sm:$0xff] %vm4839_vm8, %v10684_v13  ;;  %5376 = vst.msk [vmem:[#allocation2 + $0x188] sm:$0xff] %vm4839_vm8, %v10684_v13 }
 0x228   : > { %v14054_v23 = vcombine.low %v14052_v40, %v14053_v51  ;;  %5378 = vst.msk [vmem:[#allocation2 + $0x198] sm:$0xff] %vm4839_vm8, %v10684_v13  ;;  %5379 = vst.msk [vmem:[#allocation2 + $0x1a0] sm:$0xff] %vm4839_vm8, %v10684_v13 }
 0x229   : > { %5335 = vst.msk [vmem:[#allocation2 + $0x40] sm:$0x3] %vm5328_vm9, %v10684_v13  ;;  %5329 = vst.msk [vmem:[#allocation2 + $0x10] sm:$0x3] %vm5328_vm9, %v10684_v13 }
 0x22a   : > { %5332 = vst.msk [vmem:[#allocation2 + $0x28] sm:$0x3] %vm5328_vm9, %v10684_v13  ;;  %5338 = vst.msk [vmem:[#allocation2 + $0x58] sm:$0x3] %vm5328_vm9, %v10684_v13 }
 0x22b   : > { %5341 = vst.msk [vmem:[#allocation2 + $0x70] sm:$0x3] %vm5328_vm9, %v10684_v13  ;;  %5344 = vst.msk [vmem:[#allocation2 + $0x88] sm:$0x3] %vm5328_vm9, %v10684_v13 }
 0x22c   : > { %5347 = vst.msk [vmem:[#allocation2 + $0xa0] sm:$0x3] %vm5328_vm9, %v10684_v13  ;;  %5350 = vst.msk [vmem:[#allocation2 + $0xb8] sm:$0x3] %vm5328_vm9, %v10684_v13 }
 0x22d   : > { %5353 = vst.msk [vmem:[#allocation2 + $0xd0] sm:$0x3] %vm5328_vm9, %v10684_v13  ;;  %5356 = vst.msk [vmem:[#allocation2 + $0xe8] sm:$0x3] %vm5328_vm9, %v10684_v13 }
 0x22e   : > { %9668 = vmatmul.mubr.msk.bf16.gmra.mrb[4].mxu0 %vm766_vm3, %v8897_v12  ;;  %5359 = vst.msk [vmem:[#allocation2 + $0x100] sm:$0x3] %vm5328_vm9, %v10684_v13  ;;  %5362 = vst.msk [vmem:[#allocation2 + $0x118] sm:$0x3] %vm5328_vm9, %v10684_v13 }
 0x22f   : > { %9671 = vmatprep.mubr.msk.bf16.mxu0 %vm766_vm3, %v8898_v63  ;;  %5365 = vst.msk [vmem:[#allocation2 + $0x130] sm:$0x3] %vm5328_vm9, %v10684_v13  ;;  %5368 = vst.msk [vmem:[#allocation2 + $0x148] sm:$0x3] %vm5328_vm9, %v10684_v13 }
 0x230   : > { %5371 = vst.msk [vmem:[#allocation2 + $0x160] sm:$0x3] %vm5328_vm9, %v10684_v13  ;;  %5374 = vst.msk [vmem:[#allocation2 + $0x178] sm:$0x3] %vm5328_vm9, %v10684_v13 }
 0x231   : > { %5377 = vst.msk [vmem:[#allocation2 + $0x190] sm:$0x3] %vm5328_vm9, %v10684_v13  ;;  %5380 = vst.msk [vmem:[#allocation2 + $0x1a8] sm:$0x3] %vm5328_vm9, %v10684_v13 }
 0x236   : > { %9672 = vmatmul.mubr.msk.bf16.gmra.mrb[8].mxu0 %vm766_vm3, %v14043_v44 }
 0x237   : > { %9675 = vmatprep.mubr.msk.bf16.mxu0 %vm766_vm3, %v8900_v15 }
 0x23e   : > { %9676 = vmatmul.mubr.msk.bf16.gmra.mrb[12].mxu0 %vm766_vm3, %v14045_v22 }
 0x23f   : > { %9679 = vmatprep.mubr.msk.bf16.mxu0 %vm766_vm3, %v8902_v32 }
 0x246   : > { %9680 = vmatmul.mubr.msk.bf16.gmra.mrb[16].mxu0 %vm766_vm3, %v14048_v5 }
 0x247   : > { %9683 = vmatprep.mubr.msk.bf16.mxu0 %vm766_vm3, %v8904_v30 }
 0x24e   : > { %9684 = vmatmul.mubr.msk.bf16.gmra.mrb[20].mxu0 %vm766_vm3, %v14051_v45 }
 0x24f   : > { %9687 = vmatprep.mubr.msk.bf16.mxu0 %vm766_vm3, %v8906_v16 }
 0x256   : > { %9688 = vmatmul.mubr.msk.bf16.gmra.mrb[24].mxu0 %vm766_vm3, %v14054_v23 }
 0x257   : > { %9691 = vmatprep.mubr.msk.bf16.mxu0 %vm766_vm3, %v8908_v35 }
 0x25e   : > { %9692 = vmatmul.mubr.msk.bf16.gmra.mrb[28].mxu0 %vm766_vm3, %v14057_v55 }
 0x2f9   : > { %v12540_v54 = vpop.f32.mrb[0].mxu0 }
 0x2fa   : > { %v12542_v59 = vpop.f32.mrb[1].mxu0  ;;  %v4843_v42 = vsel %vm4839_vm8, %v12540_v54, 0.0 }
 0x2fb   : > { %v12544_v0 = vpop.f32.mrb[2].mxu0  ;;  %v4840_v58 = vsel %vm4839_vm8, %v12542_v59, 0.0 }
 0x2fc   : > { %v12546_v29 = vpop.f32.mrb[3].mxu0  ;;  %v4845_v63 = vsel %vm4839_vm8, %v12544_v0, 0.0 }
 0x2fd   : > { %v4841_v2 = vsel %vm4839_vm8, %v12546_v29, 0.0 }
 0x2fe   : > { %v4842_v61 = vadd.f32 %v4841_v2, %v4840_v58 }
 0x300   : > { %v4844_v12 = vadd.f32 %v4843_v42, %v4842_v61 }
 0x301   : > { %v12556_v36 = vpop.f32.mrb[4].mxu0 }
 0x302   : > { %v12558_v8 = vpop.f32.mrb[5].mxu0  ;;  %v4846_v14 = vadd.f32 %v4845_v63, %v4844_v12  ;;  %v4851_v3 = vsel %vm4839_vm8, %v12556_v36, 0.0 }
 0x303   : > { %v4847_v38 = vsel %vm4839_vm8, %v12558_v8, 0.0  ;;  %v12562_v31 = vpop.f32.mrb[6].mxu0 }
 0x304   : > { %v4848_v24 = vadd.f32 %v4847_v38, %v4846_v14  ;;  %v12564_v9 = vpop.f32.mrb[7].mxu0  ;;  %v4853_v44 = vsel %vm4839_vm8, %v12562_v31, 0.0 }
 0x305   : > { %v4849_v15 = vsel %vm4839_vm8, %v12564_v9, 0.0 }
 0x306   : > { %v4850_v21 = vadd.f32 %v4849_v15, %v4848_v24 }
 0x308   : > { %v4852_v37 = vadd.f32 %v4851_v3, %v4850_v21 }
 0x309   : > { %v12572_v56 = vpop.f32.mrb[8].mxu0 }
 0x30a   : > { %v12574_v6 = vpop.f32.mrb[9].mxu0  ;;  %v4854_v11 = vadd.f32 %v4853_v44, %v4852_v37  ;;  %v4859_v22 = vsel %vm4839_vm8, %v12572_v56, 0.0 }
 0x30b   : > { %v4855_v43 = vsel %vm4839_vm8, %v12574_v6, 0.0  ;;  %v12578_v32 = vpop.f32.mrb[10].mxu0 }
 0x30c   : > { %v4856_v57 = vadd.f32 %v4855_v43, %v4854_v11  ;;  %v12580_v41 = vpop.f32.mrb[11].mxu0  ;;  %v4861_v18 = vsel %vm4839_vm8, %v12578_v32, 0.0 }
 0x30d   : > { %v4857_v53 = vsel %vm4839_vm8, %v12580_v41, 0.0 }
 0x30e   : > { %v4858_v33 = vadd.f32 %v4857_v53, %v4856_v57 }
 0x310   : > { %v4860_v62 = vadd.f32 %v4859_v22, %v4858_v33 }
 0x311   : > { %v12588_v27 = vpop.f32.mrb[12].mxu0 }
 0x312   : > { %v12590_v60 = vpop.f32.mrb[13].mxu0  ;;  %v4862_v30 = vadd.f32 %v4861_v18, %v4860_v62  ;;  %v4867_v46 = vsel %vm4839_vm8, %v12588_v27, 0.0 }
 0x313   : > { %v4863_v7 = vsel %vm4839_vm8, %v12590_v60, 0.0  ;;  %v12594_v34 = vpop.f32.mrb[14].mxu0 }
 0x314   : > { %v4864_v49 = vadd.f32 %v4863_v7, %v4862_v30  ;;  %v12596_v4 = vpop.f32.mrb[15].mxu0  ;;  %v4869_v25 = vsel %vm4839_vm8, %v12594_v34, 0.0 }
 0x315   : > { %v4865_v10 = vsel %vm4839_vm8, %v12596_v4, 0.0 }
 0x316   : > { %v4866_v5 = vadd.f32 %v4865_v10, %v4864_v49 }
 0x318   : > { %v4868_v26 = vadd.f32 %v4867_v46, %v4866_v5 }
 0x319   : > { %v12604_v17 = vpop.f32.mrb[16].mxu0 }
 0x31a   : > { %v12606_v16 = vpop.f32.mrb[17].mxu0  ;;  %v4870_v52 = vadd.f32 %v4869_v25, %v4868_v26  ;;  %v4875_v47 = vsel %vm4839_vm8, %v12604_v17, 0.0 }
 0x31b   : > { %v4871_v48 = vsel %vm4839_vm8, %v12606_v16, 0.0  ;;  %v12610_v19 = vpop.f32.mrb[18].mxu0 }
 0x31c   : > { %v4872_v1 = vadd.f32 %v4871_v48, %v4870_v52  ;;  %v12612_v28 = vpop.f32.mrb[19].mxu0  ;;  %v4877_v40 = vsel %vm4839_vm8, %v12610_v19, 0.0 }
 0x31d   : > { %v4873_v45 = vsel %vm4839_vm8, %v12612_v28, 0.0 }
 0x31e   : > { %v4874_v39 = vadd.f32 %v4873_v45, %v4872_v1 }
 0x320   : > { %v4876_v35 = vadd.f32 %v4875_v47, %v4874_v39 }
 0x321   : > { %v12620_v51 = vpop.f32.mrb[20].mxu0 }
 0x322   : > { %v12622_v23 = vpop.f32.mrb[21].mxu0  ;;  %v4878_v50 = vadd.f32 %v4877_v40, %v4876_v35  ;;  %v4883_v42 = vsel %vm4839_vm8, %v12620_v51, 0.0 }
 0x323   : > { %v4879_v20 = vsel %vm4839_vm8, %v12622_v23, 0.0  ;;  %v12626_v55 = vpop.f32.mrb[22].mxu0 }
 0x324   : > { %v4880_v13 = vadd.f32 %v4879_v20, %v4878_v50  ;;  %v12628_v58 = vpop.f32.mrb[23].mxu0  ;;  %v4885_v63 = vsel %vm4839_vm8, %v12626_v55, 0.0 }
 0x325   : > { %v4881_v2 = vsel %vm4839_vm8, %v12628_v58, 0.0 }
 0x326   : > { %v4882_v61 = vadd.f32 %v4881_v2, %v4880_v13 }
 0x328   : > { %v4884_v12 = vadd.f32 %v4883_v42, %v4882_v61 }
 0x329   : > { %v12636_v14 = vpop.f32.mrb[24].mxu0 }
 0x32a   : > { %v12638_v38 = vpop.f32.mrb[25].mxu0  ;;  %v4886_v24 = vadd.f32 %v4885_v63, %v4884_v12  ;;  %v4891_v43 = vsel %vm4839_vm8, %v12636_v14, 0.0 }
 0x32b   : > { %v4887_v15 = vsel %vm4839_vm8, %v12638_v38, 0.0  ;;  %v12642_v21 = vpop.f32.mrb[26].mxu0 }
 0x32c   : > { %v4888_v3 = vadd.f32 %v4887_v15, %v4886_v24  ;;  %v12644_v37 = vpop.f32.mrb[27].mxu0  ;;  %v4893_v53 = vsel %vm4839_vm8, %v12642_v21, 0.0 }
 0x32d   : > { %v4889_v44 = vsel %vm4839_vm8, %v12644_v37, 0.0 }
 0x32e   : > { %v4890_v11 = vadd.f32 %v4889_v44, %v4888_v3 }
 0x330   : > { %v4892_v57 = vadd.f32 %v4891_v43, %v4890_v11 }
 0x331   : > { %v12652_v33 = vpop.f32.mrb[28].mxu0 }
 0x332   : > { %v12654_v22 = vpop.f32.mrb[29].mxu0  ;;  %v4894_v62 = vadd.f32 %v4893_v53, %v4892_v57  ;;  %v4899_v46 = vsel %vm4839_vm8, %v12652_v33, 0.0 }
 0x333   : > { %v4895_v18 = vsel %vm4839_vm8, %v12654_v22, 0.0  ;;  %v12658_v30 = vpop.f32.mrb[30].mxu0 }
 0x334   : > { %v4896_v7 = vadd.f32 %v4895_v18, %v4894_v62  ;;  %v12660_v49 = vpop.f32.mrb[31].mxu0  ;;  %v4901_v25 = vsel %vm4839_vm8, %v12658_v30, 0.0 }
 0x335   : > { %v4897_v10 = vsel %vm4839_vm8, %v12660_v49, 0.0 }
 0x336   : > { %v4898_v5 = vadd.f32 %v4897_v10, %v4896_v7 }
 0x338   : > { %v4900_v26 = vadd.f32 %v4899_v46, %v4898_v5 }
 0x33a   : > { %v4902_v52 = vadd.f32 %v4901_v25, %v4900_v26 }
 0x33c   : > { %4903 = vadd.xlane.f32.xlu0 %v4902_v52 }
 0x3c9   : > { %v4904_v48 = vpop.xlane.xlu0 %4903 }
 0x3ca   : > { %v4905_v1 = vrot.slane %v4904_v48, 4 }
 0x3cc   : > { %v4906_v45 = vadd.f32 %v4905_v1, %v4904_v48 }
 0x3ce   : > { %v4907_v39 = vrot.slane %v4906_v45, 2 }
 0x3d0   : > { %v4908_v47 = vadd.f32 %v4907_v39, %v4906_v45 }
 0x3d2   : > { %v4909_v35 = vrot.slane %v4908_v47, 1 }
 0x3d4   : > { %v4910_v40 = vadd.f32 %v4909_v35, %v4908_v47 }
 0x3d6   : > { %10532 = vpush %v4910_v40 }
 0x407   : > { %s10533_s27 = spop %10532 }
 0x408   : > { %s4912_s28 = smul.f32 0.00048828125, %s10533_s27 }
 0x40a   : > { %v12668_v50 = vstv %s4912_s28 }
 0x40b   : > { %v12672_v20 = vsub.f32 %v12542_v59, %v12668_v50  ;;  %v12676_v13 = vsub.f32 %v12546_v29, %v12668_v50  ;;  %v12680_v2 = vsub.f32 %v12540_v54, %v12668_v50  ;;  %v12684_v61 = vsub.f32 %v12544_v0, %v12668_v50 }
 0x40c   : > { %v12692_v59 = vsub.f32 %v12558_v8, %v12668_v50  ;;  %v12698_v54 = vsub.f32 %v12564_v9, %v12668_v50  ;;  %v12706_v3 = vsub.f32 %v12556_v36, %v12668_v50  ;;  %v12713_v9 = vsub.f32 %v12562_v31, %v12668_v50 }
 0x40d   : > { %v4946_v42 = vmul.f32 %v12672_v20, %v12672_v20  ;;  %v4947_v12 = vmul.f32 %v12676_v13, %v12676_v13  ;;  %v4948_v29 = vmul.f32 %v12680_v2, %v12680_v2  ;;  %v4949_v0 = vmul.f32 %v12684_v61, %v12684_v61 }
 0x40e   : > { %v4950_v8 = vmul.f32 %v12692_v59, %v12692_v59  ;;  %v4951_v43 = vmul.f32 %v12698_v54, %v12698_v54  ;;  %v12720_v36 = vsub.f32 %v12574_v6, %v12668_v50  ;;  %v4952_v62 = vmul.f32 %v12706_v3, %v12706_v3 }
 0x40f   : > { %v4978_v63 = vsel %vm4839_vm8, %v4946_v42, 0.0  ;;  %v4979_v24 = vsel %vm4839_vm8, %v4947_v12, 0.0  ;;  %v4981_v44 = vsel %vm4839_vm8, %v4948_v29, 0.0  ;;  %v4983_v57 = vsel %vm4839_vm8, %v4949_v0, 0.0 }
 0x410   : > { %v4980_v15 = vadd.f32 %v4979_v24, %v4978_v63  ;;  %v4985_v18 = vsel %vm4839_vm8, %v4950_v8, 0.0  ;;  %v12727_v31 = vsub.f32 %v12580_v41, %v12668_v50  ;;  %v4953_v10 = vmul.f32 %v12713_v9, %v12713_v9 }
 0x411   : > { %v4987_v5 = vsel %vm4839_vm8, %v4951_v43, 0.0  ;;  %v12734_v6 = vsub.f32 %v12572_v56, %v12668_v50  ;;  %v4954_v26 = vmul.f32 %v12720_v36, %v12720_v36  ;;  %v4989_v25 = vsel %vm4839_vm8, %v4952_v62, 0.0 }
 0x412   : > { %v4982_v11 = vadd.f32 %v4981_v44, %v4980_v15  ;;  %v12741_v41 = vsub.f32 %v12578_v32, %v12668_v50  ;;  %v4955_v48 = vmul.f32 %v12727_v31, %v12727_v31  ;;  %v4991_v1 = vsel %vm4839_vm8, %v4953_v10, 0.0 }
 0x413   : > { %v12748_v56 = vsub.f32 %v12590_v60, %v12668_v50  ;;  %v4956_v39 = vmul.f32 %v12734_v6, %v12734_v6  ;;  %v4993_v47 = vsel %vm4839_vm8, %v4954_v26, 0.0  ;;  %v12755_v32 = vsub.f32 %v12596_v4, %v12668_v50 }
 0x414   : > { %v4984_v53 = vadd.f32 %v4983_v57, %v4982_v11  ;;  %v4957_v40 = vmul.f32 %v12741_v41, %v12741_v41  ;;  %v4995_v42 = vsel %vm4839_vm8, %v4955_v48, 0.0  ;;  %v12762_v60 = vsub.f32 %v12588_v27, %v12668_v50 }
 0x415   : > { %v4958_v29 = vmul.f32 %v12748_v56, %v12748_v56  ;;  %v4997_v0 = vsel %vm4839_vm8, %v4956_v39, 0.0  ;;  %v12769_v4 = vsub.f32 %v12594_v34, %v12668_v50  ;;  %v4959_v24 = vmul.f32 %v12755_v32, %v12755_v32 }
 0x416   : > { %v4986_v7 = vadd.f32 %v4985_v18, %v4984_v53  ;;  %v4999_v15 = vsel %vm4839_vm8, %v4957_v40, 0.0  ;;  %v12776_v27 = vsub.f32 %v12606_v16, %v12668_v50  ;;  %v4960_v44 = vmul.f32 %v12762_v60, %v12762_v60 }
 0x417   : > { %v5001_v11 = vsel %vm4839_vm8, %v4958_v29, 0.0  ;;  %v12783_v34 = vsub.f32 %v12612_v28, %v12668_v50  ;;  %v4961_v57 = vmul.f32 %v12769_v4, %v12769_v4  ;;  %v5003_v53 = vsel %vm4839_vm8, %v4959_v24, 0.0 }
 0x418   : > { %v4988_v46 = vadd.f32 %v4987_v5, %v4986_v7  ;;  %v12790_v16 = vsub.f32 %v12604_v17, %v12668_v50  ;;  %v4962_v18 = vmul.f32 %v12776_v27, %v12776_v27  ;;  %v5005_v7 = vsel %vm4839_vm8, %v4960_v44, 0.0 }
 0x419   : > { %v12797_v28 = vsub.f32 %v12610_v19, %v12668_v50  ;;  %v4963_v5 = vmul.f32 %v12783_v34, %v12783_v34  ;;  %v12804_v17 = vsub.f32 %v12622_v23, %v12668_v50  ;;  %v12811_v19 = vsub.f32 %v12628_v58, %v12668_v50 }
 0x41a   : > { %v4990_v52 = vadd.f32 %v4989_v25, %v4988_v46  ;;  %v5007_v46 = vsel %vm4839_vm8, %v4961_v57, 0.0  ;;  %v4964_v25 = vmul.f32 %v12790_v16, %v12790_v16  ;;  %v12818_v23 = vsub.f32 %v12620_v51, %v12668_v50 }
 0x41b   : > { %v12825_v58 = vsub.f32 %v12626_v55, %v12668_v50  ;;  %v12832_v51 = vsub.f32 %v12638_v38, %v12668_v50  ;;  %v12839_v55 = vsub.f32 %v12644_v37, %v12668_v50  ;;  %v12846_v38 = vsub.f32 %v12636_v14, %v12668_v50 }
 0x41c   : > { %v4992_v45 = vadd.f32 %v4991_v1, %v4990_v52  ;;  %v5009_v52 = vsel %vm4839_vm8, %v4962_v18, 0.0  ;;  %v4965_v1 = vmul.f32 %v12797_v28, %v12797_v28  ;;  %v12853_v37 = vsub.f32 %v12642_v21, %v12668_v50 }
 0x41d   : > { %v12860_v14 = vsub.f32 %v12654_v22, %v12668_v50  ;;  %v12867_v21 = vsub.f32 %v12660_v49, %v12668_v50  ;;  %v12874_v22 = vsub.f32 %v12652_v33, %v12668_v50  ;;  %v12881_v49 = vsub.f32 %v12658_v30, %v12668_v50 }
 0x41e   : > { %v4994_v35 = vadd.f32 %v4993_v47, %v4992_v45  ;;  %v5011_v45 = vsel %vm4839_vm8, %v4963_v5, 0.0  ;;  %v4966_v47 = vmul.f32 %v12804_v17, %v12804_v17 }
 0x41f   : > { %v4976_v33 = vmul.f32 %v12874_v22, %v12874_v22 }
 0x420   : > { %v4996_v12 = vadd.f32 %v4995_v42, %v4994_v35  ;;  %v5013_v35 = vsel %vm4839_vm8, %v4964_v25, 0.0  ;;  %v4967_v42 = vmul.f32 %v12811_v19, %v12811_v19 }
 0x421   : > { %v5037_v30 = vsel %vm4839_vm8, %v4976_v33, 0.0 }
 0x422   : > { %v4998_v63 = vadd.f32 %v4997_v0, %v4996_v12  ;;  %v5015_v12 = vsel %vm4839_vm8, %v4965_v1, 0.0  ;;  %v4968_v0 = vmul.f32 %v12818_v23, %v12818_v23 }
 0x424   : > { %v5000_v8 = vadd.f32 %v4999_v15, %v4998_v63  ;;  %v5017_v63 = vsel %vm4839_vm8, %v4966_v47, 0.0  ;;  %v4969_v15 = vmul.f32 %v12825_v58, %v12825_v58 }
 0x426   : > { %v5002_v43 = vadd.f32 %v5001_v11, %v5000_v8  ;;  %v5019_v8 = vsel %vm4839_vm8, %v4967_v42, 0.0  ;;  %v4970_v11 = vmul.f32 %v12832_v51, %v12832_v51  ;;  %v4977_v42 = vmul.f32 %v12881_v49, %v12881_v49 }
 0x428   : > { %v5004_v62 = vadd.f32 %v5003_v53, %v5002_v43  ;;  %v5021_v43 = vsel %vm4839_vm8, %v4968_v0, 0.0  ;;  %v4971_v53 = vmul.f32 %v12839_v55, %v12839_v55  ;;  %v5039_v0 = vsel %vm4839_vm8, %v4977_v42, 0.0 }
 0x42a   : > { %v5006_v10 = vadd.f32 %v5005_v7, %v5004_v62  ;;  %v5023_v62 = vsel %vm4839_vm8, %v4969_v15, 0.0  ;;  %v4972_v7 = vmul.f32 %v12846_v38, %v12846_v38 }
 0x42c   : > { %v5008_v26 = vadd.f32 %v5007_v46, %v5006_v10  ;;  %v5025_v10 = vsel %vm4839_vm8, %v4970_v11, 0.0  ;;  %v4973_v46 = vmul.f32 %v12853_v37, %v12853_v37 }
 0x42e   : > { %v5010_v48 = vadd.f32 %v5009_v52, %v5008_v26  ;;  %v5027_v26 = vsel %vm4839_vm8, %v4971_v53, 0.0  ;;  %v4974_v52 = vmul.f32 %v12860_v14, %v12860_v14 }
 0x430   : > { %v5012_v39 = vadd.f32 %v5011_v45, %v5010_v48  ;;  %v5029_v48 = vsel %vm4839_vm8, %v4972_v7, 0.0  ;;  %v4975_v45 = vmul.f32 %v12867_v21, %v12867_v21  ;;  %v5463_v7 = vld [vmem:[#allocation2 + $0x1] sm:$0xff] }
 0x432   : > { %v5014_v40 = vadd.f32 %v5013_v35, %v5012_v39  ;;  %v5031_v39 = vsel %vm4839_vm8, %v4973_v46, 0.0  ;;  %v5033_v35 = vsel %vm4839_vm8, %v4974_v52, 0.0 }
 0x434   : > { %v5016_v29 = vadd.f32 %v5015_v12, %v5014_v40  ;;  %v5035_v12 = vsel %vm4839_vm8, %v4975_v45, 0.0 }
 0x436   : > { %v5018_v24 = vadd.f32 %v5017_v63, %v5016_v29 }
 0x438   : > { %v5020_v44 = vadd.f32 %v5019_v8, %v5018_v24 }
 0x43a   : > { %v5022_v57 = vadd.f32 %v5021_v43, %v5020_v44 }
 0x43c   : > { %v5024_v18 = vadd.f32 %v5023_v62, %v5022_v57 }
 0x43e   : > { %v5026_v5 = vadd.f32 %v5025_v10, %v5024_v18  ;;  %v8928_v18 = vld [vmem:[%s13932_s4 + $0x4] sm:$0xf]  ;;  %v5464_v10 = vld [vmem:[#allocation2 + $0x9] sm:$0xff] }
 0x43f   : > { %10522 = vmatprep.subr.msk.bf16.mxu1 %vm5561_vm10, %v8928_v18  ;;  %v5495_v46 = vpack.c.bf16 %v5464_v10, %v5463_v7 }
 0x440   : > { %v5028_v25 = vadd.f32 %v5027_v26, %v5026_v5  ;;  %v5563_v5 = vsel %vm5561_vm10, %v8928_v18, 0  ;;  %v5462_v26 = vld [vmem:[%s13932_s4] sm:$0xf] }
 0x441   : > { %9696 = vmatpush3.bf16.msra.mxu1 %v5563_v5  ;;  %9697 = vmatprep.mubr.msk.bf16.mxu1 %vm4839_vm8, %v5495_v46  ;;  %v12908_v45 = vsel %vm5561_vm10, %v5462_v26, 0 }
 0x442   : > { %v5030_v1 = vadd.f32 %v5029_v48, %v5028_v25  ;;  %10523 = vmatprep.subr.msk.bf16.mxu1 %vm5561_vm10, %v5462_v26 }
 0x444   : > { %v5032_v47 = vadd.f32 %v5031_v39, %v5030_v1 }
 0x446   : > { %v5034_v40 = vadd.f32 %v5033_v35, %v5032_v47 }
 0x448   : > { %v5036_v29 = vadd.f32 %v5035_v12, %v5034_v40 }
 0x44a   : > { %v5038_v50 = vadd.f32 %v5037_v30, %v5036_v29 }
 0x44c   : > { %v5040_v63 = vadd.f32 %v5039_v0, %v5038_v50 }
 0x44e   : > { %5041 = vadd.xlane.f32.xlu0 %v5040_v63 }
 0x4db   : > { %v5042_v24 = vpop.xlane.xlu0 %5041 }
 0x4dc   : > { %v5043_v15 = vrot.slane %v5042_v24, 4 }
 0x4de   : > { %v5044_v8 = vadd.f32 %v5043_v15, %v5042_v24 }
 0x4e0   : > { %v5045_v44 = vrot.slane %v5044_v8, 2 }
 0x4e2   : > { %v5046_v11 = vadd.f32 %v5045_v44, %v5044_v8 }
 0x4e4   : > { %v5047_v43 = vrot.slane %v5046_v11, 1 }
 0x4e6   : > { %v5048_v57 = vadd.f32 %v5047_v43, %v5046_v11 }
 0x4e8   : > { %10534 = vpush %v5048_v57 }
 0x519   : > { %s10535_s29 = spop %10534 }
 0x51a   : > { %s5050_s30 = smul.f32 0.00048828125, %s10535_s29 }
 0x51c   : > { %s5051_s8 = sadd.f32 1e-05, %s5050_s30 }
 0x51e   : > { %v5052_v53 = vstv %s5051_s8 }
 0x51f   : > { %10604 = vrsqrt.f32 %v5052_v53 }
 0x529   : > { %v10605_v62 = vpop.eup %10604 }
 0x52a   : > { %10536 = vpush %v10605_v62 }
 0x55b   : > { %s10537_s13 = spop %10536 }
 0x55c   : > { %v5055_v25 = vstv %s10537_s13 }
 0x55d   : > { %v5056_v52 = vmul.f32 %v5055_v25, %v12672_v20  ;;  %v5057_v48 = vmul.f32 %v5055_v25, %v12676_v13  ;;  %v5058_v1 = vmul.f32 %v5055_v25, %v12680_v2  ;;  %v5059_v39 = vmul.f32 %v5055_v25, %v12684_v61 }
 0x55e   : > { %v5060_v47 = vmul.f32 %v5055_v25, %v12692_v59  ;;  %v5061_v33 = vmul.f32 %v5055_v25, %v12698_v54  ;;  %v5062_v35 = vmul.f32 %v5055_v25, %v12706_v3  ;;  %v5063_v40 = vmul.f32 %v5055_v25, %v12713_v9 }
 0x55f   : > { %v5064_v42 = vmul.f32 %v5055_v25, %v12720_v36  ;;  %v5065_v20 = vmul.f32 %v5055_v25, %v12727_v31  ;;  %v5066_v13 = vmul.f32 %v5055_v25, %v12734_v6  ;;  %v5067_v2 = vmul.f32 %v5055_v25, %v12741_v41  ;;  %v8926_v31 = vld [vmem:[%s13930_s2] ss:$0 sm:$0xff] }
 0x560   : > { %v5068_v12 = vmul.f32 %v5055_v25, %v12748_v56  ;;  %v5069_v61 = vmul.f32 %v5055_v25, %v12755_v32  ;;  %v5070_v59 = vmul.f32 %v5055_v25, %v12762_v60  ;;  %v5071_v54 = vmul.f32 %v5055_v25, %v12769_v4 }
 0x561   : > { %v5072_v3 = vmul.f32 %v5055_v25, %v12776_v27  ;;  %v5073_v9 = vmul.f32 %v5055_v25, %v12783_v34  ;;  %v5074_v36 = vmul.f32 %v5055_v25, %v12790_v16  ;;  %v5075_v6 = vmul.f32 %v5055_v25, %v12797_v28 }
 0x562   : > { %v5076_v41 = vmul.f32 %v5055_v25, %v12804_v17  ;;  %v5077_v56 = vmul.f32 %v5055_v25, %v12811_v19  ;;  %v5078_v32 = vmul.f32 %v5055_v25, %v12818_v23  ;;  %v5079_v60 = vmul.f32 %v5055_v25, %v12825_v58 }
 0x563   : > { %v5080_v4 = vmul.f32 %v5055_v25, %v12832_v51  ;;  %v5081_v27 = vmul.f32 %v5055_v25, %v12839_v55  ;;  %v5082_v34 = vmul.f32 %v5055_v25, %v12846_v38  ;;  %v5083_v16 = vmul.f32 %v5055_v25, %v12853_v37 }
 0x564   : > { %v5084_v29 = vmul.f32 %v5055_v25, %v12860_v14  ;;  %v5085_v28 = vmul.f32 %v5055_v25, %v12867_v21  ;;  %v5086_v17 = vmul.f32 %v5055_v25, %v12874_v22  ;;  %v5087_v19 = vmul.f32 %v5055_v25, %v12881_v49  ;;  %v8927_v49 = vld [vmem:[%s13931_s3] ss:$0 sm:$0xff] }
 0x565   : > { %v5095_v30 = vmul.f32 %v8926_v31, %v5056_v52  ;;  %v5096_v23 = vmul.f32 %v8926_v31, %v5057_v48  ;;  %v5097_v50 = vmul.f32 %v8926_v31, %v5058_v1  ;;  %v5098_v58 = vmul.f32 %v8926_v31, %v5059_v39 }
 0x566   : > { %v5099_v0 = vmul.f32 %v8926_v31, %v5060_v47  ;;  %v5100_v51 = vmul.f32 %v8926_v31, %v5061_v33  ;;  %v5101_v63 = vmul.f32 %v8926_v31, %v5062_v35  ;;  %v5102_v55 = vmul.f32 %v8926_v31, %v5063_v40 }
 0x567   : > { %v5103_v24 = vmul.f32 %v8926_v31, %v5064_v42  ;;  %v5104_v38 = vmul.f32 %v8926_v31, %v5065_v20  ;;  %v5105_v15 = vmul.f32 %v8926_v31, %v5066_v13  ;;  %v5106_v37 = vmul.f32 %v8926_v31, %v5067_v2 }
 0x568   : > { %v5107_v8 = vmul.f32 %v8926_v31, %v5068_v12  ;;  %v5108_v14 = vmul.f32 %v8926_v31, %v5069_v61  ;;  %v5109_v44 = vmul.f32 %v8926_v31, %v5070_v59  ;;  %v5110_v21 = vmul.f32 %v8926_v31, %v5071_v54 }
 0x569   : > { %v5111_v11 = vmul.f32 %v8926_v31, %v5072_v3  ;;  %v5112_v22 = vmul.f32 %v8926_v31, %v5073_v9  ;;  %v5113_v43 = vmul.f32 %v8926_v31, %v5074_v36  ;;  %v5114_v57 = vmul.f32 %v8926_v31, %v5075_v6 }
 0x56a   : > { %v5115_v53 = vmul.f32 %v8926_v31, %v5076_v41  ;;  %v5116_v62 = vmul.f32 %v8926_v31, %v5077_v56  ;;  %v5117_v18 = vmul.f32 %v8926_v31, %v5078_v32  ;;  %v5118_v7 = vmul.f32 %v8926_v31, %v5079_v60 }
 0x56b   : > { %v5119_v10 = vmul.f32 %v8926_v31, %v5080_v4  ;;  %v5120_v5 = vmul.f32 %v8926_v31, %v5081_v27  ;;  %v5121_v46 = vmul.f32 %v8926_v31, %v5082_v34  ;;  %v5122_v26 = vmul.f32 %v8926_v31, %v5083_v16 }
 0x56c   : > { %v5123_v25 = vmul.f32 %v8926_v31, %v5084_v29  ;;  %v5124_v52 = vmul.f32 %v8926_v31, %v5085_v28  ;;  %v5125_v48 = vmul.f32 %v8926_v31, %v5086_v17  ;;  %v5126_v1 = vmul.f32 %v8926_v31, %v5087_v19 }
 0x56d   : > { %v5134_v39 = vadd.f32 %v8927_v49, %v5095_v30  ;;  %v5135_v47 = vadd.f32 %v8927_v49, %v5096_v23  ;;  %v5136_v33 = vadd.f32 %v8927_v49, %v5097_v50  ;;  %v5137_v35 = vadd.f32 %v8927_v49, %v5098_v58 }
 0x56e   : > { %v5138_v40 = vadd.f32 %v8927_v49, %v5099_v0  ;;  %v5139_v42 = vadd.f32 %v8927_v49, %v5100_v51  ;;  %v5140_v20 = vadd.f32 %v8927_v49, %v5101_v63  ;;  %v5141_v13 = vadd.f32 %v8927_v49, %v5102_v55 }
 0x56f   : > { %v5142_v2 = vadd.f32 %v8927_v49, %v5103_v24  ;;  %v5143_v12 = vadd.f32 %v8927_v49, %v5104_v38  ;;  %v5144_v61 = vadd.f32 %v8927_v49, %v5105_v15  ;;  %v5145_v59 = vadd.f32 %v8927_v49, %v5106_v37 }
 0x570   : > { %v5146_v54 = vadd.f32 %v8927_v49, %v5107_v8  ;;  %v5147_v3 = vadd.f32 %v8927_v49, %v5108_v14  ;;  %v5148_v9 = vadd.f32 %v8927_v49, %v5109_v44  ;;  %v5149_v36 = vadd.f32 %v8927_v49, %v5110_v21 }
 0x571   : > { %v5150_v6 = vadd.f32 %v8927_v49, %v5111_v11  ;;  %v12945_v41 = vadd.f32 %v8927_v49, %v5112_v22  ;;  %v12947_v31 = vadd.f32 %v8927_v49, %v5113_v43  ;;  %v12949_v56 = vadd.f32 %v8927_v49, %v5114_v57 }
 0x572   : > { %v12951_v32 = vadd.f32 %v8927_v49, %v5115_v53  ;;  %v12953_v60 = vadd.f32 %v8927_v49, %v5116_v62  ;;  %v12955_v4 = vadd.f32 %v8927_v49, %v5117_v18  ;;  %v12957_v27 = vadd.f32 %v8927_v49, %v5118_v7 }
 0x573   : > { %v5198_v34 = vmul.f32 0.70710677, %v5134_v39  ;;  %v5199_v16 = vmul.f32 0.70710677, %v5135_v47  ;;  %v5200_v29 = vmul.f32 0.70710677, %v5136_v33  ;;  %v12959_v28 = vadd.f32 %v8927_v49, %v5119_v10 }
 0x574   : > { %v12961_v17 = vadd.f32 %v8927_v49, %v5120_v5  ;;  %v12963_v19 = vadd.f32 %v8927_v49, %v5121_v46  ;;  %v5201_v30 = vmul.f32 0.70710677, %v5137_v35  ;;  %v12965_v23 = vadd.f32 %v8927_v49, %v5122_v26 }
 0x575   : > { %v12967_v50 = vadd.f32 %v8927_v49, %v5123_v25  ;;  %v5202_v58 = vmul.f32 0.70710677, %v5138_v40  ;;  %10606 = verf.f32 %v5198_v34  ;;  %v12969_v0 = vadd.f32 %v8927_v49, %v5124_v52 }
 0x576   : > { %v12971_v51 = vadd.f32 %v8927_v49, %v5125_v48  ;;  %v5203_v63 = vmul.f32 0.70710677, %v5139_v42  ;;  %10608 = verf.f32 %v5199_v16  ;;  %v12973_v55 = vadd.f32 %v8927_v49, %v5126_v1 }
 0x577   : > { %v5166_v24 = vmul.f32 0.5, %v5134_v39  ;;  %v5204_v38 = vmul.f32 0.70710677, %v5140_v20  ;;  %10610 = verf.f32 %v5200_v29  ;;  %v5167_v15 = vmul.f32 0.5, %v5135_v47 }
 0x578   : > { %v5168_v37 = vmul.f32 0.5, %v5136_v33  ;;  %v5205_v8 = vmul.f32 0.70710677, %v5141_v13  ;;  %10612 = verf.f32 %v5201_v30  ;;  %v5169_v14 = vmul.f32 0.5, %v5137_v35 }
 0x579   : > { %v12975_v44 = vmul.f32 0.5, %v5138_v40  ;;  %v5206_v21 = vmul.f32 0.70710677, %v5142_v2  ;;  %10614 = verf.f32 %v5202_v58  ;;  %v12977_v11 = vmul.f32 0.5, %v5139_v42 }
 0x57a   : > { %v12979_v22 = vmul.f32 0.5, %v5140_v20  ;;  %v5207_v43 = vmul.f32 0.70710677, %v5143_v12  ;;  %10616 = verf.f32 %v5203_v63  ;;  %v12981_v49 = vmul.f32 0.5, %v5141_v13 }
 0x57b   : > { %v12983_v57 = vmul.f32 0.5, %v5142_v2  ;;  %v5208_v53 = vmul.f32 0.70710677, %v5144_v61  ;;  %10618 = verf.f32 %v5204_v38  ;;  %v12985_v62 = vmul.f32 0.5, %v5143_v12 }
 0x57c   : > { %v12987_v18 = vmul.f32 0.5, %v5144_v61  ;;  %v5209_v7 = vmul.f32 0.70710677, %v5145_v59  ;;  %10620 = verf.f32 %v5205_v8  ;;  %v12989_v10 = vmul.f32 0.5, %v5145_v59 }
 0x57d   : > { %v12991_v5 = vmul.f32 0.5, %v5146_v54  ;;  %v5210_v46 = vmul.f32 0.70710677, %v5146_v54  ;;  %10622 = verf.f32 %v5206_v21  ;;  %v12993_v26 = vmul.f32 0.5, %v5147_v3 }
 0x57e   : > { %v12995_v25 = vmul.f32 0.5, %v5148_v9  ;;  %v5211_v52 = vmul.f32 0.70710677, %v5147_v3  ;;  %10624 = verf.f32 %v5207_v43  ;;  %v12997_v1 = vmul.f32 0.5, %v5149_v36 }
 0x57f   : > { %v10607_v48 = vpop.eup %10606  ;;  %v12999_v39 = vmul.f32 0.5, %v5150_v6  ;;  %v5212_v47 = vmul.f32 0.70710677, %v5148_v9  ;;  %10626 = verf.f32 %v5208_v53  ;;  %v5213_v35 = vmul.f32 0.70710677, %v5149_v36 }
 0x580   : > { %v10609_v33 = vpop.eup %10608  ;;  %v5214_v40 = vmul.f32 0.70710677, %v5150_v6  ;;  %10628 = verf.f32 %v5209_v7  ;;  %v5262_v42 = vadd.f32 1.0, %v10607_v48  ;;  %v5215_v13 = vmul.f32 0.70710677, %v12945_v41 }
 0x581   : > { %v10611_v20 = vpop.eup %10610  ;;  %v5216_v2 = vmul.f32 0.70710677, %v12947_v31  ;;  %10630 = verf.f32 %v5210_v46  ;;  %v5263_v12 = vadd.f32 1.0, %v10609_v33  ;;  %v5217_v59 = vmul.f32 0.70710677, %v12949_v56 }
 0x582   : > { %v10613_v61 = vpop.eup %10612  ;;  %10632 = verf.f32 %v5211_v52  ;;  %v5264_v54 = vadd.f32 1.0, %v10611_v20  ;;  %v5294_v3 = vmul.f32 %v5262_v42, %v5166_v24  ;;  %v5218_v34 = vmul.f32 0.70710677, %v12951_v32 }
 0x583   : > { %v10615_v9 = vpop.eup %10614  ;;  %10634 = verf.f32 %v5212_v47  ;;  %v5265_v36 = vadd.f32 1.0, %v10613_v61  ;;  %v5295_v6 = vmul.f32 %v5263_v12, %v5167_v15  ;;  %v5219_v29 = vmul.f32 0.70710677, %v12953_v60 }
 0x584   : > { %v10617_v16 = vpop.eup %10616  ;;  %10636 = verf.f32 %v5213_v35  ;;  %v5266_v30 = vadd.f32 1.0, %v10615_v9  ;;  %v5296_v58 = vmul.f32 %v5264_v54, %v5168_v37  ;;  %5382 = vst.msk [vmem:[#allocation2 + $0x19] sm:$0xff] %vm4839_vm8, %v5294_v3  ;;  %v5220_v38 = vmul.f32 0.70710677, %v12955_v4 }
 0x585   : > { %v10619_v63 = vpop.eup %10618  ;;  %10638 = verf.f32 %v5214_v40  ;;  %v5267_v8 = vadd.f32 1.0, %v10617_v16  ;;  %v5297_v24 = vmul.f32 %v5265_v36, %v5169_v14  ;;  %5383 = vst.msk [vmem:[#allocation2 + $0x21] sm:$0xff] %vm4839_vm8, %v5295_v6  ;;  %v5221_v43 = vmul.f32 0.70710677, %v12957_v27 }
 0x586   : > { %v10621_v21 = vpop.eup %10620  ;;  %10640 = verf.f32 %v5215_v13  ;;  %v5268_v15 = vadd.f32 1.0, %v10619_v63  ;;  %v5298_v53 = vmul.f32 %v5266_v30, %v12975_v44  ;;  %5384 = vst.msk [vmem:[#allocation2 + $0x31] sm:$0xff] %vm4839_vm8, %v5296_v58  ;;  %v5222_v7 = vmul.f32 0.70710677, %v12959_v28 }
 0x587   : > { %v10623_v37 = vpop.eup %10622  ;;  %10642 = verf.f32 %v5216_v2  ;;  %v5269_v46 = vadd.f32 1.0, %v10621_v21  ;;  %v5299_v52 = vmul.f32 %v5267_v8, %v12977_v11  ;;  %5385 = vst.msk [vmem:[#allocation2 + $0x39] sm:$0xff] %vm4839_vm8, %v5297_v24  ;;  %v5223_v48 = vmul.f32 0.70710677, %v12961_v17  ;;  %v13040_v8 = vld [vmem:[%s13932_s4 + $0x8] sm:$0xf] }
 0x588   : > { %v10625_v14 = vpop.eup %10624  ;;  %10644 = verf.f32 %v5217_v59  ;;  %v5270_v47 = vadd.f32 1.0, %v10623_v37  ;;  %v5300_v33 = vmul.f32 %v5268_v15, %v12979_v22  ;;  %5386 = vst.msk [vmem:[#allocation2 + $0x49] sm:$0xff] %vm4839_vm8, %v5298_v53  ;;  %v5224_v35 = vmul.f32 0.70710677, %v12963_v19 }
 0x589   : > { %v10627_v44 = vpop.eup %10626  ;;  %10646 = verf.f32 %v5218_v34  ;;  %v5271_v40 = vadd.f32 1.0, %v10625_v14  ;;  %v5301_v42 = vmul.f32 %v5269_v46, %v12981_v49  ;;  %5387 = vst.msk [vmem:[#allocation2 + $0x51] sm:$0xff] %vm4839_vm8, %v5299_v52  ;;  %v5225_v20 = vmul.f32 0.70710677, %v12965_v23 }
 0x58a   : > { %v10629_v11 = vpop.eup %10628  ;;  %10648 = verf.f32 %v5219_v29  ;;  %v5272_v13 = vadd.f32 1.0, %v10627_v44  ;;  %v5302_v2 = vmul.f32 %v5270_v47, %v12983_v57  ;;  %5388 = vst.msk [vmem:[#allocation2 + $0x61] sm:$0xff] %vm4839_vm8, %v5300_v33  ;;  %v5226_v12 = vmul.f32 0.70710677, %v12967_v50 }
 0x58b   : > { %v10631_v22 = vpop.eup %10630  ;;  %10650 = verf.f32 %v5220_v38  ;;  %v5273_v61 = vadd.f32 1.0, %v10629_v11  ;;  %v5303_v59 = vmul.f32 %v5271_v40, %v12985_v62  ;;  %5389 = vst.msk [vmem:[#allocation2 + $0x69] sm:$0xff] %vm4839_vm8, %v5301_v42  ;;  %v5465_v49 = vld [vmem:[#allocation2 + $0x19] sm:$0xff]  ;;  %v5227_v3 = vmul.f32 0.70710677, %v12969_v0 }
 0x58c   : > { %v10633_v54 = vpop.eup %10632  ;;  %10652 = verf.f32 %v5221_v43  ;;  %v5274_v9 = vadd.f32 1.0, %v10631_v22  ;;  %v5304_v34 = vmul.f32 %v5272_v13, %v12987_v18  ;;  %5390 = vst.msk [vmem:[#allocation2 + $0x79] sm:$0xff] %vm4839_vm8, %v5302_v2  ;;  %v5466_v57 = vld [vmem:[#allocation2 + $0x21] sm:$0xff]  ;;  %v5228_v58 = vmul.f32 0.70710677, %v12971_v51 }
 0x58d   : > { %v10635_v36 = vpop.eup %10634  ;;  %10654 = verf.f32 %v5222_v7  ;;  %v5275_v6 = vadd.f32 1.0, %v10633_v54  ;;  %v5305_v16 = vmul.f32 %v5273_v61, %v12989_v10  ;;  %5391 = vst.msk [vmem:[#allocation2 + $0x81] sm:$0xff] %vm4839_vm8, %v5303_v59  ;;  %v13032_v62 = vpack.c.bf16 %v5466_v57, %v5465_v49  ;;  %v5467_v29 = vld [vmem:[#allocation2 + $0x31] sm:$0xff] }
 0x58e   : > { %v10637_v30 = vpop.eup %10636  ;;  %10656 = verf.f32 %v5223_v48  ;;  %v5276_v63 = vadd.f32 1.0, %v10635_v36  ;;  %v5306_v18 = vmul.f32 %v5274_v9, %v12991_v5  ;;  %5392 = vst.msk [vmem:[#allocation2 + $0x91] sm:$0xff] %vm4839_vm8, %v5304_v34  ;;  %v5468_v38 = vld [vmem:[#allocation2 + $0x39] sm:$0xff]  ;;  %v5229_v15 = vmul.f32 0.70710677, %v12973_v55 }
 0x58f   : > { %v10639_v10 = vpop.eup %10638  ;;  %10658 = verf.f32 %v5224_v35  ;;  %v5277_v24 = vadd.f32 1.0, %v10637_v30  ;;  %v5307_v21 = vmul.f32 %v5275_v6, %v12993_v26  ;;  %5393 = vst.msk [vmem:[#allocation2 + $0x99] sm:$0xff] %vm4839_vm8, %v5305_v16  ;;  %9698 = vmatmul.mubr.msk.bf16.vlgmr.msra.gmra.mrb[0].mxu1 %vm4839_vm8, %v13032_v62  ;;  %v13046_v43 = vpack.c.bf16 %v5468_v38, %v5467_v29 }
 0x590   : > { %v10641_v5 = vpop.eup %10640  ;;  %10660 = verf.f32 %v5225_v20  ;;  %v5278_v53 = vadd.f32 1.0, %v10639_v10  ;;  %v5308_v37 = vmul.f32 %v5276_v63, %v12995_v25  ;;  %5394 = vst.msk [vmem:[#allocation2 + $0xa9] sm:$0xff] %vm4839_vm8, %v5306_v18  ;;  %9730 = vmatpush3.bf16.msra.mxu1 %v12908_v45  ;;  %v5183_v26 = vmul.f32 0.5, %v12945_v41  ;;  %v5469_v41 = vld [vmem:[#allocation2 + $0x49] sm:$0xff]  ;;  %v5470_v47 = vld [vmem:[#allocation2 + $0x51] sm:$0xff] }
 0x591   : > { %v10643_v7 = vpop.eup %10642  ;;  %10662 = verf.f32 %v5226_v12  ;;  %v5279_v46 = vadd.f32 1.0, %v10641_v5  ;;  %v5309_v52 = vmul.f32 %v5277_v24, %v12997_v1  ;;  %5395 = vst.msk [vmem:[#allocation2 + $0xb1] sm:$0xff] %vm4839_vm8, %v5307_v21  ;;  %9701 = vmatprep.mubr.msk.bf16.mxu1 %vm4839_vm8, %v13046_v43  ;;  %10524 = vmatprep.subr.msk.bf16.mxu1 %vm5561_vm10, %v13040_v8  ;;  %v5184_v14 = vmul.f32 0.5, %v12947_v31  ;;  %v5471_v40 = vld [vmem:[#allocation2 + $0x61] sm:$0xff] }
 0x592   : > { %v10645_v25 = vpop.eup %10644  ;;  %10664 = verf.f32 %v5227_v3  ;;  %v5280_v45 = vadd.f32 1.0, %v10643_v7  ;;  %v5310_v48 = vmul.f32 %v5278_v53, %v12999_v39  ;;  %5396 = vst.msk [vmem:[#allocation2 + $0xc1] sm:$0xff] %vm4839_vm8, %v5308_v37  ;;  %v5185_v33 = vmul.f32 0.5, %v12949_v56  ;;  %v5472_v42 = vld [vmem:[#allocation2 + $0x69] sm:$0xff] }
 0x593   : > { %v10647_v1 = vpop.eup %10646  ;;  %10666 = verf.f32 %v5228_v58  ;;  %v5281_v44 = vadd.f32 1.0, %v10645_v25  ;;  %v5311_v35 = vmul.f32 %v5279_v46, %v5183_v26  ;;  %5397 = vst.msk [vmem:[#allocation2 + $0xc9] sm:$0xff] %vm4839_vm8, %v5309_v52  ;;  %v5186_v31 = vmul.f32 0.5, %v12951_v32 }
 0x594   : > { %v10649_v11 = vpop.eup %10648  ;;  %10668 = verf.f32 %v5229_v15  ;;  %v5282_v20 = vadd.f32 1.0, %v10647_v1  ;;  %v5312_v39 = vmul.f32 %v5280_v45, %v5184_v14  ;;  %5398 = vst.msk [vmem:[#allocation2 + $0xd9] sm:$0xff] %vm4839_vm8, %v5310_v48  ;;  %v5187_v2 = vmul.f32 0.5, %v12953_v60  ;;  %v5474_v10 = vld [vmem:[#allocation2 + $0x81] sm:$0xff] }
 0x595   : > { %v10651_v13 = vpop.eup %10650  ;;  %v5283_v22 = vadd.f32 1.0, %v10649_v11  ;;  %v5313_v56 = vmul.f32 %v5281_v44, %v5185_v33  ;;  %5399 = vst.msk [vmem:[#allocation2 + $0xe1] sm:$0xff] %vm4839_vm8, %v5311_v35  ;;  %v13068_v12 = vpack.c.bf16 %v5470_v47, %v5469_v41  ;;  %v5188_v59 = vmul.f32 0.5, %v12955_v4 }
 0x596   : > { %v10653_v61 = vpop.eup %10652  ;;  %v5284_v49 = vadd.f32 1.0, %v10651_v13  ;;  %v5314_v54 = vmul.f32 %v5282_v20, %v5186_v31  ;;  %5400 = vst.msk [vmem:[#allocation2 + $0xf1] sm:$0xff] %vm4839_vm8, %v5312_v39  ;;  %v13072_v32 = vpack.c.bf16 %v5472_v42, %v5471_v40  ;;  %v5189_v9 = vmul.f32 0.5, %v12957_v27  ;;  %v5476_v53 = vld [vmem:[#allocation2 + $0x99] sm:$0xff] }
 0x597   : > { %v10655_v3 = vpop.eup %10654  ;;  %v5285_v34 = vadd.f32 1.0, %v10653_v61  ;;  %v5315_v60 = vmul.f32 %v5283_v22, %v5187_v2  ;;  %5401 = vst.msk [vmem:[#allocation2 + $0xf9] sm:$0xff] %vm4839_vm8, %v5313_v56  ;;  %9702 = vmatmul.mubr.msk.bf16.gmra.mrb[4].mxu1 %vm4839_vm8, %v13068_v12  ;;  %v5190_v36 = vmul.f32 0.5, %v12959_v28  ;;  %v5191_v27 = vmul.f32 0.5, %v12961_v17  ;;  %v5473_v28 = vld [vmem:[#allocation2 + $0x79] sm:$0xff]  ;;  %v5475_v17 = vld [vmem:[#allocation2 + $0x91] sm:$0xff] }
 0x598   : > { %v10657_v57 = vpop.eup %10656  ;;  %v5286_v4 = vadd.f32 1.0, %v10655_v3  ;;  %v5316_v6 = vmul.f32 %v5284_v49, %v5188_v59  ;;  %5402 = vst.msk [vmem:[#allocation2 + $0x109] sm:$0xff] %vm4839_vm8, %v5314_v54  ;;  %9705 = vmatprep.mubr.msk.bf16.mxu1 %vm4839_vm8, %v13072_v32  ;;  %v5192_v63 = vmul.f32 0.5, %v12963_v19  ;;  %v5193_v21 = vmul.f32 0.5, %v12965_v23  ;;  %v5477_v35 = vld [vmem:[#allocation2 + $0xa9] sm:$0xff] }
 0x599   : > { %v10659_v16 = vpop.eup %10658  ;;  %v5287_v29 = vadd.f32 1.0, %v10657_v57  ;;  %v5317_v30 = vmul.f32 %v5285_v34, %v5189_v9  ;;  %5403 = vst.msk [vmem:[#allocation2 + $0x111] sm:$0xff] %vm4839_vm8, %v5315_v60  ;;  %v5194_v7 = vmul.f32 0.5, %v12967_v50  ;;  %v5195_v52 = vmul.f32 0.5, %v12969_v0  ;;  %v5479_v40 = vld [vmem:[#allocation2 + $0xc1] sm:$0xff] }
 0x59a   : > { %v10661_v58 = vpop.eup %10660  ;;  %v5288_v18 = vadd.f32 1.0, %v10659_v16  ;;  %v5318_v38 = vmul.f32 %v5286_v4, %v5190_v36  ;;  %5404 = vst.msk [vmem:[#allocation2 + $0x121] sm:$0xff] %vm4839_vm8, %v5316_v6  ;;  %v13092_v23 = vpack.c.bf16 %v5474_v10, %v5473_v28  ;;  %v5196_v48 = vmul.f32 0.5, %v12971_v51  ;;  %v5480_v42 = vld [vmem:[#allocation2 + $0xc9] sm:$0xff]  ;;  %v5414_v16 = vld [vmem:[#allocation2] sm:$0xff]  ;;  %v5419_v10 = vld [vmem:[#allocation2 + $0x38] sm:$0xff] }
 0x59b   : > { %v10663_v24 = vpop.eup %10662  ;;  %v5289_v5 = vadd.f32 1.0, %v10661_v58  ;;  %v5319_v15 = vmul.f32 %v5287_v29, %v5191_v27  ;;  %5405 = vst.msk [vmem:[#allocation2 + $0x129] sm:$0xff] %vm4839_vm8, %v5317_v30  ;;  %v13096_v50 = vpack.c.bf16 %v5476_v53, %v5475_v17  ;;  %v5197_v1 = vmul.f32 0.5, %v12973_v55  ;;  %v5478_v55 = vld [vmem:[#allocation2 + $0xb1] sm:$0xff]  ;;  %v5481_v20 = vld [vmem:[#allocation2 + $0xd9] sm:$0xff]  ;;  %v5415_v27 = vld [vmem:[#allocation2 + $0x8] sm:$0xff] }
 0x59c   : > { %v10665_v37 = vpop.eup %10664  ;;  %v5290_v26 = vadd.f32 1.0, %v10663_v24  ;;  %v5320_v19 = vmul.f32 %v5288_v18, %v5192_v63  ;;  %5406 = vst.msk [vmem:[#allocation2 + $0x139] sm:$0xff] %vm4839_vm8, %v5318_v38  ;;  %v13108_v11 = vpack.c.bf16 %v5478_v55, %v5477_v35  ;;  %v13110_v31 = vpack.c.bf16 %v5480_v42, %v5479_v40  ;;  %v5482_v39 = vld [vmem:[#allocation2 + $0xe1] sm:$0xff]  ;;  %v5416_v18 = vld [vmem:[#allocation2 + $0x18] sm:$0xff]  ;;  %v5418_v28 = vld [vmem:[#allocation2 + $0x30] sm:$0xff] }
 0x59d   : > { %v10667_v46 = vpop.eup %10666  ;;  %v5291_v25 = vadd.f32 1.0, %v10665_v37  ;;  %v5321_v14 = vmul.f32 %v5289_v5, %v5193_v21  ;;  %5407 = vst.msk [vmem:[#allocation2 + $0x141] sm:$0xff] %vm4839_vm8, %v5319_v15  ;;  %v5483_v13 = vld [vmem:[#allocation2 + $0xf1] sm:$0xff]  ;;  %v13116_v22 = vpack.c.bf16 %v5482_v39, %v5481_v20  ;;  %v5446_v58 = vpack.c.bf16 %v5415_v27, %v5414_v16  ;;  %v5417_v38 = vld [vmem:[#allocation2 + $0x20] sm:$0xff]  ;;  %v13154_v15 = vld [vmem:[%s13932_s4 + $0xc] sm:$0xf] }
 0x59e   : > { %v10669_v45 = vpop.eup %10668  ;;  %v5292_v41 = vadd.f32 1.0, %v10667_v46  ;;  %v5322_v47 = vmul.f32 %v5290_v26, %v5194_v7  ;;  %5408 = vst.msk [vmem:[#allocation2 + $0x151] sm:$0xff] %vm4839_vm8, %v5320_v19  ;;  %v5484_v2 = vld [vmem:[#allocation2 + $0xf9] sm:$0xff]  ;;  %v13145_v24 = vpack.c.bf16 %v5417_v38, %v5416_v18  ;;  %v6037_v21 = vsel %vm5561_vm10, %v13040_v8, 0  ;;  %v5420_v17 = vld [vmem:[#allocation2 + $0x48] sm:$0xff]  ;;  %v5421_v53 = vld [vmem:[#allocation2 + $0x50] sm:$0xff] }
 0x59f   : > { %v5293_v33 = vadd.f32 1.0, %v10669_v45  ;;  %v5323_v44 = vmul.f32 %v5291_v25, %v5195_v52  ;;  %5409 = vst.msk [vmem:[#allocation2 + $0x159] sm:$0xff] %vm4839_vm8, %v5321_v14  ;;  %9706 = vmatmul.mubr.msk.bf16.gmra.mrb[8].mxu1 %vm4839_vm8, %v13092_v23  ;;  %v13118_v56 = vpack.c.bf16 %v5484_v2, %v5483_v13  ;;  %v5485_v61 = vld [vmem:[#allocation2 + $0x109] sm:$0xff]  ;;  %v13149_v5 = vpack.c.bf16 %v5419_v10, %v5418_v28  ;;  %v5422_v8 = vld [vmem:[#allocation2 + $0x60] sm:$0xff]  ;;  %v5424_v19 = vld [vmem:[#allocation2 + $0x78] sm:$0xff] }
 0x5a0   : > { %v5324_v0 = vmul.f32 %v5292_v41, %v5196_v48  ;;  %5410 = vst.msk [vmem:[#allocation2 + $0x169] sm:$0xff] %vm4839_vm8, %v5322_v47  ;;  %9709 = vmatprep.mubr.msk.bf16.mxu1 %vm4839_vm8, %v13096_v50  ;;  %v5486_v59 = vld [vmem:[#allocation2 + $0x111] sm:$0xff]  ;;  %v5423_v37 = vld [vmem:[#allocation2 + $0x68] sm:$0xff]  ;;  %v13162_v7 = vpack.c.bf16 %v5421_v53, %v5420_v17  ;;  %v5425_v46 = vld [vmem:[#allocation2 + $0x80] sm:$0xff]  ;;  %v6331_v53 = vsel %vm5561_vm10, %v13154_v15, 0 }
 0x5a1   : > { %v5325_v51 = vmul.f32 %v5293_v33, %v5197_v1  ;;  %5411 = vst.msk [vmem:[#allocation2 + $0x171] sm:$0xff] %vm4839_vm8, %v5323_v44  ;;  %v5487_v49 = vld [vmem:[#allocation2 + $0x121] sm:$0xff]  ;;  %v13124_v3 = vpack.c.bf16 %v5486_v59, %v5485_v61  ;;  %v13164_v26 = vpack.c.bf16 %v5423_v37, %v5422_v8  ;;  %v5426_v52 = vld [vmem:[#allocation2 + $0x90] sm:$0xff]  ;;  %v5427_v25 = vld [vmem:[#allocation2 + $0x98] sm:$0xff]  ;;  %v13170_v14 = vpack.c.bf16 %v5425_v46, %v5424_v19 }
 0x5a2   : > { %5412 = vst.msk [vmem:[#allocation2 + $0x181] sm:$0xff] %vm4839_vm8, %v5324_v0  ;;  %v5488_v54 = vld [vmem:[#allocation2 + $0x129] sm:$0xff]  ;;  %v13172_v45 = vpack.c.bf16 %v5427_v25, %v5426_v52  ;;  %v5430_v47 = vld [vmem:[#allocation2 + $0xc0] sm:$0xff]  ;;  %v5432_v0 = vld [vmem:[#allocation2 + $0xd8] sm:$0xff] }
 0x5a3   : > { %5413 = vst.msk [vmem:[#allocation2 + $0x189] sm:$0xff] %vm4839_vm8, %v5325_v51  ;;  %v13126_v9 = vpack.c.bf16 %v5488_v54, %v5487_v49  ;;  %v5489_v34 = vld [vmem:[#allocation2 + $0x139] sm:$0xff]  ;;  %v5428_v48 = vld [vmem:[#allocation2 + $0xa8] sm:$0xff]  ;;  %v5429_v41 = vld [vmem:[#allocation2 + $0xb0] sm:$0xff] }
 0x5a4   : > { %v5490_v60 = vld [vmem:[#allocation2 + $0x141] sm:$0xff]  ;;  %v13178_v33 = vpack.c.bf16 %v5429_v41, %v5428_v48  ;;  %v5434_v35 = vld [vmem:[#allocation2 + $0xf0] sm:$0xff]  ;;  %v5435_v55 = vld [vmem:[#allocation2 + $0xf8] sm:$0xff] }
 0x5a5   : > { %v5491_v57 = vld [vmem:[#allocation2 + $0x151] sm:$0xff]  ;;  %v13132_v4 = vpack.c.bf16 %v5490_v60, %v5489_v34  ;;  %v5431_v1 = vld [vmem:[#allocation2 + $0xc8] sm:$0xff]  ;;  %v5433_v51 = vld [vmem:[#allocation2 + $0xe0] sm:$0xff]  ;;  %v13188_v42 = vpack.c.bf16 %v5435_v55, %v5434_v35 }
 0x5a6   : > { %v5492_v36 = vld [vmem:[#allocation2 + $0x159] sm:$0xff]  ;;  %v13180_v44 = vpack.c.bf16 %v5431_v1, %v5430_v47  ;;  %v13186_v40 = vpack.c.bf16 %v5433_v51, %v5432_v0  ;;  %v5436_v20 = vld [vmem:[#allocation2 + $0x108] sm:$0xff]  ;;  %v5437_v39 = vld [vmem:[#allocation2 + $0x110] sm:$0xff] }
 0x5a7   : > { %9710 = vmatmul.mubr.msk.bf16.gmra.mrb[12].mxu1 %vm4839_vm8, %v13108_v11  ;;  %v13134_v6 = vpack.c.bf16 %v5492_v36, %v5491_v57  ;;  %v5493_v29 = vld [vmem:[#allocation2 + $0x169] sm:$0xff]  ;;  %v5438_v13 = vld [vmem:[#allocation2 + $0x120] sm:$0xff]  ;;  %v13194_v61 = vpack.c.bf16 %v5437_v39, %v5436_v20  ;;  %v5440_v49 = vld [vmem:[#allocation2 + $0x138] sm:$0xff] }
 0x5a8   : > { %9713 = vmatprep.mubr.msk.bf16.mxu1 %vm4839_vm8, %v13110_v31  ;;  %v5494_v30 = vld [vmem:[#allocation2 + $0x171] sm:$0xff]  ;;  %v5439_v2 = vld [vmem:[#allocation2 + $0x128] sm:$0xff]  ;;  %v5441_v54 = vld [vmem:[#allocation2 + $0x140] sm:$0xff] }
 0x5a9   : > { %v13140_v63 = vpack.c.bf16 %v5494_v30, %v5493_v29  ;;  %v13196_v59 = vpack.c.bf16 %v5439_v2, %v5438_v13  ;;  %v5442_v34 = vld [vmem:[#allocation2 + $0x150] sm:$0xff]  ;;  %v5443_v60 = vld [vmem:[#allocation2 + $0x158] sm:$0xff]  ;;  %v13202_v57 = vpack.c.bf16 %v5441_v54, %v5440_v49  ;;  %v5938_v16 = vld [vmem:[#allocation2 + $0x2] sm:$0xff] }
 0x5aa   : > { %v13204_v36 = vpack.c.bf16 %v5443_v60, %v5442_v34  ;;  %v5939_v27 = vld [vmem:[#allocation2 + $0xa] sm:$0xff]  ;;  %v5940_v38 = vld [vmem:[#allocation2 + $0x1a] sm:$0xff]  ;;  %v5941_v28 = vld [vmem:[#allocation2 + $0x22] sm:$0xff] }
 0x5ab   : > { %v5444_v29 = vld [vmem:[#allocation2 + $0x168] sm:$0xff]  ;;  %v5445_v30 = vld [vmem:[#allocation2 + $0x170] sm:$0xff]  ;;  %v13215_v17 = vpack.c.bf16 %v5941_v28, %v5940_v38  ;;  %v5948_v41 = vld [vmem:[#allocation2 + $0x7a] sm:$0xff] }
 0x5ac   : > { %v13210_v18 = vpack.c.bf16 %v5445_v30, %v5444_v29  ;;  %v5942_v10 = vld [vmem:[#allocation2 + $0x32] sm:$0xff]  ;;  %v5944_v19 = vld [vmem:[#allocation2 + $0x4a] sm:$0xff]  ;;  %v5946_v52 = vld [vmem:[#allocation2 + $0x62] sm:$0xff] }
 0x5ad   : > { %v8995_v37 = vld [vmem:[%s13932_s4 + $0x10] sm:$0xf]  ;;  %v5949_v47 = vld [vmem:[#allocation2 + $0x82] sm:$0xff]  ;;  %v5951_v0 = vld [vmem:[#allocation2 + $0x9a] sm:$0xff] }
 0x5ae   : > { %v5945_v46 = vld [vmem:[#allocation2 + $0x52] sm:$0xff]  ;;  %v5947_v25 = vld [vmem:[#allocation2 + $0x6a] sm:$0xff]  ;;  %v13237_v51 = vpack.c.bf16 %v5949_v47, %v5948_v41  ;;  %v5954_v39 = vld [vmem:[#allocation2 + $0xc2] sm:$0xff] }
 0x5af   : > { %9714 = vmatmul.mubr.msk.bf16.gmra.mrb[16].mxu1 %vm4839_vm8, %v13116_v22  ;;  %v13231_v48 = vpack.c.bf16 %v5947_v25, %v5946_v52  ;;  %v5950_v1 = vld [vmem:[#allocation2 + $0x92] sm:$0xff]  ;;  %v5952_v55 = vld [vmem:[#allocation2 + $0xaa] sm:$0xff]  ;;  %v5956_v54 = vld [vmem:[#allocation2 + $0xda] sm:$0xff] }
 0x5b0   : > { %9717 = vmatprep.mubr.msk.bf16.mxu1 %vm4839_vm8, %v13118_v56  ;;  %v13239_v35 = vpack.c.bf16 %v5951_v0, %v5950_v1  ;;  %v5953_v20 = vld [vmem:[#allocation2 + $0xb2] sm:$0xff]  ;;  %v5955_v13 = vld [vmem:[#allocation2 + $0xca] sm:$0xff]  ;;  %v5957_v34 = vld [vmem:[#allocation2 + $0xe2] sm:$0xff] }
 0x5b1   : > { %v13245_v2 = vpack.c.bf16 %v5953_v20, %v5952_v55  ;;  %v13247_v49 = vpack.c.bf16 %v5955_v13, %v5954_v39  ;;  %v5958_v60 = vld [vmem:[#allocation2 + $0xf2] sm:$0xff]  ;;  %v5960_v30 = vld [vmem:[#allocation2 + $0x10a] sm:$0xff]  ;;  %v5962_v38 = vld [vmem:[#allocation2 + $0x122] sm:$0xff]  ;;  %v6625_v55 = vsel %vm5561_vm10, %v8995_v37, 0 }
 0x5b2   : > { %v5963_v28 = vld [vmem:[#allocation2 + $0x12a] sm:$0xff]  ;;  %v5967_v52 = vld [vmem:[#allocation2 + $0x15a] sm:$0xff]  ;;  %v5969_v1 = vld [vmem:[#allocation2 + $0x172] sm:$0xff] }
 0x5b3   : > { %v5968_v47 = vld [vmem:[#allocation2 + $0x16a] sm:$0xff]  ;;  %v9012_v20 = vld [vmem:[%s13932_s4 + $0x14] sm:$0xf] }
 0x5b4   : > { %v13277_v0 = vpack.c.bf16 %v5969_v1, %v5968_v47  ;;  %v6919_v13 = vsel %vm5561_vm10, %v9012_v20, 0 }
 0x5b7   : > { %9718 = vmatmul.mubr.msk.bf16.gmra.mrb[20].mxu1 %vm4839_vm8, %v13124_v3 }
 0x5b8   : > { %9721 = vmatprep.mubr.msk.bf16.mxu1 %vm4839_vm8, %v13126_v9 }
 0x5bf   : > { %9722 = vmatmul.mubr.msk.bf16.gmra.mrb[24].mxu1 %vm4839_vm8, %v13132_v4 }
 0x5c0   : > { %9725 = vmatprep.mubr.msk.bf16.mxu1 %vm4839_vm8, %v13134_v6 }
 0x5c7   : > { %9726 = vmatmul.mubr.msk.bf16.gmra.mrb[28].mxu1 %vm4839_vm8, %v13140_v63 }
 0x5c8   : > { %9731 = vmatprep.mubr.msk.bf16.mxu1 %vm4839_vm8, %v5446_v58  ;;  %v5970_v58 = vpack.c.bf16 %v5939_v27, %v5938_v16  ;;  %v5959_v16 = vld [vmem:[#allocation2 + $0xfa] sm:$0xff]  ;;  %v13253_v27 = vpack.c.bf16 %v5957_v34, %v5956_v54  ;;  %v6557_v34 = vld [vmem:[#allocation2 + $0x189] sm:$0xff] }
 0x5c9   : > { %v13255_v29 = vpack.c.bf16 %v5959_v16, %v5958_v60  ;;  %v9029_v54 = vld [vmem:[%s13932_s4 + $0x18] sm:$0xf] }
 0x5ca   : > { %v7214_v16 = vsel %vm5561_vm10, %v9029_v54, 0 }
 0x5cf   : > { %9732 = vmatmul.mubr.msk.bf16.vlgmr.msra.gmra.mrb[0].mxu1 %vm4839_vm8, %v13145_v24 }
 0x5d0   : > { %9764 = vmatpush3.bf16.msra.mxu1 %v6037_v21  ;;  %9735 = vmatprep.mubr.msk.bf16.mxu1 %vm4839_vm8, %v13149_v5  ;;  %v5943_v21 = vld [vmem:[#allocation2 + $0x3a] sm:$0xff] }
 0x5d1   : > { %10525 = vmatprep.subr.msk.bf16.mxu1 %vm5561_vm10, %v13154_v15  ;;  %v13219_v8 = vpack.c.bf16 %v5943_v21, %v5942_v10  ;;  %v13229_v15 = vpack.c.bf16 %v5945_v46, %v5944_v19  ;;  %v13263_v21 = vpack.c.bf16 %v5963_v28, %v5962_v38  ;;  %v5965_v19 = vld [vmem:[#allocation2 + $0x142] sm:$0xff]  ;;  %v5966_v46 = vld [vmem:[#allocation2 + $0x152] sm:$0xff] }
 0x5d2   : > { %v13271_v41 = vpack.c.bf16 %v5967_v52, %v5966_v46 }
 0x5d7   : > { %9736 = vmatmul.mubr.msk.bf16.gmra.mrb[4].mxu1 %vm4839_vm8, %v13162_v7 }
 0x5d8   : > { %9739 = vmatprep.mubr.msk.bf16.mxu1 %vm4839_vm8, %v13164_v26 }
 0x5df   : > { %9740 = vmatmul.mubr.msk.bf16.gmra.mrb[8].mxu1 %vm4839_vm8, %v13170_v14 }
 0x5e0   : > { %9743 = vmatprep.mubr.msk.bf16.mxu1 %vm4839_vm8, %v13172_v45 }
 0x5e7   : > { %9744 = vmatmul.mubr.msk.bf16.gmra.mrb[12].mxu1 %vm4839_vm8, %v13178_v33 }
 0x5e8   : > { %9747 = vmatprep.mubr.msk.bf16.mxu1 %vm4839_vm8, %v13180_v44 }
 0x5ef   : > { %9748 = vmatmul.mubr.msk.bf16.gmra.mrb[16].mxu1 %vm4839_vm8, %v13186_v40 }
 0x5f0   : > { %9751 = vmatprep.mubr.msk.bf16.mxu1 %vm4839_vm8, %v13188_v42 }
 0x5f7   : > { %9752 = vmatmul.mubr.msk.bf16.gmra.mrb[20].mxu1 %vm4839_vm8, %v13194_v61 }
 0x5f8   : > { %9755 = vmatprep.mubr.msk.bf16.mxu1 %vm4839_vm8, %v13196_v59 }
 0x5ff   : > { %9756 = vmatmul.mubr.msk.bf16.gmra.mrb[24].mxu1 %vm4839_vm8, %v13202_v57 }
 0x600   : > { %9759 = vmatprep.mubr.msk.bf16.mxu1 %vm4839_vm8, %v13204_v36 }
 0x607   : > { %9760 = vmatmul.mubr.msk.bf16.gmra.mrb[28].mxu1 %vm4839_vm8, %v13210_v18 }
 0x608   : > { %9765 = vmatprep.mubr.msk.bf16.mxu1 %vm4839_vm8, %v5970_v58  ;;  %v5961_v58 = vld [vmem:[#allocation2 + $0x112] sm:$0xff] }
 0x609   : > { %v13261_v10 = vpack.c.bf16 %v5961_v58, %v5960_v30  ;;  %v9046_v30 = vld [vmem:[%s13932_s4 + $0x1c] sm:$0xf]  ;;  %v6851_v58 = vld [vmem:[#allocation2 + $0x18a] sm:$0xff] }
 0x60a   : > { %v7508_v28 = vsel %vm5561_vm10, %v9046_v30, 0 }
 0x60f   : > { %9766 = vmatmul.mubr.msk.bf16.vlgmr.msra.gmra.mrb[0].mxu1 %vm4839_vm8, %v13215_v17 }
 0x610   : > { %9798 = vmatpush3.bf16.msra.mxu1 %v6331_v53  ;;  %9769 = vmatprep.mubr.msk.bf16.mxu1 %vm4839_vm8, %v13219_v8  ;;  %v5964_v53 = vld [vmem:[#allocation2 + $0x13a] sm:$0xff] }
 0x611   : > { %10526 = vmatprep.subr.msk.bf16.mxu1 %vm5561_vm10, %v8995_v37  ;;  %v13269_v25 = vpack.c.bf16 %v5965_v19, %v5964_v53  ;;  %v6263_v37 = vld [vmem:[#allocation2 + $0x188] sm:$0xff]  ;;  %v9063_v53 = vld [vmem:[%s13932_s4 + $0x20] sm:$0xf] }
 0x617   : > { %9770 = vmatmul.mubr.msk.bf16.gmra.mrb[4].mxu1 %vm4839_vm8, %v13229_v15 }
 0x618   : > { %9773 = vmatprep.mubr.msk.bf16.mxu1 %vm4839_vm8, %v13231_v48 }
 0x61f   : > { %9774 = vmatmul.mubr.msk.bf16.gmra.mrb[8].mxu1 %vm4839_vm8, %v13237_v51 }
 0x620   : > { %9777 = vmatprep.mubr.msk.bf16.mxu1 %vm4839_vm8, %v13239_v35 }
 0x627   : > { %9778 = vmatmul.mubr.msk.bf16.gmra.mrb[12].mxu1 %vm4839_vm8, %v13245_v2 }
 0x628   : > { %9781 = vmatprep.mubr.msk.bf16.mxu1 %vm4839_vm8, %v13247_v49 }
 0x62f   : > { %9782 = vmatmul.mubr.msk.bf16.gmra.mrb[16].mxu1 %vm4839_vm8, %v13253_v27 }
 0x630   : > { %9785 = vmatprep.mubr.msk.bf16.mxu1 %vm4839_vm8, %v13255_v29 }
 0x637   : > { %9786 = vmatmul.mubr.msk.bf16.gmra.mrb[20].mxu1 %vm4839_vm8, %v13261_v10 }
 0x638   : > { %9789 = vmatprep.mubr.msk.bf16.mxu1 %vm4839_vm8, %v13263_v21 }
 0x63f   : > { %9790 = vmatmul.mubr.msk.bf16.gmra.mrb[24].mxu1 %vm4839_vm8, %v13269_v25 }
 0x640   : > { %9793 = vmatprep.mubr.msk.bf16.mxu1 %vm4839_vm8, %v13271_v41 }
 0x647   : > { %9794 = vmatmul.mubr.msk.bf16.gmra.mrb[28].mxu1 %vm4839_vm8, %v13277_v0 }
 0x648   : > { %9799 = vmatprep.mubr.msk.bf16.mxu1 %vm4839_vm8, %v13145_v24  ;;  %v6262_v24 = vld [vmem:[#allocation2 + $0x180] sm:$0xff] }
 0x649   : > { %v13316_v39 = vpack.c.bf16 %v6263_v37, %v6262_v24 }
 0x64f   : > { %9800 = vmatmul.mubr.msk.bf16.vlgmr.msra.gmra.mrb[0].mxu1 %vm4839_vm8, %v13149_v5 }
 0x650   : > { %9832 = vmatpush3.bf16.msra.mxu1 %v6625_v55  ;;  %9803 = vmatprep.mubr.msk.bf16.mxu1 %vm4839_vm8, %v13162_v7 }
 0x651   : > { %10527 = vmatprep.subr.msk.bf16.mxu1 %vm5561_vm10, %v9012_v20 }
 0x657   : > { %9804 = vmatmul.mubr.msk.bf16.gmra.mrb[4].mxu1 %vm4839_vm8, %v13164_v26 }
 0x658   : > { %9807 = vmatprep.mubr.msk.bf16.mxu1 %vm4839_vm8, %v13170_v14 }
 0x65f   : > { %9808 = vmatmul.mubr.msk.bf16.gmra.mrb[8].mxu1 %vm4839_vm8, %v13172_v45 }
 0x660   : > { %9811 = vmatprep.mubr.msk.bf16.mxu1 %vm4839_vm8, %v13178_v33 }
 0x667   : > { %9812 = vmatmul.mubr.msk.bf16.gmra.mrb[12].mxu1 %vm4839_vm8, %v13180_v44 }
 0x668   : > { %9815 = vmatprep.mubr.msk.bf16.mxu1 %vm4839_vm8, %v13186_v40 }
 0x66f   : > { %9816 = vmatmul.mubr.msk.bf16.gmra.mrb[16].mxu1 %vm4839_vm8, %v13188_v42 }
 0x670   : > { %9819 = vmatprep.mubr.msk.bf16.mxu1 %vm4839_vm8, %v13194_v61 }
 0x677   : > { %9820 = vmatmul.mubr.msk.bf16.gmra.mrb[20].mxu1 %vm4839_vm8, %v13196_v59 }
 0x678   : > { %9823 = vmatprep.mubr.msk.bf16.mxu1 %vm4839_vm8, %v13202_v57 }
 0x67f   : > { %9824 = vmatmul.mubr.msk.bf16.gmra.mrb[24].mxu1 %vm4839_vm8, %v13204_v36 }
 0x680   : > { %9827 = vmatprep.mubr.msk.bf16.mxu1 %vm4839_vm8, %v13210_v18 }
 0x687   : > { %9828 = vmatmul.mubr.msk.bf16.gmra.mrb[28].mxu1 %vm4839_vm8, %v13316_v39 }
 0x688   : > { %9833 = vmatprep.mubr.msk.bf16.mxu1 %vm4839_vm8, %v13032_v62  ;;  %v6556_v62 = vld [vmem:[#allocation2 + $0x181] sm:$0xff] }
 0x689   : > { %v13355_v60 = vpack.c.bf16 %v6557_v34, %v6556_v62 }
 0x68f   : > { %9834 = vmatmul.mubr.msk.bf16.vlgmr.msra.gmra.mrb[0].mxu1 %vm4839_vm8, %v13046_v43 }
 0x690   : > { %9866 = vmatpush3.bf16.msra.mxu1 %v6919_v13  ;;  %9837 = vmatprep.mubr.msk.bf16.mxu1 %vm4839_vm8, %v13068_v12 }
 0x691   : > { %10528 = vmatprep.subr.msk.bf16.mxu1 %vm5561_vm10, %v9029_v54 }
 0x697   : > { %9838 = vmatmul.mubr.msk.bf16.gmra.mrb[4].mxu1 %vm4839_vm8, %v13072_v32 }
 0x698   : > { %9841 = vmatprep.mubr.msk.bf16.mxu1 %vm4839_vm8, %v13092_v23 }
 0x69f   : > { %9842 = vmatmul.mubr.msk.bf16.gmra.mrb[8].mxu1 %vm4839_vm8, %v13096_v50 }
 0x6a0   : > { %9845 = vmatprep.mubr.msk.bf16.mxu1 %vm4839_vm8, %v13108_v11 }
 0x6a7   : > { %9846 = vmatmul.mubr.msk.bf16.gmra.mrb[12].mxu1 %vm4839_vm8, %v13110_v31 }
 0x6a8   : > { %9849 = vmatprep.mubr.msk.bf16.mxu1 %vm4839_vm8, %v13116_v22 }
 0x6af   : > { %9850 = vmatmul.mubr.msk.bf16.gmra.mrb[16].mxu1 %vm4839_vm8, %v13118_v56 }
 0x6b0   : > { %9853 = vmatprep.mubr.msk.bf16.mxu1 %vm4839_vm8, %v13124_v3 }
 0x6b7   : > { %9854 = vmatmul.mubr.msk.bf16.gmra.mrb[20].mxu1 %vm4839_vm8, %v13126_v9 }
 0x6b8   : > { %9857 = vmatprep.mubr.msk.bf16.mxu1 %vm4839_vm8, %v13132_v4 }
 0x6bf   : > { %9858 = vmatmul.mubr.msk.bf16.gmra.mrb[24].mxu1 %vm4839_vm8, %v13134_v6 }
 0x6c0   : > { %9861 = vmatprep.mubr.msk.bf16.mxu1 %vm4839_vm8, %v13140_v63 }
 0x6c7   : > { %9862 = vmatmul.mubr.msk.bf16.gmra.mrb[28].mxu1 %vm4839_vm8, %v13355_v60 }
 0x6c8   : > { %9867 = vmatprep.mubr.msk.bf16.mxu1 %vm4839_vm8, %v13215_v17  ;;  %v6850_v17 = vld [vmem:[#allocation2 + $0x182] sm:$0xff] }
 0x6c9   : > { %v6867_v38 = vpack.c.bf16 %v6851_v58, %v6850_v17 }
 0x6cf   : > { %9868 = vmatmul.mubr.msk.bf16.vlgmr.msra.gmra.mrb[0].mxu1 %vm4839_vm8, %v13219_v8 }
 0x6d0   : > { %9900 = vmatpush3.bf16.msra.mxu1 %v7214_v16  ;;  %9871 = vmatprep.mubr.msk.bf16.mxu1 %vm4839_vm8, %v13229_v15 }
 0x6d1   : > { %10529 = vmatprep.subr.msk.bf16.mxu1 %vm5561_vm10, %v9046_v30 }
 0x6d7   : > { %9872 = vmatmul.mubr.msk.bf16.gmra.mrb[4].mxu1 %vm4839_vm8, %v13231_v48 }
 0x6d8   : > { %9875 = vmatprep.mubr.msk.bf16.mxu1 %vm4839_vm8, %v13237_v51 }
 0x6df   : > { %9876 = vmatmul.mubr.msk.bf16.gmra.mrb[8].mxu1 %vm4839_vm8, %v13239_v35 }
 0x6e0   : > { %9879 = vmatprep.mubr.msk.bf16.mxu1 %vm4839_vm8, %v13245_v2 }
 0x6e7   : > { %9880 = vmatmul.mubr.msk.bf16.gmra.mrb[12].mxu1 %vm4839_vm8, %v13247_v49 }
 0x6e8   : > { %9883 = vmatprep.mubr.msk.bf16.mxu1 %vm4839_vm8, %v13253_v27 }
 0x6ef   : > { %9884 = vmatmul.mubr.msk.bf16.gmra.mrb[16].mxu1 %vm4839_vm8, %v13255_v29 }
 0x6f0   : > { %9887 = vmatprep.mubr.msk.bf16.mxu1 %vm4839_vm8, %v13261_v10 }
 0x6f7   : > { %9888 = vmatmul.mubr.msk.bf16.gmra.mrb[20].mxu1 %vm4839_vm8, %v13263_v21 }
 0x6f8   : > { %9891 = vmatprep.mubr.msk.bf16.mxu1 %vm4839_vm8, %v13269_v25 }
 0x6ff   : > { %9892 = vmatmul.mubr.msk.bf16.gmra.mrb[24].mxu1 %vm4839_vm8, %v13271_v41 }
 0x700   : > { %9895 = vmatprep.mubr.msk.bf16.mxu1 %vm4839_vm8, %v13277_v0 }
 0x707   : > { %9896 = vmatmul.mubr.msk.bf16.gmra.mrb[28].mxu1 %vm4839_vm8, %v6867_v38 }
 0x708   : > { %9901 = vmatprep.mubr.msk.bf16.mxu1 %vm4839_vm8, %v13149_v5  ;;  %v7145_v5 = vld [vmem:[#allocation2 + $0x198] sm:$0xff] }
 0x70f   : > { %9902 = vmatmul.mubr.msk.bf16.vlgmr.msra.gmra.mrb[0].mxu1 %vm4839_vm8, %v13162_v7  ;;  %v7146_v7 = vld [vmem:[#allocation2 + $0x1a0] sm:$0xff] }
 0x710   : > { %9934 = vmatpush3.bf16.msra.mxu1 %v7508_v28  ;;  %9905 = vmatprep.mubr.msk.bf16.mxu1 %vm4839_vm8, %v13164_v26  ;;  %v7162_v26 = vpack.c.bf16 %v7146_v7, %v7145_v5 }
 0x711   : > { %10530 = vmatprep.subr.msk.bf16.mxu1 %vm5561_vm10, %v9063_v53 }
 0x717   : > { %9906 = vmatmul.mubr.msk.bf16.gmra.mrb[4].mxu1 %vm4839_vm8, %v13170_v14  ;;  %v7802_v14 = vsel %vm5561_vm10, %v9063_v53, 0 }
 0x718   : > { %9909 = vmatprep.mubr.msk.bf16.mxu1 %vm4839_vm8, %v13172_v45 }
 0x71f   : > { %9910 = vmatmul.mubr.msk.bf16.gmra.mrb[8].mxu1 %vm4839_vm8, %v13178_v33 }
 0x720   : > { %9913 = vmatprep.mubr.msk.bf16.mxu1 %vm4839_vm8, %v13180_v44 }
 0x727   : > { %9914 = vmatmul.mubr.msk.bf16.gmra.mrb[12].mxu1 %vm4839_vm8, %v13186_v40 }
 0x728   : > { %9917 = vmatprep.mubr.msk.bf16.mxu1 %vm4839_vm8, %v13188_v42 }
 0x72f   : > { %9918 = vmatmul.mubr.msk.bf16.gmra.mrb[16].mxu1 %vm4839_vm8, %v13194_v61 }
 0x730   : > { %9921 = vmatprep.mubr.msk.bf16.mxu1 %vm4839_vm8, %v13196_v59 }
 0x737   : > { %9922 = vmatmul.mubr.msk.bf16.gmra.mrb[20].mxu1 %vm4839_vm8, %v13202_v57 }
 0x738   : > { %9925 = vmatprep.mubr.msk.bf16.mxu1 %vm4839_vm8, %v13204_v36 }
 0x73f   : > { %9926 = vmatmul.mubr.msk.bf16.gmra.mrb[24].mxu1 %vm4839_vm8, %v13210_v18 }
 0x740   : > { %9929 = vmatprep.mubr.msk.bf16.mxu1 %vm4839_vm8, %v13316_v39 }
 0x747   : > { %9930 = vmatmul.mubr.msk.bf16.gmra.mrb[28].mxu1 %vm4839_vm8, %v7162_v26 }
 0x748   : > { %9935 = vmatprep.mubr.msk.bf16.mxu1 %vm4839_vm8, %v13046_v43  ;;  %v7439_v43 = vld [vmem:[#allocation2 + $0x199] sm:$0xff] }
 0x74f   : > { %9936 = vmatmul.mubr.msk.bf16.vlgmr.msra.gmra.mrb[0].mxu1 %vm4839_vm8, %v13068_v12  ;;  %v7440_v12 = vld [vmem:[#allocation2 + $0x1a1] sm:$0xff] }
 0x750   : > { %9968 = vmatpush3.bf16.msra.mxu1 %v7802_v14  ;;  %9939 = vmatprep.mubr.msk.bf16.mxu1 %vm4839_vm8, %v13072_v32  ;;  %v7456_v32 = vpack.c.bf16 %v7440_v12, %v7439_v43 }
 0x757   : > { %9940 = vmatmul.mubr.msk.bf16.gmra.mrb[4].mxu1 %vm4839_vm8, %v13092_v23  ;;  %v7733_v23 = vld [vmem:[#allocation2 + $0x19a] sm:$0xff] }
 0x758   : > { %9943 = vmatprep.mubr.msk.bf16.mxu1 %vm4839_vm8, %v13096_v50  ;;  %v7734_v50 = vld [vmem:[#allocation2 + $0x1a2] sm:$0xff] }
 0x75f   : > { %9944 = vmatmul.mubr.msk.bf16.gmra.mrb[8].mxu1 %vm4839_vm8, %v13108_v11  ;;  %v7750_v11 = vpack.c.bf16 %v7734_v50, %v7733_v23 }
 0x760   : > { %9947 = vmatprep.mubr.msk.bf16.mxu1 %vm4839_vm8, %v13110_v31 }
 0x767   : > { %9948 = vmatmul.mubr.msk.bf16.gmra.mrb[12].mxu1 %vm4839_vm8, %v13116_v22 }
 0x768   : > { %9951 = vmatprep.mubr.msk.bf16.mxu1 %vm4839_vm8, %v13118_v56 }
 0x76f   : > { %9952 = vmatmul.mubr.msk.bf16.gmra.mrb[16].mxu1 %vm4839_vm8, %v13124_v3 }
 0x770   : > { %9955 = vmatprep.mubr.msk.bf16.mxu1 %vm4839_vm8, %v13126_v9 }
 0x777   : > { %9956 = vmatmul.mubr.msk.bf16.gmra.mrb[20].mxu1 %vm4839_vm8, %v13132_v4 }
 0x778   : > { %9959 = vmatprep.mubr.msk.bf16.mxu1 %vm4839_vm8, %v13134_v6 }
 0x77f   : > { %9960 = vmatmul.mubr.msk.bf16.gmra.mrb[24].mxu1 %vm4839_vm8, %v13140_v63 }
 0x780   : > { %9963 = vmatprep.mubr.msk.bf16.mxu1 %vm4839_vm8, %v13355_v60 }
 0x787   : > { %9964 = vmatmul.mubr.msk.bf16.gmra.mrb[28].mxu1 %vm4839_vm8, %v7456_v32 }
 0x788   : > { %9969 = vmatprep.mubr.msk.bf16.mxu1 %vm4839_vm8, %v13219_v8 }
 0x78f   : > { %9970 = vmatmul.mubr.msk.bf16.vlgmr.msra.gmra.mrb[0].mxu1 %vm4839_vm8, %v13229_v15 }
 0x790   : > { %9973 = vmatprep.mubr.msk.bf16.mxu1 %vm4839_vm8, %v13231_v48 }
 0x797   : > { %9974 = vmatmul.mubr.msk.bf16.gmra.mrb[4].mxu1 %vm4839_vm8, %v13237_v51 }
 0x798   : > { %9977 = vmatprep.mubr.msk.bf16.mxu1 %vm4839_vm8, %v13239_v35 }
 0x79f   : > { %9978 = vmatmul.mubr.msk.bf16.gmra.mrb[8].mxu1 %vm4839_vm8, %v13245_v2 }
 0x7a0   : > { %9981 = vmatprep.mubr.msk.bf16.mxu1 %vm4839_vm8, %v13247_v49 }
 0x7a7   : > { %9982 = vmatmul.mubr.msk.bf16.gmra.mrb[12].mxu1 %vm4839_vm8, %v13253_v27 }
 0x7a8   : > { %9985 = vmatprep.mubr.msk.bf16.mxu1 %vm4839_vm8, %v13255_v29 }
 0x7af   : > { %9986 = vmatmul.mubr.msk.bf16.gmra.mrb[16].mxu1 %vm4839_vm8, %v13261_v10 }
 0x7b0   : > { %9989 = vmatprep.mubr.msk.bf16.mxu1 %vm4839_vm8, %v13263_v21 }
 0x7b7   : > { %9990 = vmatmul.mubr.msk.bf16.gmra.mrb[20].mxu1 %vm4839_vm8, %v13269_v25 }
 0x7b8   : > { %9993 = vmatprep.mubr.msk.bf16.mxu1 %vm4839_vm8, %v13271_v41 }
 0x7bf   : > { %9994 = vmatmul.mubr.msk.bf16.gmra.mrb[24].mxu1 %vm4839_vm8, %v13277_v0 }
 0x7c0   : > { %9997 = vmatprep.mubr.msk.bf16.mxu1 %vm4839_vm8, %v6867_v38 }
 0x7c7   : > { %9998 = vmatmul.mubr.msk.bf16.gmra.mrb[28].mxu1 %vm4839_vm8, %v7750_v11 }
 0x862   : > { %v13493_v31 = vpop.f32.mrb[0].mxu1 }
 0x863   : > { %v13495_v22 = vpop.f32.mrb[1].mxu1  ;;  %v8000_v63 = vsel %vm4839_vm8, %v13493_v31, 0.0 }
 0x864   : > { %v13497_v56 = vpop.f32.mrb[2].mxu1  ;;  %v7997_v9 = vsel %vm4839_vm8, %v13495_v22, 0.0 }
 0x865   : > { %v13499_v3 = vpop.f32.mrb[3].mxu1  ;;  %v8002_v33 = vsel %vm4839_vm8, %v13497_v56, 0.0 }
 0x866   : > { %v7998_v4 = vsel %vm4839_vm8, %v13499_v3, 0.0 }
 0x867   : > { %v7999_v6 = vadd.f32 %v7998_v4, %v7997_v9 }
 0x869   : > { %v8001_v45 = vadd.f32 %v8000_v63, %v7999_v6 }
 0x86a   : > { %v13509_v44 = vpop.f32.mrb[4].mxu1 }
 0x86b   : > { %v13511_v40 = vpop.f32.mrb[5].mxu1  ;;  %v8003_v42 = vadd.f32 %v8002_v33, %v8001_v45  ;;  %v8008_v15 = vsel %vm4839_vm8, %v13509_v44, 0.0 }
 0x86c   : > { %v8004_v61 = vsel %vm4839_vm8, %v13511_v40, 0.0  ;;  %v13515_v59 = vpop.f32.mrb[6].mxu1 }
 0x86d   : > { %v8005_v57 = vadd.f32 %v8004_v61, %v8003_v42  ;;  %v13517_v36 = vpop.f32.mrb[7].mxu1  ;;  %v8010_v51 = vsel %vm4839_vm8, %v13515_v59, 0.0 }
 0x86e   : > { %v8006_v18 = vsel %vm4839_vm8, %v13517_v36, 0.0 }
 0x86f   : > { %v8007_v8 = vadd.f32 %v8006_v18, %v8005_v57 }
 0x871   : > { %v8009_v48 = vadd.f32 %v8008_v15, %v8007_v8 }
 0x872   : > { %v13525_v35 = vpop.f32.mrb[8].mxu1 }
 0x873   : > { %v13527_v2 = vpop.f32.mrb[9].mxu1  ;;  %v8011_v49 = vadd.f32 %v8010_v51, %v8009_v48  ;;  %v8016_v52 = vsel %vm4839_vm8, %v13525_v35, 0.0 }
 0x874   : > { %v8012_v27 = vsel %vm4839_vm8, %v13527_v2, 0.0  ;;  %v13531_v29 = vpop.f32.mrb[10].mxu1 }
 0x875   : > { %v8013_v10 = vadd.f32 %v8012_v27, %v8011_v49  ;;  %v13533_v21 = vpop.f32.mrb[11].mxu1  ;;  %v8018_v41 = vsel %vm4839_vm8, %v13531_v29, 0.0 }
 0x876   : > { %v8014_v19 = vsel %vm4839_vm8, %v13533_v21, 0.0 }
 0x877   : > { %v8015_v46 = vadd.f32 %v8014_v19, %v8013_v10 }
 0x879   : > { %v8017_v25 = vadd.f32 %v8016_v52, %v8015_v46 }
 0x87a   : > { %v13541_v47 = vpop.f32.mrb[12].mxu1 }
 0x87b   : > { %v13543_v1 = vpop.f32.mrb[13].mxu1  ;;  %v8019_v0 = vadd.f32 %v8018_v41, %v8017_v25  ;;  %v8024_v54 = vsel %vm4839_vm8, %v13541_v47, 0.0 }
 0x87c   : > { %v8020_v55 = vsel %vm4839_vm8, %v13543_v1, 0.0  ;;  %v13547_v20 = vpop.f32.mrb[14].mxu1 }
 0x87d   : > { %v8021_v24 = vadd.f32 %v8020_v55, %v8019_v0  ;;  %v13549_v37 = vpop.f32.mrb[15].mxu1  ;;  %v8026_v34 = vsel %vm4839_vm8, %v13547_v20, 0.0 }
 0x87e   : > { %v8022_v39 = vsel %vm4839_vm8, %v13549_v37, 0.0 }
 0x87f   : > { %v8023_v13 = vadd.f32 %v8022_v39, %v8021_v24 }
 0x881   : > { %v8025_v62 = vadd.f32 %v8024_v54, %v8023_v13 }
 0x882   : > { %v13557_v60 = vpop.f32.mrb[16].mxu1 }
 0x883   : > { %v13559_v16 = vpop.f32.mrb[17].mxu1  ;;  %v8027_v30 = vadd.f32 %v8026_v34, %v8025_v62  ;;  %v8032_v7 = vsel %vm4839_vm8, %v13557_v60, 0.0 }
 0x884   : > { %v8028_v17 = vsel %vm4839_vm8, %v13559_v16, 0.0  ;;  %v13563_v58 = vpop.f32.mrb[18].mxu1 }
 0x885   : > { %v8029_v38 = vadd.f32 %v8028_v17, %v8027_v30  ;;  %v13565_v28 = vpop.f32.mrb[19].mxu1  ;;  %v8034_v14 = vsel %vm4839_vm8, %v13563_v58, 0.0 }
 0x886   : > { %v8030_v53 = vsel %vm4839_vm8, %v13565_v28, 0.0 }
 0x887   : > { %v8031_v5 = vadd.f32 %v8030_v53, %v8029_v38 }
 0x889   : > { %v8033_v26 = vadd.f32 %v8032_v7, %v8031_v5 }
 0x88a   : > { %v13573_v43 = vpop.f32.mrb[20].mxu1 }
 0x88b   : > { %v13575_v12 = vpop.f32.mrb[21].mxu1  ;;  %v8035_v32 = vadd.f32 %v8034_v14, %v8033_v26  ;;  %v8040_v63 = vsel %vm4839_vm8, %v13573_v43, 0.0 }
 0x88c   : > { %v8036_v23 = vsel %vm4839_vm8, %v13575_v12, 0.0  ;;  %v13579_v50 = vpop.f32.mrb[22].mxu1 }
 0x88d   : > { %v8037_v11 = vadd.f32 %v8036_v23, %v8035_v32  ;;  %v13581_v9 = vpop.f32.mrb[23].mxu1  ;;  %v8042_v33 = vsel %vm4839_vm8, %v13579_v50, 0.0 }
 0x88e   : > { %v8038_v4 = vsel %vm4839_vm8, %v13581_v9, 0.0 }
 0x88f   : > { %v8039_v6 = vadd.f32 %v8038_v4, %v8037_v11 }
 0x891   : > { %v8041_v45 = vadd.f32 %v8040_v63, %v8039_v6 }
 0x892   : > { %v13589_v42 = vpop.f32.mrb[24].mxu1 }
 0x893   : > { %v13591_v61 = vpop.f32.mrb[25].mxu1  ;;  %v8043_v57 = vadd.f32 %v8042_v33, %v8041_v45  ;;  %v8048_v27 = vsel %vm4839_vm8, %v13589_v42, 0.0 }
 0x894   : > { %v8044_v18 = vsel %vm4839_vm8, %v13591_v61, 0.0  ;;  %v13595_v8 = vpop.f32.mrb[26].mxu1 }
 0x895   : > { %v8045_v15 = vadd.f32 %v8044_v18, %v8043_v57  ;;  %v13597_v48 = vpop.f32.mrb[27].mxu1  ;;  %v8050_v19 = vsel %vm4839_vm8, %v13595_v8, 0.0 }
 0x896   : > { %v8046_v51 = vsel %vm4839_vm8, %v13597_v48, 0.0 }
 0x897   : > { %v8047_v49 = vadd.f32 %v8046_v51, %v8045_v15 }
 0x899   : > { %v8049_v10 = vadd.f32 %v8048_v27, %v8047_v49 }
 0x89a   : > { %v13605_v46 = vpop.f32.mrb[28].mxu1 }
 0x89b   : > { %v13607_v52 = vpop.f32.mrb[29].mxu1  ;;  %v8051_v25 = vadd.f32 %v8050_v19, %v8049_v10  ;;  %v8056_v54 = vsel %vm4839_vm8, %v13605_v46, 0.0 }
 0x89c   : > { %v8052_v41 = vsel %vm4839_vm8, %v13607_v52, 0.0  ;;  %v13611_v0 = vpop.f32.mrb[30].mxu1 }
 0x89d   : > { %v8053_v55 = vadd.f32 %v8052_v41, %v8051_v25  ;;  %v13613_v24 = vpop.f32.mrb[31].mxu1  ;;  %v8058_v34 = vsel %vm4839_vm8, %v13611_v0, 0.0 }
 0x89e   : > { %v8054_v39 = vsel %vm4839_vm8, %v13613_v24, 0.0 }
 0x89f   : > { %v8055_v13 = vadd.f32 %v8054_v39, %v8053_v55 }
 0x8a1   : > { %v8057_v62 = vadd.f32 %v8056_v54, %v8055_v13 }
 0x8a3   : > { %v8059_v30 = vadd.f32 %v8058_v34, %v8057_v62 }
 0x8a5   : > { %8060 = vadd.xlane.f32.xlu1 %v8059_v30 }
 0x932   : > { %v8061_v17 = vpop.xlane.xlu1 %8060 }
 0x933   : > { %v8062_v38 = vrot.slane %v8061_v17, 4 }
 0x935   : > { %v8063_v53 = vadd.f32 %v8062_v38, %v8061_v17 }
 0x937   : > { %v8064_v5 = vrot.slane %v8063_v53, 2 }
 0x939   : > { %v8065_v7 = vadd.f32 %v8064_v5, %v8063_v53 }
 0x93b   : > { %v8066_v26 = vrot.slane %v8065_v7, 1 }
 0x93d   : > { %v8067_v14 = vadd.f32 %v8066_v26, %v8065_v7 }
 0x93f   : > { %10538 = vpush %v8067_v14 }
 0x970   : > { %s10539_s11 = spop %10538 }
 0x971   : > { %s8069_s12 = smul.f32 0.00048828125, %s10539_s11 }
 0x973   : > { %v13621_v32 = vstv %s8069_s12 }
 0x974   : > { %v13625_v23 = vsub.f32 %v13495_v22, %v13621_v32  ;;  %v13629_v11 = vsub.f32 %v13499_v3, %v13621_v32  ;;  %v13633_v4 = vsub.f32 %v13493_v31, %v13621_v32  ;;  %v13637_v6 = vsub.f32 %v13497_v56, %v13621_v32 }
 0x975   : > { %v13645_v22 = vsub.f32 %v13511_v40, %v13621_v32  ;;  %v13651_v31 = vsub.f32 %v13517_v36, %v13621_v32  ;;  %v13659_v15 = vsub.f32 %v13509_v44, %v13621_v32  ;;  %v13666_v36 = vsub.f32 %v13515_v59, %v13621_v32 }
 0x976   : > { %v8103_v63 = vmul.f32 %v13625_v23, %v13625_v23  ;;  %v8104_v45 = vmul.f32 %v13629_v11, %v13629_v11  ;;  %v8105_v3 = vmul.f32 %v13633_v4, %v13633_v4  ;;  %v8106_v56 = vmul.f32 %v13637_v6, %v13637_v6 }
 0x977   : > { %v8107_v40 = vmul.f32 %v13645_v22, %v13645_v22  ;;  %v8108_v27 = vmul.f32 %v13651_v31, %v13651_v31  ;;  %v13673_v44 = vsub.f32 %v13527_v2, %v13621_v32  ;;  %v8109_v25 = vmul.f32 %v13659_v15, %v13659_v15 }
 0x978   : > { %v8135_v33 = vsel %vm4839_vm8, %v8103_v63, 0.0  ;;  %v8136_v57 = vsel %vm4839_vm8, %v8104_v45, 0.0  ;;  %v8138_v51 = vsel %vm4839_vm8, %v8105_v3, 0.0  ;;  %v8140_v10 = vsel %vm4839_vm8, %v8106_v56, 0.0 }
 0x979   : > { %v8137_v18 = vadd.f32 %v8136_v57, %v8135_v33  ;;  %v8142_v41 = vsel %vm4839_vm8, %v8107_v40, 0.0  ;;  %v13680_v59 = vsub.f32 %v13533_v21, %v13621_v32  ;;  %v8110_v39 = vmul.f32 %v13666_v36, %v13666_v36 }
 0x97a   : > { %v8144_v13 = vsel %vm4839_vm8, %v8108_v27, 0.0  ;;  %v13687_v2 = vsub.f32 %v13525_v35, %v13621_v32  ;;  %v8111_v62 = vmul.f32 %v13673_v44, %v13673_v44  ;;  %v8146_v34 = vsel %vm4839_vm8, %v8109_v25, 0.0 }
 0x97b   : > { %v8139_v49 = vadd.f32 %v8138_v51, %v8137_v18  ;;  %v13694_v21 = vsub.f32 %v13531_v29, %v13621_v32  ;;  %v8112_v17 = vmul.f32 %v13680_v59, %v13680_v59  ;;  %v8148_v38 = vsel %vm4839_vm8, %v8110_v39, 0.0 }
 0x97c   : > { %v13701_v35 = vsub.f32 %v13543_v1, %v13621_v32  ;;  %v8113_v5 = vmul.f32 %v13687_v2, %v13687_v2  ;;  %v8150_v7 = vsel %vm4839_vm8, %v8111_v62, 0.0  ;;  %v13708_v29 = vsub.f32 %v13549_v37, %v13621_v32 }
 0x97d   : > { %v8141_v19 = vadd.f32 %v8140_v10, %v8139_v49  ;;  %v8114_v14 = vmul.f32 %v13694_v21, %v13694_v21  ;;  %v8152_v63 = vsel %vm4839_vm8, %v8112_v17, 0.0  ;;  %v13715_v1 = vsub.f32 %v13541_v47, %v13621_v32 }
 0x97e   : > { %v8115_v3 = vmul.f32 %v13701_v35, %v13701_v35  ;;  %v8154_v56 = vsel %vm4839_vm8, %v8113_v5, 0.0  ;;  %v13722_v37 = vsub.f32 %v13547_v20, %v13621_v32  ;;  %v8116_v57 = vmul.f32 %v13708_v29, %v13708_v29 }
 0x97f   : > { %v8143_v55 = vadd.f32 %v8142_v41, %v8141_v19  ;;  %v8156_v18 = vsel %vm4839_vm8, %v8114_v14, 0.0  ;;  %v13729_v47 = vsub.f32 %v13559_v16, %v13621_v32  ;;  %v8117_v51 = vmul.f32 %v13715_v1, %v13715_v1 }
 0x980   : > { %v8158_v49 = vsel %vm4839_vm8, %v8115_v3, 0.0  ;;  %v13736_v20 = vsub.f32 %v13565_v28, %v13621_v32  ;;  %v8118_v10 = vmul.f32 %v13722_v37, %v13722_v37  ;;  %v8160_v19 = vsel %vm4839_vm8, %v8116_v57, 0.0 }
 0x981   : > { %v8145_v54 = vadd.f32 %v8144_v13, %v8143_v55  ;;  %v13743_v16 = vsub.f32 %v13557_v60, %v13621_v32  ;;  %v8119_v41 = vmul.f32 %v13729_v47, %v13729_v47  ;;  %v8162_v55 = vsel %vm4839_vm8, %v8117_v51, 0.0 }
 0x982   : > { %v13750_v28 = vsub.f32 %v13563_v58, %v13621_v32  ;;  %v8120_v13 = vmul.f32 %v13736_v20, %v13736_v20  ;;  %v13757_v60 = vsub.f32 %v13575_v12, %v13621_v32  ;;  %v13764_v58 = vsub.f32 %v13581_v9, %v13621_v32 }
 0x983   : > { %v8147_v30 = vadd.f32 %v8146_v34, %v8145_v54  ;;  %v8164_v54 = vsel %vm4839_vm8, %v8118_v10, 0.0  ;;  %v8121_v34 = vmul.f32 %v13743_v16, %v13743_v16  ;;  %v13771_v12 = vsub.f32 %v13573_v43, %v13621_v32 }
 0x984   : > { %v13778_v9 = vsub.f32 %v13579_v50, %v13621_v32  ;;  %v13785_v43 = vsub.f32 %v13591_v61, %v13621_v32  ;;  %v13792_v50 = vsub.f32 %v13597_v48, %v13621_v32  ;;  %v13799_v61 = vsub.f32 %v13589_v42, %v13621_v32 }
 0x985   : > { %v8149_v53 = vadd.f32 %v8148_v38, %v8147_v30  ;;  %v8166_v30 = vsel %vm4839_vm8, %v8119_v41, 0.0  ;;  %v8122_v38 = vmul.f32 %v13750_v28, %v13750_v28  ;;  %v13806_v48 = vsub.f32 %v13595_v8, %v13621_v32 }
 0x986   : > { %v13813_v42 = vsub.f32 %v13607_v52, %v13621_v32  ;;  %v13820_v8 = vsub.f32 %v13613_v24, %v13621_v32  ;;  %v13827_v52 = vsub.f32 %v13605_v46, %v13621_v32  ;;  %v13834_v24 = vsub.f32 %v13611_v0, %v13621_v32 }
 0x987   : > { %v8151_v26 = vadd.f32 %v8150_v7, %v8149_v53  ;;  %v8168_v53 = vsel %vm4839_vm8, %v8120_v13, 0.0  ;;  %v8123_v7 = vmul.f32 %v13757_v60, %v13757_v60 }
 0x988   : > { %v8133_v46 = vmul.f32 %v13827_v52, %v13827_v52 }
 0x989   : > { %v8153_v45 = vadd.f32 %v8152_v63, %v8151_v26  ;;  %v8170_v26 = vsel %vm4839_vm8, %v8121_v34, 0.0  ;;  %v8124_v63 = vmul.f32 %v13764_v58, %v13764_v58 }
 0x98a   : > { %v8194_v0 = vsel %vm4839_vm8, %v8133_v46, 0.0 }
 0x98b   : > { %v8155_v33 = vadd.f32 %v8154_v56, %v8153_v45  ;;  %v8172_v45 = vsel %vm4839_vm8, %v8122_v38, 0.0  ;;  %v8125_v56 = vmul.f32 %v13771_v12, %v13771_v12 }
 0x98d   : > { %v8157_v40 = vadd.f32 %v8156_v18, %v8155_v33  ;;  %v8174_v33 = vsel %vm4839_vm8, %v8123_v7, 0.0  ;;  %v8126_v18 = vmul.f32 %v13778_v9, %v13778_v9 }
 0x98f   : > { %v8159_v27 = vadd.f32 %v8158_v49, %v8157_v40  ;;  %v8176_v40 = vsel %vm4839_vm8, %v8124_v63, 0.0  ;;  %v8127_v49 = vmul.f32 %v13785_v43, %v13785_v43  ;;  %v8134_v63 = vmul.f32 %v13834_v24, %v13834_v24 }
 0x991   : > { %v8161_v25 = vadd.f32 %v8160_v19, %v8159_v27  ;;  %v8178_v27 = vsel %vm4839_vm8, %v8125_v56, 0.0  ;;  %v8128_v19 = vmul.f32 %v13792_v50, %v13792_v50  ;;  %v8196_v56 = vsel %vm4839_vm8, %v8134_v63, 0.0 }
 0x993   : > { %v8163_v39 = vadd.f32 %v8162_v55, %v8161_v25  ;;  %v8180_v25 = vsel %vm4839_vm8, %v8126_v18, 0.0  ;;  %v8129_v55 = vmul.f32 %v13799_v61, %v13799_v61  ;;  %v10685_v18 = vmov 0  }
 0x994   : > { %10554 = vset.pattern.permute.xlu1 %v10685_v18 }
 0x995   : > { %v8165_v62 = vadd.f32 %v8164_v54, %v8163_v39  ;;  %v8182_v39 = vsel %vm4839_vm8, %v8127_v49, 0.0  ;;  %v8130_v54 = vmul.f32 %v13806_v48, %v13806_v48 }
 0x997   : > { %v8167_v17 = vadd.f32 %v8166_v30, %v8165_v62  ;;  %v8184_v62 = vsel %vm4839_vm8, %v8128_v19, 0.0  ;;  %v8131_v30 = vmul.f32 %v13813_v42, %v13813_v42 }
 0x999   : > { %v8169_v5 = vadd.f32 %v8168_v53, %v8167_v17  ;;  %v8186_v17 = vsel %vm4839_vm8, %v8129_v55, 0.0  ;;  %v8132_v53 = vmul.f32 %v13820_v8, %v13820_v8 }
 0x99b   : > { %v8171_v14 = vadd.f32 %v8170_v26, %v8169_v5  ;;  %v8188_v5 = vsel %vm4839_vm8, %v8130_v54, 0.0  ;;  %v8190_v26 = vsel %vm4839_vm8, %v8131_v30, 0.0 }
 0x99d   : > { %v8173_v3 = vadd.f32 %v8172_v45, %v8171_v14  ;;  %v8192_v45 = vsel %vm4839_vm8, %v8132_v53, 0.0 }
 0x99f   : > { %v8175_v57 = vadd.f32 %v8174_v33, %v8173_v3 }
 0x9a1   : > { %v8177_v51 = vadd.f32 %v8176_v40, %v8175_v57  ;;  %v8309_v57 = vld [vmem:[%s13933_s5] sm:$0xff] }
 0x9a2   : > { %v8317_v40 = vld [vmem:[%s13934_s6] sm:$0xff] }
 0x9a3   : > { %v8179_v10 = vadd.f32 %v8178_v27, %v8177_v51 }
 0x9a5   : > { %v8181_v41 = vadd.f32 %v8180_v25, %v8179_v10 }
 0x9a7   : > { %v8183_v13 = vadd.f32 %v8182_v39, %v8181_v41 }
 0x9a9   : > { %v8185_v34 = vadd.f32 %v8184_v62, %v8183_v13 }
 0x9ab   : > { %v8187_v38 = vadd.f32 %v8186_v17, %v8185_v34 }
 0x9ad   : > { %v8189_v7 = vadd.f32 %v8188_v5, %v8187_v38 }
 0x9af   : > { %v8191_v14 = vadd.f32 %v8190_v26, %v8189_v7 }
 0x9b1   : > { %v8193_v3 = vadd.f32 %v8192_v45, %v8191_v14 }
 0x9b3   : > { %v8195_v32 = vadd.f32 %v8194_v0, %v8193_v3 }
 0x9b5   : > { %v8197_v33 = vadd.f32 %v8196_v56, %v8195_v32 }
 0x9b7   : > { %8198 = vadd.xlane.f32.xlu1 %v8197_v33 }
 0x9c8   : > { %8312 = vperm.xlu1 %10554, %v8309_v57  }
 0x9cc   : > { %8320 = vperm.xlu1 %10554, %v8317_v40  }
 0xa44   : > { %v8199_v51 = vpop.xlane.xlu1 %8198 }
 0xa45   : > { %v8200_v49 = vrot.slane %v8199_v51, 4 }
 0xa47   : > { %v8201_v27 = vadd.f32 %v8200_v49, %v8199_v51 }
 0xa49   : > { %v8202_v10 = vrot.slane %v8201_v27, 2 }
 0xa4b   : > { %v8203_v19 = vadd.f32 %v8202_v10, %v8201_v27 }
 0xa4d   : > { %v8204_v25 = vrot.slane %v8203_v19, 1 }
 0xa4f   : > { %v8205_v41 = vadd.f32 %v8204_v25, %v8203_v19 }
 0xa51   : > { %10540 = vpush %v8205_v41 }
 0xa82   : > { %s10541_s17 = spop %10540 }
 0xa83   : > { %s8207_s18 = smul.f32 0.00048828125, %s10541_s17 }
 0xa85   : > { %s8208_s19 = sadd.f32 1e-05, %s8207_s18 }
 0xa87   : > { %v8209_v55 = vstv %s8208_s19 }
 0xa88   : > { %10670 = vrsqrt.f32 %v8209_v55 }
 0xa92   : > { %v10671_v39 = vpop.eup %10670 }
 0xa93   : > { %10542 = vpush %v10671_v39 }
 0xac4   : > { %s10543_s20 = spop %10542 }
 0xac5   : > { %v13854_v13 = vstv %s10543_s20 }
 0xac6   : > { %v8229_v54 = vmul.f32 %v13854_v13, %v13729_v47  ;;  %v8230_v62 = vmul.f32 %v13854_v13, %v13736_v20  ;;  %v8213_v34 = vmul.f32 %v13854_v13, %v13625_v23  ;;  %v8214_v30 = vmul.f32 %v13854_v13, %v13629_v11 }
 0xac7   : > { %v8231_v17 = vmul.f32 %v13854_v13, %v13743_v16  ;;  %v8215_v47 = vmul.f32 %v13854_v13, %v13633_v4  ;;  %v8232_v38 = vmul.f32 %v13854_v13, %v13750_v28  ;;  %v8216_v23 = vmul.f32 %v13854_v13, %v13637_v6 }
 0xac8   : > { %8277 = vxpose.xlu1.b32.start [1/16] (narrow) %v8229_v54, 8  ;;  %8245 = vxpose.xlu0.b32.start [1/16] (narrow) %v8213_v34, 8  ;;  %v8233_v20 = vmul.f32 %v13854_v13, %v13757_v60  ;;  %v8217_v11 = vmul.f32 %v13854_v13, %v13645_v22  ;;  %v8234_v16 = vmul.f32 %v13854_v13, %v13764_v58 }
 0xac9   : > { %v8218_v4 = vmul.f32 %v13854_v13, %v13651_v31  ;;  %v8235_v28 = vmul.f32 %v13854_v13, %v13771_v12  ;;  %v8219_v6 = vmul.f32 %v13854_v13, %v13659_v15  ;;  %v8236_v60 = vmul.f32 %v13854_v13, %v13778_v9 }
 0xaca   : > { %v8220_v22 = vmul.f32 %v13854_v13, %v13666_v36  ;;  %v8237_v58 = vmul.f32 %v13854_v13, %v13785_v43  ;;  %v8221_v31 = vmul.f32 %v13854_v13, %v13673_v44  ;;  %v8238_v12 = vmul.f32 %v13854_v13, %v13792_v50 }
 0xacb   : > { %v8222_v15 = vmul.f32 %v13854_v13, %v13680_v59  ;;  %v8239_v9 = vmul.f32 %v13854_v13, %v13799_v61  ;;  %v8223_v36 = vmul.f32 %v13854_v13, %v13687_v2  ;;  %v8240_v43 = vmul.f32 %v13854_v13, %v13806_v48 }
 0xacc   : > { %8278 = vxpose.xlu1.b32.cont [2/16] (narrow) %v8230_v62, 8  ;;  %8246 = vxpose.xlu0.b32.cont [2/16] (narrow) %v8214_v30, 8  ;;  %v8224_v44 = vmul.f32 %v13854_v13, %v13694_v21  ;;  %v8241_v50 = vmul.f32 %v13854_v13, %v13813_v42  ;;  %v8225_v59 = vmul.f32 %v13854_v13, %v13701_v35 }
 0xacd   : > { %v8242_v61 = vmul.f32 %v13854_v13, %v13820_v8  ;;  %v8226_v2 = vmul.f32 %v13854_v13, %v13708_v29  ;;  %v8243_v21 = vmul.f32 %v13854_v13, %v13827_v52  ;;  %v8227_v48 = vmul.f32 %v13854_v13, %v13715_v1  ;;  %v8313_v29 = vpop.permute.xlu1 %8312 }
 0xace   : > { %v8244_v35 = vmul.f32 %v13854_v13, %v13834_v24  ;;  %v8228_v42 = vmul.f32 %v13854_v13, %v13722_v37 }
 0xad0   : > { %8279 = vxpose.xlu1.b32.cont [3/16] (narrow) %v8231_v17, 8  ;;  %8247 = vxpose.xlu0.b32.cont [3/16] (narrow) %v8215_v47, 8 }
 0xad1   : > { %v8321_v8 = vpop.permute.xlu1 %8320 }
 0xad4   : > { %8280 = vxpose.xlu1.b32.cont [4/16] (narrow) %v8232_v38, 8  ;;  %8248 = vxpose.xlu0.b32.cont [4/16] (narrow) %v8216_v23, 8 }
 0xad8   : > { %8281 = vxpose.xlu1.b32.cont [5/16] (narrow) %v8233_v20, 8  ;;  %8249 = vxpose.xlu0.b32.cont [5/16] (narrow) %v8217_v11, 8 }
 0xadc   : > { %8282 = vxpose.xlu1.b32.cont [6/16] (narrow) %v8234_v16, 8  ;;  %8250 = vxpose.xlu0.b32.cont [6/16] (narrow) %v8218_v4, 8 }
 0xae0   : > { %8283 = vxpose.xlu1.b32.cont [7/16] (narrow) %v8235_v28, 8  ;;  %8251 = vxpose.xlu0.b32.cont [7/16] (narrow) %v8219_v6, 8 }
 0xae4   : > { %8284 = vxpose.xlu1.b32.cont [8/16] (narrow) %v8236_v60, 8  ;;  %8252 = vxpose.xlu0.b32.cont [8/16] (narrow) %v8220_v22, 8 }
 0xae8   : > { %8285 = vxpose.xlu1.b32.cont [9/16] (narrow) %v8237_v58, 8  ;;  %8253 = vxpose.xlu0.b32.cont [9/16] (narrow) %v8221_v31, 8 }
 0xaec   : > { %8286 = vxpose.xlu1.b32.cont [10/16] (narrow) %v8238_v12, 8  ;;  %8254 = vxpose.xlu0.b32.cont [10/16] (narrow) %v8222_v15, 8 }
 0xaf0   : > { %8287 = vxpose.xlu1.b32.cont [11/16] (narrow) %v8239_v9, 8  ;;  %8255 = vxpose.xlu0.b32.cont [11/16] (narrow) %v8223_v36, 8 }
 0xaf4   : > { %8288 = vxpose.xlu1.b32.cont [12/16] (narrow) %v8240_v43, 8  ;;  %8256 = vxpose.xlu0.b32.cont [12/16] (narrow) %v8224_v44, 8 }
 0xaf8   : > { %8289 = vxpose.xlu1.b32.cont [13/16] (narrow) %v8241_v50, 8  ;;  %8257 = vxpose.xlu0.b32.cont [13/16] (narrow) %v8225_v59, 8 }
 0xafc   : > { %8290 = vxpose.xlu1.b32.cont [14/16] (narrow) %v8242_v61, 8  ;;  %8258 = vxpose.xlu0.b32.cont [14/16] (narrow) %v8226_v2, 8 }
 0xb00   : > { %8291 = vxpose.xlu1.b32.cont [15/16] (narrow) %v8243_v21, 8  ;;  %8259 = vxpose.xlu0.b32.cont [15/16] (narrow) %v8227_v48, 8 }
 0xb04   : > { %8292 = vxpose.xlu1.b32.end [16/16] (narrow) %v8244_v35, 8  ;;  %8260 = vxpose.xlu0.b32.end [16/16] (narrow) %v8228_v42, 8 }
 0xb2d   : > { %10555 = vset.pattern.permute.xlu0 %v10685_v18 }
 0xb48   : > { %v8293_v52 = vpop.trf.xlu1  ;;  %v8261_v5 = vpop.trf.xlu0 }
 0xb49   : > { %v8316_v53 = vmul.f32 %v8313_v29, %v8293_v52  ;;  %v8315_v24 = vmul.f32 %v8313_v29, %v8261_v5 }
 0xb4b   : > { %v8324_v1 = vadd.f32 %v8321_v8, %v8316_v53  ;;  %v8323_v7 = vadd.f32 %v8321_v8, %v8315_v24 }
 0xb4d   : > { %8326 = vst [vmem:[%s278_s26 + $0x8] sm:$0xff] %v8324_v1  ;;  %8325 = vst [vmem:[%s278_s26] sm:$0xff] %v8323_v7 }
 0xb4e PF: > { %s17_s24 = sadd.s32 1, %s10682_s24  }
 0xb4f   : > { %p14_p4 = scmp.ge.s32.totalorder %s17_s24, 4  }
 0xb51   :  { %16 = sbr.rel (!%p14_p4) target bundleno = 1 (0x1), region = 98 }

</bundles_post_ra>
